<compile_context>
chip_gen: v6e
topology: v6e:2x2x1
jax: 0.10.0
libtpu: 0.0.40
codegen_flags: <defaults>
</compile_context>

<pallas_src>
import functools

import numpy as np

import jax
import jax.numpy as jnp
from jax.experimental import pallas as pl
from jax.experimental.pallas import tpu as pltpu

LRELU_SLOPE = 0.01   # nn.LeakyReLU() default
BN_EPS = 1e-5        # nn.BatchNorm2d default
NEG_BIG = -1e30      # stands in for -inf padding of MaxPool2d windows


# ----------------------------------------------------------------------------
# Fused Pallas kernel: whole Discriminator forward in one call.
# ----------------------------------------------------------------------------
def _disc_fused_kernel(p0_ref, w0_ref, b0_ref, g0_ref, be0_ref,
                       s1_ref, w1_ref, b1_ref, g1_ref, be1_ref,
                       sp_ref, pb_ref,
                       w2_ref, b2_ref, g2_ref, be2_ref,
                       w3_ref, b3_ref, g3_ref, be3_ref,
                       w4_ref, b4_ref,
                       o_ref):
    f32 = jnp.float32

    def bn_lrelu(x, g, b):
        # BatchNorm2d (training mode, biased variance) + LeakyReLU(0.01),
        # one-pass statistics: E[x], E[x^2].
        inv_m = 1.0 / x.shape[0]
        s = jnp.sum(x, axis=0, keepdims=True)
        ss = jnp.sum(x * x, axis=0, keepdims=True)
        mean = s * inv_m
        var = ss * inv_m - mean * mean
        y = (x - mean) * jax.lax.rsqrt(var + BN_EPS) * g + b
        return jnp.where(y >= 0, y, LRELU_SLOPE * y)

    def conv3x3(x, s_ref, w_ref, bias):
        # sum over the 9 taps of:  (select rows of x for this tap) @ W_tap
        # zero rows in the selection matrix implement the conv zero-padding.
        acc = None
        for t in range(9):
            win = jnp.dot(s_ref[t], x, preferred_element_type=f32)
            upd = jnp.dot(win, w_ref[t], preferred_element_type=f32)
            acc = upd if acc is None else acc + upd
        return acc + bias

    def maxpool3x3(x, s_ref, padbias_ref):
        # elementwise max over the 9 taps; padded taps get -1e30 via padbias.
        mx = None
        for t in range(9):
            win = jnp.dot(s_ref[t], x, preferred_element_type=f32) + padbias_ref[t]
            mx = win if mx is None else jnp.maximum(mx, win)
        return mx

    # Layer 0: Conv(Cin->96, 3, s2, p1) via pre-built im2col patches + BN + LReLU
    x = jnp.dot(p0_ref[...], w0_ref[...], preferred_element_type=f32) + b0_ref[...]
    x = bn_lrelu(x, g0_ref[...], be0_ref[...])                      # (B*8*8, 96)

    # Layer 1: Conv(96->64, 3, s2, p1) + BN + LReLU (windows built in-kernel)
    x = bn_lrelu(conv3x3(x, s1_ref, w1_ref, b1_ref[...]),
                 g1_ref[...], be1_ref[...])                         # (B*4*4, 64)

    # MaxPool2d(3, 1, 1) (windows built in-kernel, -inf padding)
    x = maxpool3x3(x, sp_ref, pb_ref)                               # (B*4*4, 64)

    # Layer 2: Conv(64->32, 3, s1, p1) + BN + LReLU (same spatial selection)
    x = bn_lrelu(conv3x3(x, sp_ref, w2_ref, b2_ref[...]),
                 g2_ref[...], be2_ref[...])                         # (B*4*4, 32)

    # Layer 3: Conv(32->32, 1x1) + BN + LReLU
    x = bn_lrelu(jnp.dot(x, w3_ref[...], preferred_element_type=f32) + b3_ref[...],
                 g3_ref[...], be3_ref[...])                         # (B*4*4, 32)

    # Layer 4: Conv(32->2, 1x1); N zero-padded to 128 for lane-dense stores.
    o_ref[...] = jnp.dot(x, w4_ref[...], preferred_element_type=f32) + b4_ref[...]


def _full_block(shape):
    n = len(shape)
    return pl.BlockSpec(shape, lambda *_, _n=n: (0,) * _n)


# ----------------------------------------------------------------------------
# Host-side helpers (trace-time constants / tiny XLA data movement)
# ----------------------------------------------------------------------------
@functools.lru_cache(maxsize=None)
def _conv_selection_np(B, H, W, k, stride, pad):
    """0/1 selection matrices: tap t maps the flattened (B*H*W, C) activation
    to the (B*Ho*Wo, C) shifted window; rows falling in the padding are zero.
    Also returns a validity mask per output row/tap (for maxpool -inf pad)."""
    Ho = (H + 2 * pad - k) // stride + 1
    Wo = (W + 2 * pad - k) // stride + 1
    S = np.zeros((k * k, B * Ho * Wo, B * H * W), np.float32)
    valid = np.zeros((k * k, B * Ho * Wo, 1), np.float32)
    for kh in range(k):
        for kw in range(k):
            t = kh * k + kw
            for b in range(B):
                for ho in range(Ho):
                    for wo in range(Wo):
                        hi = ho * stride + kh - pad
                        wi = wo * stride + kw - pad
                        if 0 <= hi < H and 0 <= wi < W:
                            r = (b * Ho + ho) * Wo + wo
                            c = (b * H + hi) * W + wi
                            S[t, r, c] = 1.0
                            valid[t, r, 0] = 1.0
    return S, valid, Ho, Wo


def _im2col(x, k, stride, pad):
    # x: (B, H, W, C) -> (B*Ho*Wo, k*k*C); K ordered (kh, kw, Cin).  Only used
    # for layer 0 whose input already lives in HBM (tiny: ~18 KB).
    B, H, W, C = x.shape
    xp = jnp.pad(x, ((0, 0), (pad, pad), (pad, pad), (0, 0)))
    Ho = (H + 2 * pad - k) // stride + 1
    Wo = (W + 2 * pad - k) // stride + 1
    cols = []
    for dh in range(k):
        for dw in range(k):
            cols.append(xp[:, dh:dh + stride * (Ho - 1) + 1:stride,
                           dw:dw + stride * (Wo - 1) + 1:stride, :])
    p = jnp.stack(cols, axis=3)                       # (B, Ho, Wo, k*k, C)
    return p.reshape(B * Ho * Wo, k * k * C), Ho, Wo


# ----------------------------------------------------------------------------
# Parameters & forward
# ----------------------------------------------------------------------------
def init_params(key, input_features):
    # Conv weights stored HWIO (kh, kw, Cin, Cout) == PyTorch (Cout,Cin,kh,kw)
    # permuted to (2, 3, 1, 0).
    conv_specs = [
        (3, 3, input_features, 96),
        (3, 3, 96, 64),
        (3, 3, 64, 32),
        (1, 1, 32, 32),
        (1, 1, 32, 2),
    ]
    params = {}
    for i, s in enumerate(conv_specs):
        key, kw_, kb_ = jax.random.split(key, 3)
        fan_in = s[0] * s[1] * s[2]
        params[f"w{i}"] = jax.random.normal(kw_, s, jnp.float32) / jnp.sqrt(fan_in)
        params[f"b{i}"] = 0.05 * jax.random.normal(kb_, (s[3],), jnp.float32)
    for i, c in enumerate([96, 64, 32, 32]):
        key, kg_, kb_ = jax.random.split(key, 3)
        params[f"gamma{i}"] = 1.0 + 0.1 * jax.random.normal(kg_, (c,), jnp.float32)
        params[f"beta{i}"] = 0.1 * jax.random.normal(kb_, (c,), jnp.float32)
    return params
# TODO(synk): BatchNorm running-stat (momentum) buffer updates are training
# bookkeeping and do not affect the forward output, so they are not emitted.


def discriminator_forward(params, x_nchw):
    x = jnp.transpose(x_nchw, (0, 2, 3, 1)).astype(jnp.float32)   # NCHW -> NHWC
    B, H, W, Cin = x.shape

    # Layer-0 im2col (tiny, on the raw HBM input).
    p0, Ho0, Wo0 = _im2col(x, 3, 2, 1)                            # (B*8*8, 9*Cin)

    # Static selection matrices for the in-kernel windows (trace-time consts).
    S1, _, Ho1, Wo1 = _conv_selection_np(B, Ho0, Wo0, 3, 2, 1)    # conv1 (s2)
    Sp, vp, Hp, Wp = _conv_selection_np(B, Ho1, Wo1, 3, 1, 1)     # maxpool & conv2
    pb = np.where(vp > 0.5, 0.0, NEG_BIG).astype(np.float32)      # (9, M1, 1)
    M1 = B * Ho1 * Wo1
    NPAD = 128

    # Weight / param reshapes (HWIO -> matmul layouts), final layer lane-padded.
    w0 = params["w0"].reshape(-1, 96)                              # (9*Cin, 96)
    w1 = params["w1"].reshape(9, 96, 64)
    w2 = params["w2"].reshape(9, 64, 32)
    w3 = params["w3"].reshape(32, 32)
    w4 = jnp.pad(params["w4"].reshape(32, 2), ((0, 0), (0, NPAD - 2)))
    b4 = jnp.pad(params["b4"], (0, NPAD - 2)).reshape(1, NPAD)

    args = (
        p0,
        w0, params["b0"].reshape(1, -1),
        params["gamma0"].reshape(1, -1), params["beta0"].reshape(1, -1),
        jnp.asarray(S1), w1, params["b1"].reshape(1, -1),
        params["gamma1"].reshape(1, -1), params["beta1"].reshape(1, -1),
        jnp.asarray(Sp), jnp.asarray(pb),
        w2, params["b2"].reshape(1, -1),
        params["gamma2"].reshape(1, -1), params["beta2"].reshape(1, -1),
        w3, params["b3"].reshape(1, -1),
        params["gamma3"].reshape(1, -1), params["beta3"].reshape(1, -1),
        w4, b4,
    )

    out = pl.pallas_call(
        _disc_fused_kernel,
        out_shape=jax.ShapeDtypeStruct((M1, NPAD), jnp.float32),
        grid=(1,),
        in_specs=[_full_block(tuple(a.shape)) for a in args],
        out_specs=_full_block((M1, NPAD)),
        compiler_params=pltpu.CompilerParams(
            dimension_semantics=("arbitrary",)),
    )(*args)

    # Lane-padded (M, 128) -> (M, 2); row order == permute(0,2,3,1).view(-1,2).
    return out[:, :2]


if __name__ == "__main__":
    key = jax.random.PRNGKey(0)
    kx, kp = jax.random.split(key)

    input_features = 4
    x = jax.random.normal(kx, (2, input_features, 16, 16), jnp.float32)
    params = init_params(kp, input_features)

    fwd = jax.jit(functools.partial(discriminator_forward, params))
    out = fwd(x)
    jax.block_until_ready(out)

    # 16x16 -> 8x8 (s2) -> 4x4 (s2) -> 4x4 (pool / convs); 2*4*4 rows x 2 cols
    assert out.shape == (2 * 4 * 4, 2), out.shape
    assert out.dtype == jnp.float32
    print("KERNEL_OK")
</pallas_src>

<mosaic_0001>
module attributes {stable_mosaic.version = 11 : i64} {
  func.func @_disc_fused_kernel(%arg0: i32, %arg1: memref<128x36xf32, #tpu.memory_space<vmem>>, %arg2: memref<36x96xf32, #tpu.memory_space<vmem>>, %arg3: memref<1x96xf32, #tpu.memory_space<vmem>>, %arg4: memref<1x96xf32, #tpu.memory_space<vmem>>, %arg5: memref<1x96xf32, #tpu.memory_space<vmem>>, %arg6: memref<9x32x128xf32, #tpu.memory_space<vmem>>, %arg7: memref<9x96x64xf32, #tpu.memory_space<vmem>>, %arg8: memref<1x64xf32, #tpu.memory_space<vmem>>, %arg9: memref<1x64xf32, #tpu.memory_space<vmem>>, %arg10: memref<1x64xf32, #tpu.memory_space<vmem>>, %arg11: memref<9x32x32xf32, #tpu.memory_space<vmem>>, %arg12: memref<9x32x1xf32, #tpu.memory_space<vmem>>, %arg13: memref<9x64x32xf32, #tpu.memory_space<vmem>>, %arg14: memref<1x32xf32, #tpu.memory_space<vmem>>, %arg15: memref<1x32xf32, #tpu.memory_space<vmem>>, %arg16: memref<1x32xf32, #tpu.memory_space<vmem>>, %arg17: memref<32x32xf32, #tpu.memory_space<vmem>>, %arg18: memref<1x32xf32, #tpu.memory_space<vmem>>, %arg19: memref<1x32xf32, #tpu.memory_space<vmem>>, %arg20: memref<1x32xf32, #tpu.memory_space<vmem>>, %arg21: memref<32x128xf32, #tpu.memory_space<vmem>>, %arg22: memref<1x128xf32, #tpu.memory_space<vmem>>, %arg23: memref<32x128xf32, #tpu.memory_space<vmem>>) attributes {dimension_semantics = [#tpu.dimension_semantics<arbitrary>], iteration_bounds = array<i64: 1>, scalar_prefetch = 0 : i64, scratch_operands = 0 : i64, tpu.core_type = #tpu.core_type<tc>, window_params = [{pipeline_mode = #tpu.pipeline_mode<synchronous>, transform_indices = @transform_0, window_bounds = array<i64: 128, 36>}, {pipeline_mode = #tpu.pipeline_mode<synchronous>, transform_indices = @transform_1, window_bounds = array<i64: 36, 96>}, {pipeline_mode = #tpu.pipeline_mode<synchronous>, transform_indices = @transform_2, window_bounds = array<i64: 1, 96>}, {pipeline_mode = #tpu.pipeline_mode<synchronous>, transform_indices = @transform_3, window_bounds = array<i64: 1, 96>}, {pipeline_mode = #tpu.pipeline_mode<synchronous>, transform_indices = @transform_4, window_bounds = array<i64: 1, 96>}, {pipeline_mode = #tpu.pipeline_mode<synchronous>, transform_indices = @transform_5, window_bounds = array<i64: 9, 32, 128>}, {pipeline_mode = #tpu.pipeline_mode<synchronous>, transform_indices = @transform_6, window_bounds = array<i64: 9, 96, 64>}, {pipeline_mode = #tpu.pipeline_mode<synchronous>, transform_indices = @transform_7, window_bounds = array<i64: 1, 64>}, {pipeline_mode = #tpu.pipeline_mode<synchronous>, transform_indices = @transform_8, window_bounds = array<i64: 1, 64>}, {pipeline_mode = #tpu.pipeline_mode<synchronous>, transform_indices = @transform_9, window_bounds = array<i64: 1, 64>}, {pipeline_mode = #tpu.pipeline_mode<synchronous>, transform_indices = @transform_10, window_bounds = array<i64: 9, 32, 32>}, {pipeline_mode = #tpu.pipeline_mode<synchronous>, transform_indices = @transform_11, window_bounds = array<i64: 9, 32, 1>}, {pipeline_mode = #tpu.pipeline_mode<synchronous>, transform_indices = @transform_12, window_bounds = array<i64: 9, 64, 32>}, {pipeline_mode = #tpu.pipeline_mode<synchronous>, transform_indices = @transform_13, window_bounds = array<i64: 1, 32>}, {pipeline_mode = #tpu.pipeline_mode<synchronous>, transform_indices = @transform_14, window_bounds = array<i64: 1, 32>}, {pipeline_mode = #tpu.pipeline_mode<synchronous>, transform_indices = @transform_15, window_bounds = array<i64: 1, 32>}, {pipeline_mode = #tpu.pipeline_mode<synchronous>, transform_indices = @transform_16, window_bounds = array<i64: 32, 32>}, {pipeline_mode = #tpu.pipeline_mode<synchronous>, transform_indices = @transform_17, window_bounds = array<i64: 1, 32>}, {pipeline_mode = #tpu.pipeline_mode<synchronous>, transform_indices = @transform_18, window_bounds = array<i64: 1, 32>}, {pipeline_mode = #tpu.pipeline_mode<synchronous>, transform_indices = @transform_19, window_bounds = array<i64: 1, 32>}, {pipeline_mode = #tpu.pipeline_mode<synchronous>, transform_indices = @transform_20, window_bounds = array<i64: 32, 128>}, {pipeline_mode = #tpu.pipeline_mode<synchronous>, transform_indices = @transform_21, window_bounds = array<i64: 1, 128>}, {pipeline_mode = #tpu.pipeline_mode<synchronous>, transform_indices = @transform_22, window_bounds = array<i64: 32, 128>}]} {
    %c0 = arith.constant 0 : index
    %c0_0 = arith.constant 0 : index
    %0 = vector.load %arg1[%c0, %c0_0] : memref<128x36xf32, #tpu.memory_space<vmem>>, vector<128x36xf32>
    %c0_1 = arith.constant 0 : index
    %c0_2 = arith.constant 0 : index
    %1 = vector.load %arg2[%c0_1, %c0_2] : memref<36x96xf32, #tpu.memory_space<vmem>>, vector<36x96xf32>
    %cst = arith.constant dense<0.000000e+00> : vector<128x96xf32>
    %2 = tpu.matmul %0, %1, %cst {dimension_numbers = #tpu.dot_dimension_numbers<[1], [0], [0], [1], [0, 0, 1, 1], [], []>} : vector<128x36xf32>, vector<36x96xf32>, vector<128x96xf32> -> vector<128x96xf32>
    %c0_3 = arith.constant 0 : index
    %c0_4 = arith.constant 0 : index
    %3 = vector.load %arg3[%c0_3, %c0_4] : memref<1x96xf32, #tpu.memory_space<vmem>>, vector<1x96xf32>
    %4 = vector.broadcast %3 : vector<1x96xf32> to vector<128x96xf32>
    %5 = arith.addf %2, %4 : vector<128x96xf32>
    %c0_5 = arith.constant 0 : index
    %c0_6 = arith.constant 0 : index
    %6 = vector.load %arg4[%c0_5, %c0_6] : memref<1x96xf32, #tpu.memory_space<vmem>>, vector<1x96xf32>
    %c0_7 = arith.constant 0 : index
    %c0_8 = arith.constant 0 : index
    %7 = vector.load %arg5[%c0_7, %c0_8] : memref<1x96xf32, #tpu.memory_space<vmem>>, vector<1x96xf32>
    %cst_9 = arith.constant dense<0.000000e+00> : vector<96xf32>
    %8 = vector.multi_reduction <add>, %5, %cst_9 [0] : vector<128x96xf32> to vector<96xf32>
    %9 = vector.shape_cast %8 : vector<96xf32> to vector<1x96xf32>
    %10 = arith.mulf %5, %5 : vector<128x96xf32>
    %cst_10 = arith.constant dense<0.000000e+00> : vector<96xf32>
    %11 = vector.multi_reduction <add>, %10, %cst_10 [0] : vector<128x96xf32> to vector<96xf32>
    %12 = vector.shape_cast %11 : vector<96xf32> to vector<1x96xf32>
    %cst_11 = arith.constant 7.812500e-03 : f32
    %13 = vector.broadcast %cst_11 : f32 to vector<1x96xf32>
    %14 = arith.mulf %9, %13 : vector<1x96xf32>
    %cst_12 = arith.constant 7.812500e-03 : f32
    %15 = vector.broadcast %cst_12 : f32 to vector<1x96xf32>
    %16 = arith.mulf %12, %15 : vector<1x96xf32>
    %17 = arith.mulf %14, %14 : vector<1x96xf32>
    %18 = arith.subf %16, %17 : vector<1x96xf32>
    %19 = vector.broadcast %14 : vector<1x96xf32> to vector<128x96xf32>
    %20 = arith.subf %5, %19 : vector<128x96xf32>
    %cst_13 = arith.constant 9.99999974E-6 : f32
    %21 = vector.broadcast %cst_13 : f32 to vector<1x96xf32>
    %22 = arith.addf %18, %21 : vector<1x96xf32>
    %23 = math.rsqrt %22 : vector<1x96xf32>
    %24 = vector.broadcast %23 : vector<1x96xf32> to vector<128x96xf32>
    %25 = arith.mulf %20, %24 : vector<128x96xf32>
    %26 = vector.broadcast %6 : vector<1x96xf32> to vector<128x96xf32>
    %27 = arith.mulf %25, %26 : vector<128x96xf32>
    %28 = vector.broadcast %7 : vector<1x96xf32> to vector<128x96xf32>
    %29 = arith.addf %27, %28 : vector<128x96xf32>
    %cst_14 = arith.constant 0.000000e+00 : f32
    %30 = vector.broadcast %cst_14 : f32 to vector<128x96xf32>
    %31 = arith.cmpf oge, %29, %30 : vector<128x96xf32>
    %cst_15 = arith.constant 0.00999999977 : f32
    %32 = vector.broadcast %cst_15 : f32 to vector<128x96xf32>
    %33 = arith.mulf %32, %29 : vector<128x96xf32>
    %34 = arith.select %31, %29, %33 : vector<128x96xi1>, vector<128x96xf32>
    %c0_16 = arith.constant 0 : index
    %c0_17 = arith.constant 0 : index
    %35 = vector.load %arg8[%c0_16, %c0_17] : memref<1x64xf32, #tpu.memory_space<vmem>>, vector<1x64xf32>
    %c0_18 = arith.constant 0 : index
    %c0_19 = arith.constant 0 : index
    %c0_20 = arith.constant 0 : index
    %36 = vector.load %arg6[%c0_18, %c0_19, %c0_20] : memref<9x32x128xf32, #tpu.memory_space<vmem>>, vector<1x32x128xf32>
    %37 = vector.shape_cast %36 : vector<1x32x128xf32> to vector<32x128xf32>
    %cst_21 = arith.constant dense<0.000000e+00> : vector<32x96xf32>
    %38 = tpu.matmul %37, %34, %cst_21 {dimension_numbers = #tpu.dot_dimension_numbers<[1], [0], [0], [1], [0, 0, 1, 1], [], []>} : vector<32x128xf32>, vector<128x96xf32>, vector<32x96xf32> -> vector<32x96xf32>
    %c0_22 = arith.constant 0 : index
    %c0_23 = arith.constant 0 : index
    %c0_24 = arith.constant 0 : index
    %39 = vector.load %arg7[%c0_22, %c0_23, %c0_24] : memref<9x96x64xf32, #tpu.memory_space<vmem>>, vector<1x96x64xf32>
    %40 = vector.shape_cast %39 : vector<1x96x64xf32> to vector<96x64xf32>
    %cst_25 = arith.constant dense<0.000000e+00> : vector<32x64xf32>
    %41 = tpu.matmul %38, %40, %cst_25 {dimension_numbers = #tpu.dot_dimension_numbers<[1], [0], [0], [1], [0, 0, 1, 1], [], []>} : vector<32x96xf32>, vector<96x64xf32>, vector<32x64xf32> -> vector<32x64xf32>
    %c1 = arith.constant 1 : index
    %c0_26 = arith.constant 0 : index
    %c0_27 = arith.constant 0 : index
    %42 = vector.load %arg6[%c1, %c0_26, %c0_27] : memref<9x32x128xf32, #tpu.memory_space<vmem>>, vector<1x32x128xf32>
    %43 = vector.shape_cast %42 : vector<1x32x128xf32> to vector<32x128xf32>
    %cst_28 = arith.constant dense<0.000000e+00> : vector<32x96xf32>
    %44 = tpu.matmul %43, %34, %cst_28 {dimension_numbers = #tpu.dot_dimension_numbers<[1], [0], [0], [1], [0, 0, 1, 1], [], []>} : vector<32x128xf32>, vector<128x96xf32>, vector<32x96xf32> -> vector<32x96xf32>
    %c1_29 = arith.constant 1 : index
    %c0_30 = arith.constant 0 : index
    %c0_31 = arith.constant 0 : index
    %45 = vector.load %arg7[%c1_29, %c0_30, %c0_31] : memref<9x96x64xf32, #tpu.memory_space<vmem>>, vector<1x96x64xf32>
    %46 = vector.shape_cast %45 : vector<1x96x64xf32> to vector<96x64xf32>
    %cst_32 = arith.constant dense<0.000000e+00> : vector<32x64xf32>
    %47 = tpu.matmul %44, %46, %cst_32 {dimension_numbers = #tpu.dot_dimension_numbers<[1], [0], [0], [1], [0, 0, 1, 1], [], []>} : vector<32x96xf32>, vector<96x64xf32>, vector<32x64xf32> -> vector<32x64xf32>
    %48 = arith.addf %41, %47 : vector<32x64xf32>
    %c2 = arith.constant 2 : index
    %c0_33 = arith.constant 0 : index
    %c0_34 = arith.constant 0 : index
    %49 = vector.load %arg6[%c2, %c0_33, %c0_34] : memref<9x32x128xf32, #tpu.memory_space<vmem>>, vector<1x32x128xf32>
    %50 = vector.shape_cast %49 : vector<1x32x128xf32> to vector<32x128xf32>
    %cst_35 = arith.constant dense<0.000000e+00> : vector<32x96xf32>
    %51 = tpu.matmul %50, %34, %cst_35 {dimension_numbers = #tpu.dot_dimension_numbers<[1], [0], [0], [1], [0, 0, 1, 1], [], []>} : vector<32x128xf32>, vector<128x96xf32>, vector<32x96xf32> -> vector<32x96xf32>
    %c2_36 = arith.constant 2 : index
    %c0_37 = arith.constant 0 : index
    %c0_38 = arith.constant 0 : index
    %52 = vector.load %arg7[%c2_36, %c0_37, %c0_38] : memref<9x96x64xf32, #tpu.memory_space<vmem>>, vector<1x96x64xf32>
    %53 = vector.shape_cast %52 : vector<1x96x64xf32> to vector<96x64xf32>
    %cst_39 = arith.constant dense<0.000000e+00> : vector<32x64xf32>
    %54 = tpu.matmul %51, %53, %cst_39 {dimension_numbers = #tpu.dot_dimension_numbers<[1], [0], [0], [1], [0, 0, 1, 1], [], []>} : vector<32x96xf32>, vector<96x64xf32>, vector<32x64xf32> -> vector<32x64xf32>
    %55 = arith.addf %48, %54 : vector<32x64xf32>
    %c3 = arith.constant 3 : index
    %c0_40 = arith.constant 0 : index
    %c0_41 = arith.constant 0 : index
    %56 = vector.load %arg6[%c3, %c0_40, %c0_41] : memref<9x32x128xf32, #tpu.memory_space<vmem>>, vector<1x32x128xf32>
    %57 = vector.shape_cast %56 : vector<1x32x128xf32> to vector<32x128xf32>
    %cst_42 = arith.constant dense<0.000000e+00> : vector<32x96xf32>
    %58 = tpu.matmul %57, %34, %cst_42 {dimension_numbers = #tpu.dot_dimension_numbers<[1], [0], [0], [1], [0, 0, 1, 1], [], []>} : vector<32x128xf32>, vector<128x96xf32>, vector<32x96xf32> -> vector<32x96xf32>
    %c3_43 = arith.constant 3 : index
    %c0_44 = arith.constant 0 : index
    %c0_45 = arith.constant 0 : index
    %59 = vector.load %arg7[%c3_43, %c0_44, %c0_45] : memref<9x96x64xf32, #tpu.memory_space<vmem>>, vector<1x96x64xf32>
    %60 = vector.shape_cast %59 : vector<1x96x64xf32> to vector<96x64xf32>
    %cst_46 = arith.constant dense<0.000000e+00> : vector<32x64xf32>
    %61 = tpu.matmul %58, %60, %cst_46 {dimension_numbers = #tpu.dot_dimension_numbers<[1], [0], [0], [1], [0, 0, 1, 1], [], []>} : vector<32x96xf32>, vector<96x64xf32>, vector<32x64xf32> -> vector<32x64xf32>
    %62 = arith.addf %55, %61 : vector<32x64xf32>
    %c4 = arith.constant 4 : index
    %c0_47 = arith.constant 0 : index
    %c0_48 = arith.constant 0 : index
    %63 = vector.load %arg6[%c4, %c0_47, %c0_48] : memref<9x32x128xf32, #tpu.memory_space<vmem>>, vector<1x32x128xf32>
    %64 = vector.shape_cast %63 : vector<1x32x128xf32> to vector<32x128xf32>
    %cst_49 = arith.constant dense<0.000000e+00> : vector<32x96xf32>
    %65 = tpu.matmul %64, %34, %cst_49 {dimension_numbers = #tpu.dot_dimension_numbers<[1], [0], [0], [1], [0, 0, 1, 1], [], []>} : vector<32x128xf32>, vector<128x96xf32>, vector<32x96xf32> -> vector<32x96xf32>
    %c4_50 = arith.constant 4 : index
    %c0_51 = arith.constant 0 : index
    %c0_52 = arith.constant 0 : index
    %66 = vector.load %arg7[%c4_50, %c0_51, %c0_52] : memref<9x96x64xf32, #tpu.memory_space<vmem>>, vector<1x96x64xf32>
    %67 = vector.shape_cast %66 : vector<1x96x64xf32> to vector<96x64xf32>
    %cst_53 = arith.constant dense<0.000000e+00> : vector<32x64xf32>
    %68 = tpu.matmul %65, %67, %cst_53 {dimension_numbers = #tpu.dot_dimension_numbers<[1], [0], [0], [1], [0, 0, 1, 1], [], []>} : vector<32x96xf32>, vector<96x64xf32>, vector<32x64xf32> -> vector<32x64xf32>
    %69 = arith.addf %62, %68 : vector<32x64xf32>
    %c5 = arith.constant 5 : index
    %c0_54 = arith.constant 0 : index
    %c0_55 = arith.constant 0 : index
    %70 = vector.load %arg6[%c5, %c0_54, %c0_55] : memref<9x32x128xf32, #tpu.memory_space<vmem>>, vector<1x32x128xf32>
    %71 = vector.shape_cast %70 : vector<1x32x128xf32> to vector<32x128xf32>
    %cst_56 = arith.constant dense<0.000000e+00> : vector<32x96xf32>
    %72 = tpu.matmul %71, %34, %cst_56 {dimension_numbers = #tpu.dot_dimension_numbers<[1], [0], [0], [1], [0, 0, 1, 1], [], []>} : vector<32x128xf32>, vector<128x96xf32>, vector<32x96xf32> -> vector<32x96xf32>
    %c5_57 = arith.constant 5 : index
    %c0_58 = arith.constant 0 : index
    %c0_59 = arith.constant 0 : index
    %73 = vector.load %arg7[%c5_57, %c0_58, %c0_59] : memref<9x96x64xf32, #tpu.memory_space<vmem>>, vector<1x96x64xf32>
    %74 = vector.shape_cast %73 : vector<1x96x64xf32> to vector<96x64xf32>
    %cst_60 = arith.constant dense<0.000000e+00> : vector<32x64xf32>
    %75 = tpu.matmul %72, %74, %cst_60 {dimension_numbers = #tpu.dot_dimension_numbers<[1], [0], [0], [1], [0, 0, 1, 1], [], []>} : vector<32x96xf32>, vector<96x64xf32>, vector<32x64xf32> -> vector<32x64xf32>
    %76 = arith.addf %69, %75 : vector<32x64xf32>
    %c6 = arith.constant 6 : index
    %c0_61 = arith.constant 0 : index
    %c0_62 = arith.constant 0 : index
    %77 = vector.load %arg6[%c6, %c0_61, %c0_62] : memref<9x32x128xf32, #tpu.memory_space<vmem>>, vector<1x32x128xf32>
    %78 = vector.shape_cast %77 : vector<1x32x128xf32> to vector<32x128xf32>
    %cst_63 = arith.constant dense<0.000000e+00> : vector<32x96xf32>
    %79 = tpu.matmul %78, %34, %cst_63 {dimension_numbers = #tpu.dot_dimension_numbers<[1], [0], [0], [1], [0, 0, 1, 1], [], []>} : vector<32x128xf32>, vector<128x96xf32>, vector<32x96xf32> -> vector<32x96xf32>
    %c6_64 = arith.constant 6 : index
    %c0_65 = arith.constant 0 : index
    %c0_66 = arith.constant 0 : index
    %80 = vector.load %arg7[%c6_64, %c0_65, %c0_66] : memref<9x96x64xf32, #tpu.memory_space<vmem>>, vector<1x96x64xf32>
    %81 = vector.shape_cast %80 : vector<1x96x64xf32> to vector<96x64xf32>
    %cst_67 = arith.constant dense<0.000000e+00> : vector<32x64xf32>
    %82 = tpu.matmul %79, %81, %cst_67 {dimension_numbers = #tpu.dot_dimension_numbers<[1], [0], [0], [1], [0, 0, 1, 1], [], []>} : vector<32x96xf32>, vector<96x64xf32>, vector<32x64xf32> -> vector<32x64xf32>
    %83 = arith.addf %76, %82 : vector<32x64xf32>
    %c7 = arith.constant 7 : index
    %c0_68 = arith.constant 0 : index
    %c0_69 = arith.constant 0 : index
    %84 = vector.load %arg6[%c7, %c0_68, %c0_69] : memref<9x32x128xf32, #tpu.memory_space<vmem>>, vector<1x32x128xf32>
    %85 = vector.shape_cast %84 : vector<1x32x128xf32> to vector<32x128xf32>
    %cst_70 = arith.constant dense<0.000000e+00> : vector<32x96xf32>
    %86 = tpu.matmul %85, %34, %cst_70 {dimension_numbers = #tpu.dot_dimension_numbers<[1], [0], [0], [1], [0, 0, 1, 1], [], []>} : vector<32x128xf32>, vector<128x96xf32>, vector<32x96xf32> -> vector<32x96xf32>
    %c7_71 = arith.constant 7 : index
    %c0_72 = arith.constant 0 : index
    %c0_73 = arith.constant 0 : index
    %87 = vector.load %arg7[%c7_71, %c0_72, %c0_73] : memref<9x96x64xf32, #tpu.memory_space<vmem>>, vector<1x96x64xf32>
    %88 = vector.shape_cast %87 : vector<1x96x64xf32> to vector<96x64xf32>
    %cst_74 = arith.constant dense<0.000000e+00> : vector<32x64xf32>
    %89 = tpu.matmul %86, %88, %cst_74 {dimension_numbers = #tpu.dot_dimension_numbers<[1], [0], [0], [1], [0, 0, 1, 1], [], []>} : vector<32x96xf32>, vector<96x64xf32>, vector<32x64xf32> -> vector<32x64xf32>
    %90 = arith.addf %83, %89 : vector<32x64xf32>
    %c8 = arith.constant 8 : index
    %c0_75 = arith.constant 0 : index
    %c0_76 = arith.constant 0 : index
    %91 = vector.load %arg6[%c8, %c0_75, %c0_76] : memref<9x32x128xf32, #tpu.memory_space<vmem>>, vector<1x32x128xf32>
    %92 = vector.shape_cast %91 : vector<1x32x128xf32> to vector<32x128xf32>
    %cst_77 = arith.constant dense<0.000000e+00> : vector<32x96xf32>
    %93 = tpu.matmul %92, %34, %cst_77 {dimension_numbers = #tpu.dot_dimension_numbers<[1], [0], [0], [1], [0, 0, 1, 1], [], []>} : vector<32x128xf32>, vector<128x96xf32>, vector<32x96xf32> -> vector<32x96xf32>
    %c8_78 = arith.constant 8 : index
    %c0_79 = arith.constant 0 : index
    %c0_80 = arith.constant 0 : index
    %94 = vector.load %arg7[%c8_78, %c0_79, %c0_80] : memref<9x96x64xf32, #tpu.memory_space<vmem>>, vector<1x96x64xf32>
    %95 = vector.shape_cast %94 : vector<1x96x64xf32> to vector<96x64xf32>
    %cst_81 = arith.constant dense<0.000000e+00> : vector<32x64xf32>
    %96 = tpu.matmul %93, %95, %cst_81 {dimension_numbers = #tpu.dot_dimension_numbers<[1], [0], [0], [1], [0, 0, 1, 1], [], []>} : vector<32x96xf32>, vector<96x64xf32>, vector<32x64xf32> -> vector<32x64xf32>
    %97 = arith.addf %90, %96 : vector<32x64xf32>
    %98 = vector.broadcast %35 : vector<1x64xf32> to vector<32x64xf32>
    %99 = arith.addf %97, %98 : vector<32x64xf32>
    %c0_82 = arith.constant 0 : index
    %c0_83 = arith.constant 0 : index
    %100 = vector.load %arg9[%c0_82, %c0_83] : memref<1x64xf32, #tpu.memory_space<vmem>>, vector<1x64xf32>
    %c0_84 = arith.constant 0 : index
    %c0_85 = arith.constant 0 : index
    %101 = vector.load %arg10[%c0_84, %c0_85] : memref<1x64xf32, #tpu.memory_space<vmem>>, vector<1x64xf32>
    %cst_86 = arith.constant dense<0.000000e+00> : vector<64xf32>
    %102 = vector.multi_reduction <add>, %99, %cst_86 [0] : vector<32x64xf32> to vector<64xf32>
    %103 = vector.shape_cast %102 : vector<64xf32> to vector<1x64xf32>
    %104 = arith.mulf %99, %99 : vector<32x64xf32>
    %cst_87 = arith.constant dense<0.000000e+00> : vector<64xf32>
    %105 = vector.multi_reduction <add>, %104, %cst_87 [0] : vector<32x64xf32> to vector<64xf32>
    %106 = vector.shape_cast %105 : vector<64xf32> to vector<1x64xf32>
    %cst_88 = arith.constant 3.125000e-02 : f32
    %107 = vector.broadcast %cst_88 : f32 to vector<1x64xf32>
    %108 = arith.mulf %103, %107 : vector<1x64xf32>
    %cst_89 = arith.constant 3.125000e-02 : f32
    %109 = vector.broadcast %cst_89 : f32 to vector<1x64xf32>
    %110 = arith.mulf %106, %109 : vector<1x64xf32>
    %111 = arith.mulf %108, %108 : vector<1x64xf32>
    %112 = arith.subf %110, %111 : vector<1x64xf32>
    %113 = vector.broadcast %108 : vector<1x64xf32> to vector<32x64xf32>
    %114 = arith.subf %99, %113 : vector<32x64xf32>
    %cst_90 = arith.constant 9.99999974E-6 : f32
    %115 = vector.broadcast %cst_90 : f32 to vector<1x64xf32>
    %116 = arith.addf %112, %115 : vector<1x64xf32>
    %117 = math.rsqrt %116 : vector<1x64xf32>
    %118 = vector.broadcast %117 : vector<1x64xf32> to vector<32x64xf32>
    %119 = arith.mulf %114, %118 : vector<32x64xf32>
    %120 = vector.broadcast %100 : vector<1x64xf32> to vector<32x64xf32>
    %121 = arith.mulf %119, %120 : vector<32x64xf32>
    %122 = vector.broadcast %101 : vector<1x64xf32> to vector<32x64xf32>
    %123 = arith.addf %121, %122 : vector<32x64xf32>
    %cst_91 = arith.constant 0.000000e+00 : f32
    %124 = vector.broadcast %cst_91 : f32 to vector<32x64xf32>
    %125 = arith.cmpf oge, %123, %124 : vector<32x64xf32>
    %cst_92 = arith.constant 0.00999999977 : f32
    %126 = vector.broadcast %cst_92 : f32 to vector<32x64xf32>
    %127 = arith.mulf %126, %123 : vector<32x64xf32>
    %128 = arith.select %125, %123, %127 : vector<32x64xi1>, vector<32x64xf32>
    %c0_93 = arith.constant 0 : index
    %c0_94 = arith.constant 0 : index
    %c0_95 = arith.constant 0 : index
    %129 = vector.load %arg11[%c0_93, %c0_94, %c0_95] : memref<9x32x32xf32, #tpu.memory_space<vmem>>, vector<1x32x32xf32>
    %130 = vector.shape_cast %129 : vector<1x32x32xf32> to vector<32x32xf32>
    %cst_96 = arith.constant dense<0.000000e+00> : vector<32x64xf32>
    %131 = tpu.matmul %130, %128, %cst_96 {dimension_numbers = #tpu.dot_dimension_numbers<[1], [0], [0], [1], [0, 0, 1, 1], [], []>} : vector<32x32xf32>, vector<32x64xf32>, vector<32x64xf32> -> vector<32x64xf32>
    %c0_97 = arith.constant 0 : index
    %c0_98 = arith.constant 0 : index
    %c0_99 = arith.constant 0 : index
    %132 = vector.load %arg12[%c0_97, %c0_98, %c0_99] : memref<9x32x1xf32, #tpu.memory_space<vmem>>, vector<1x32x1xf32>
    %133 = vector.shape_cast %132 : vector<1x32x1xf32> to vector<32x1xf32>
    %134 = vector.broadcast %133 : vector<32x1xf32> to vector<32x64xf32>
    %135 = arith.addf %131, %134 : vector<32x64xf32>
    %c1_100 = arith.constant 1 : index
    %c0_101 = arith.constant 0 : index
    %c0_102 = arith.constant 0 : index
    %136 = vector.load %arg11[%c1_100, %c0_101, %c0_102] : memref<9x32x32xf32, #tpu.memory_space<vmem>>, vector<1x32x32xf32>
    %137 = vector.shape_cast %136 : vector<1x32x32xf32> to vector<32x32xf32>
    %cst_103 = arith.constant dense<0.000000e+00> : vector<32x64xf32>
    %138 = tpu.matmul %137, %128, %cst_103 {dimension_numbers = #tpu.dot_dimension_numbers<[1], [0], [0], [1], [0, 0, 1, 1], [], []>} : vector<32x32xf32>, vector<32x64xf32>, vector<32x64xf32> -> vector<32x64xf32>
    %c1_104 = arith.constant 1 : index
    %c0_105 = arith.constant 0 : index
    %c0_106 = arith.constant 0 : index
    %139 = vector.load %arg12[%c1_104, %c0_105, %c0_106] : memref<9x32x1xf32, #tpu.memory_space<vmem>>, vector<1x32x1xf32>
    %140 = vector.shape_cast %139 : vector<1x32x1xf32> to vector<32x1xf32>
    %141 = vector.broadcast %140 : vector<32x1xf32> to vector<32x64xf32>
    %142 = arith.addf %138, %141 : vector<32x64xf32>
    %143 = arith.maximumf %135, %142 : vector<32x64xf32>
    %c2_107 = arith.constant 2 : index
    %c0_108 = arith.constant 0 : index
    %c0_109 = arith.constant 0 : index
    %144 = vector.load %arg11[%c2_107, %c0_108, %c0_109] : memref<9x32x32xf32, #tpu.memory_space<vmem>>, vector<1x32x32xf32>
    %145 = vector.shape_cast %144 : vector<1x32x32xf32> to vector<32x32xf32>
    %cst_110 = arith.constant dense<0.000000e+00> : vector<32x64xf32>
    %146 = tpu.matmul %145, %128, %cst_110 {dimension_numbers = #tpu.dot_dimension_numbers<[1], [0], [0], [1], [0, 0, 1, 1], [], []>} : vector<32x32xf32>, vector<32x64xf32>, vector<32x64xf32> -> vector<32x64xf32>
    %c2_111 = arith.constant 2 : index
    %c0_112 = arith.constant 0 : index
    %c0_113 = arith.constant 0 : index
    %147 = vector.load %arg12[%c2_111, %c0_112, %c0_113] : memref<9x32x1xf32, #tpu.memory_space<vmem>>, vector<1x32x1xf32>
    %148 = vector.shape_cast %147 : vector<1x32x1xf32> to vector<32x1xf32>
    %149 = vector.broadcast %148 : vector<32x1xf32> to vector<32x64xf32>
    %150 = arith.addf %146, %149 : vector<32x64xf32>
    %151 = arith.maximumf %143, %150 : vector<32x64xf32>
    %c3_114 = arith.constant 3 : index
    %c0_115 = arith.constant 0 : index
    %c0_116 = arith.constant 0 : index
    %152 = vector.load %arg11[%c3_114, %c0_115, %c0_116] : memref<9x32x32xf32, #tpu.memory_space<vmem>>, vector<1x32x32xf32>
    %153 = vector.shape_cast %152 : vector<1x32x32xf32> to vector<32x32xf32>
    %cst_117 = arith.constant dense<0.000000e+00> : vector<32x64xf32>
    %154 = tpu.matmul %153, %128, %cst_117 {dimension_numbers = #tpu.dot_dimension_numbers<[1], [0], [0], [1], [0, 0, 1, 1], [], []>} : vector<32x32xf32>, vector<32x64xf32>, vector<32x64xf32> -> vector<32x64xf32>
    %c3_118 = arith.constant 3 : index
    %c0_119 = arith.constant 0 : index
    %c0_120 = arith.constant 0 : index
    %155 = vector.load %arg12[%c3_118, %c0_119, %c0_120] : memref<9x32x1xf32, #tpu.memory_space<vmem>>, vector<1x32x1xf32>
    %156 = vector.shape_cast %155 : vector<1x32x1xf32> to vector<32x1xf32>
    %157 = vector.broadcast %156 : vector<32x1xf32> to vector<32x64xf32>
    %158 = arith.addf %154, %157 : vector<32x64xf32>
    %159 = arith.maximumf %151, %158 : vector<32x64xf32>
    %c4_121 = arith.constant 4 : index
    %c0_122 = arith.constant 0 : index
    %c0_123 = arith.constant 0 : index
    %160 = vector.load %arg11[%c4_121, %c0_122, %c0_123] : memref<9x32x32xf32, #tpu.memory_space<vmem>>, vector<1x32x32xf32>
    %161 = vector.shape_cast %160 : vector<1x32x32xf32> to vector<32x32xf32>
    %cst_124 = arith.constant dense<0.000000e+00> : vector<32x64xf32>
    %162 = tpu.matmul %161, %128, %cst_124 {dimension_numbers = #tpu.dot_dimension_numbers<[1], [0], [0], [1], [0, 0, 1, 1], [], []>} : vector<32x32xf32>, vector<32x64xf32>, vector<32x64xf32> -> vector<32x64xf32>
    %c4_125 = arith.constant 4 : index
    %c0_126 = arith.constant 0 : index
    %c0_127 = arith.constant 0 : index
    %163 = vector.load %arg12[%c4_125, %c0_126, %c0_127] : memref<9x32x1xf32, #tpu.memory_space<vmem>>, vector<1x32x1xf32>
    %164 = vector.shape_cast %163 : vector<1x32x1xf32> to vector<32x1xf32>
    %165 = vector.broadcast %164 : vector<32x1xf32> to vector<32x64xf32>
    %166 = arith.addf %162, %165 : vector<32x64xf32>
    %167 = arith.maximumf %159, %166 : vector<32x64xf32>
    %c5_128 = arith.constant 5 : index
    %c0_129 = arith.constant 0 : index
    %c0_130 = arith.constant 0 : index
    %168 = vector.load %arg11[%c5_128, %c0_129, %c0_130] : memref<9x32x32xf32, #tpu.memory_space<vmem>>, vector<1x32x32xf32>
    %169 = vector.shape_cast %168 : vector<1x32x32xf32> to vector<32x32xf32>
    %cst_131 = arith.constant dense<0.000000e+00> : vector<32x64xf32>
    %170 = tpu.matmul %169, %128, %cst_131 {dimension_numbers = #tpu.dot_dimension_numbers<[1], [0], [0], [1], [0, 0, 1, 1], [], []>} : vector<32x32xf32>, vector<32x64xf32>, vector<32x64xf32> -> vector<32x64xf32>
    %c5_132 = arith.constant 5 : index
    %c0_133 = arith.constant 0 : index
    %c0_134 = arith.constant 0 : index
    %171 = vector.load %arg12[%c5_132, %c0_133, %c0_134] : memref<9x32x1xf32, #tpu.memory_space<vmem>>, vector<1x32x1xf32>
    %172 = vector.shape_cast %171 : vector<1x32x1xf32> to vector<32x1xf32>
    %173 = vector.broadcast %172 : vector<32x1xf32> to vector<32x64xf32>
    %174 = arith.addf %170, %173 : vector<32x64xf32>
    %175 = arith.maximumf %167, %174 : vector<32x64xf32>
    %c6_135 = arith.constant 6 : index
    %c0_136 = arith.constant 0 : index
    %c0_137 = arith.constant 0 : index
    %176 = vector.load %arg11[%c6_135, %c0_136, %c0_137] : memref<9x32x32xf32, #tpu.memory_space<vmem>>, vector<1x32x32xf32>
    %177 = vector.shape_cast %176 : vector<1x32x32xf32> to vector<32x32xf32>
    %cst_138 = arith.constant dense<0.000000e+00> : vector<32x64xf32>
    %178 = tpu.matmul %177, %128, %cst_138 {dimension_numbers = #tpu.dot_dimension_numbers<[1], [0], [0], [1], [0, 0, 1, 1], [], []>} : vector<32x32xf32>, vector<32x64xf32>, vector<32x64xf32> -> vector<32x64xf32>
    %c6_139 = arith.constant 6 : index
    %c0_140 = arith.constant 0 : index
    %c0_141 = arith.constant 0 : index
    %179 = vector.load %arg12[%c6_139, %c0_140, %c0_141] : memref<9x32x1xf32, #tpu.memory_space<vmem>>, vector<1x32x1xf32>
    %180 = vector.shape_cast %179 : vector<1x32x1xf32> to vector<32x1xf32>
    %181 = vector.broadcast %180 : vector<32x1xf32> to vector<32x64xf32>
    %182 = arith.addf %178, %181 : vector<32x64xf32>
    %183 = arith.maximumf %175, %182 : vector<32x64xf32>
    %c7_142 = arith.constant 7 : index
    %c0_143 = arith.constant 0 : index
    %c0_144 = arith.constant 0 : index
    %184 = vector.load %arg11[%c7_142, %c0_143, %c0_144] : memref<9x32x32xf32, #tpu.memory_space<vmem>>, vector<1x32x32xf32>
    %185 = vector.shape_cast %184 : vector<1x32x32xf32> to vector<32x32xf32>
    %cst_145 = arith.constant dense<0.000000e+00> : vector<32x64xf32>
    %186 = tpu.matmul %185, %128, %cst_145 {dimension_numbers = #tpu.dot_dimension_numbers<[1], [0], [0], [1], [0, 0, 1, 1], [], []>} : vector<32x32xf32>, vector<32x64xf32>, vector<32x64xf32> -> vector<32x64xf32>
    %c7_146 = arith.constant 7 : index
    %c0_147 = arith.constant 0 : index
    %c0_148 = arith.constant 0 : index
    %187 = vector.load %arg12[%c7_146, %c0_147, %c0_148] : memref<9x32x1xf32, #tpu.memory_space<vmem>>, vector<1x32x1xf32>
    %188 = vector.shape_cast %187 : vector<1x32x1xf32> to vector<32x1xf32>
    %189 = vector.broadcast %188 : vector<32x1xf32> to vector<32x64xf32>
    %190 = arith.addf %186, %189 : vector<32x64xf32>
    %191 = arith.maximumf %183, %190 : vector<32x64xf32>
    %c8_149 = arith.constant 8 : index
    %c0_150 = arith.constant 0 : index
    %c0_151 = arith.constant 0 : index
    %192 = vector.load %arg11[%c8_149, %c0_150, %c0_151] : memref<9x32x32xf32, #tpu.memory_space<vmem>>, vector<1x32x32xf32>
    %193 = vector.shape_cast %192 : vector<1x32x32xf32> to vector<32x32xf32>
    %cst_152 = arith.constant dense<0.000000e+00> : vector<32x64xf32>
    %194 = tpu.matmul %193, %128, %cst_152 {dimension_numbers = #tpu.dot_dimension_numbers<[1], [0], [0], [1], [0, 0, 1, 1], [], []>} : vector<32x32xf32>, vector<32x64xf32>, vector<32x64xf32> -> vector<32x64xf32>
    %c8_153 = arith.constant 8 : index
    %c0_154 = arith.constant 0 : index
    %c0_155 = arith.constant 0 : index
    %195 = vector.load %arg12[%c8_153, %c0_154, %c0_155] : memref<9x32x1xf32, #tpu.memory_space<vmem>>, vector<1x32x1xf32>
    %196 = vector.shape_cast %195 : vector<1x32x1xf32> to vector<32x1xf32>
    %197 = vector.broadcast %196 : vector<32x1xf32> to vector<32x64xf32>
    %198 = arith.addf %194, %197 : vector<32x64xf32>
    %199 = arith.maximumf %191, %198 : vector<32x64xf32>
    %c0_156 = arith.constant 0 : index
    %c0_157 = arith.constant 0 : index
    %200 = vector.load %arg14[%c0_156, %c0_157] : memref<1x32xf32, #tpu.memory_space<vmem>>, vector<1x32xf32>
    %c0_158 = arith.constant 0 : index
    %c0_159 = arith.constant 0 : index
    %c0_160 = arith.constant 0 : index
    %201 = vector.load %arg11[%c0_158, %c0_159, %c0_160] : memref<9x32x32xf32, #tpu.memory_space<vmem>>, vector<1x32x32xf32>
    %202 = vector.shape_cast %201 : vector<1x32x32xf32> to vector<32x32xf32>
    %cst_161 = arith.constant dense<0.000000e+00> : vector<32x64xf32>
    %203 = tpu.matmul %202, %199, %cst_161 {dimension_numbers = #tpu.dot_dimension_numbers<[1], [0], [0], [1], [0, 0, 1, 1], [], []>} : vector<32x32xf32>, vector<32x64xf32>, vector<32x64xf32> -> vector<32x64xf32>
    %c0_162 = arith.constant 0 : index
    %c0_163 = arith.constant 0 : index
    %c0_164 = arith.constant 0 : index
    %204 = vector.load %arg13[%c0_162, %c0_163, %c0_164] : memref<9x64x32xf32, #tpu.memory_space<vmem>>, vector<1x64x32xf32>
    %205 = vector.shape_cast %204 : vector<1x64x32xf32> to vector<64x32xf32>
    %cst_165 = arith.constant dense<0.000000e+00> : vector<32x32xf32>
    %206 = tpu.matmul %203, %205, %cst_165 {dimension_numbers = #tpu.dot_dimension_numbers<[1], [0], [0], [1], [0, 0, 1, 1], [], []>} : vector<32x64xf32>, vector<64x32xf32>, vector<32x32xf32> -> vector<32x32xf32>
    %c1_166 = arith.constant 1 : index
    %c0_167 = arith.constant 0 : index
    %c0_168 = arith.constant 0 : index
    %207 = vector.load %arg11[%c1_166, %c0_167, %c0_168] : memref<9x32x32xf32, #tpu.memory_space<vmem>>, vector<1x32x32xf32>
    %208 = vector.shape_cast %207 : vector<1x32x32xf32> to vector<32x32xf32>
    %cst_169 = arith.constant dense<0.000000e+00> : vector<32x64xf32>
    %209 = tpu.matmul %208, %199, %cst_169 {dimension_numbers = #tpu.dot_dimension_numbers<[1], [0], [0], [1], [0, 0, 1, 1], [], []>} : vector<32x32xf32>, vector<32x64xf32>, vector<32x64xf32> -> vector<32x64xf32>
    %c1_170 = arith.constant 1 : index
    %c0_171 = arith.constant 0 : index
    %c0_172 = arith.constant 0 : index
    %210 = vector.load %arg13[%c1_170, %c0_171, %c0_172] : memref<9x64x32xf32, #tpu.memory_space<vmem>>, vector<1x64x32xf32>
    %211 = vector.shape_cast %210 : vector<1x64x32xf32> to vector<64x32xf32>
    %cst_173 = arith.constant dense<0.000000e+00> : vector<32x32xf32>
    %212 = tpu.matmul %209, %211, %cst_173 {dimension_numbers = #tpu.dot_dimension_numbers<[1], [0], [0], [1], [0, 0, 1, 1], [], []>} : vector<32x64xf32>, vector<64x32xf32>, vector<32x32xf32> -> vector<32x32xf32>
    %213 = arith.addf %206, %212 : vector<32x32xf32>
    %c2_174 = arith.constant 2 : index
    %c0_175 = arith.constant 0 : index
    %c0_176 = arith.constant 0 : index
    %214 = vector.load %arg11[%c2_174, %c0_175, %c0_176] : memref<9x32x32xf32, #tpu.memory_space<vmem>>, vector<1x32x32xf32>
    %215 = vector.shape_cast %214 : vector<1x32x32xf32> to vector<32x32xf32>
    %cst_177 = arith.constant dense<0.000000e+00> : vector<32x64xf32>
    %216 = tpu.matmul %215, %199, %cst_177 {dimension_numbers = #tpu.dot_dimension_numbers<[1], [0], [0], [1], [0, 0, 1, 1], [], []>} : vector<32x32xf32>, vector<32x64xf32>, vector<32x64xf32> -> vector<32x64xf32>
    %c2_178 = arith.constant 2 : index
    %c0_179 = arith.constant 0 : index
    %c0_180 = arith.constant 0 : index
    %217 = vector.load %arg13[%c2_178, %c0_179, %c0_180] : memref<9x64x32xf32, #tpu.memory_space<vmem>>, vector<1x64x32xf32>
    %218 = vector.shape_cast %217 : vector<1x64x32xf32> to vector<64x32xf32>
    %cst_181 = arith.constant dense<0.000000e+00> : vector<32x32xf32>
    %219 = tpu.matmul %216, %218, %cst_181 {dimension_numbers = #tpu.dot_dimension_numbers<[1], [0], [0], [1], [0, 0, 1, 1], [], []>} : vector<32x64xf32>, vector<64x32xf32>, vector<32x32xf32> -> vector<32x32xf32>
    %220 = arith.addf %213, %219 : vector<32x32xf32>
    %c3_182 = arith.constant 3 : index
    %c0_183 = arith.constant 0 : index
    %c0_184 = arith.constant 0 : index
    %221 = vector.load %arg11[%c3_182, %c0_183, %c0_184] : memref<9x32x32xf32, #tpu.memory_space<vmem>>, vector<1x32x32xf32>
    %222 = vector.shape_cast %221 : vector<1x32x32xf32> to vector<32x32xf32>
    %cst_185 = arith.constant dense<0.000000e+00> : vector<32x64xf32>
    %223 = tpu.matmul %222, %199, %cst_185 {dimension_numbers = #tpu.dot_dimension_numbers<[1], [0], [0], [1], [0, 0, 1, 1], [], []>} : vector<32x32xf32>, vector<32x64xf32>, vector<32x64xf32> -> vector<32x64xf32>
    %c3_186 = arith.constant 3 : index
    %c0_187 = arith.constant 0 : index
    %c0_188 = arith.constant 0 : index
    %224 = vector.load %arg13[%c3_186, %c0_187, %c0_188] : memref<9x64x32xf32, #tpu.memory_space<vmem>>, vector<1x64x32xf32>
    %225 = vector.shape_cast %224 : vector<1x64x32xf32> to vector<64x32xf32>
    %cst_189 = arith.constant dense<0.000000e+00> : vector<32x32xf32>
    %226 = tpu.matmul %223, %225, %cst_189 {dimension_numbers = #tpu.dot_dimension_numbers<[1], [0], [0], [1], [0, 0, 1, 1], [], []>} : vector<32x64xf32>, vector<64x32xf32>, vector<32x32xf32> -> vector<32x32xf32>
    %227 = arith.addf %220, %226 : vector<32x32xf32>
    %c4_190 = arith.constant 4 : index
    %c0_191 = arith.constant 0 : index
    %c0_192 = arith.constant 0 : index
    %228 = vector.load %arg11[%c4_190, %c0_191, %c0_192] : memref<9x32x32xf32, #tpu.memory_space<vmem>>, vector<1x32x32xf32>
    %229 = vector.shape_cast %228 : vector<1x32x32xf32> to vector<32x32xf32>
    %cst_193 = arith.constant dense<0.000000e+00> : vector<32x64xf32>
    %230 = tpu.matmul %229, %199, %cst_193 {dimension_numbers = #tpu.dot_dimension_numbers<[1], [0], [0], [1], [0, 0, 1, 1], [], []>} : vector<32x32xf32>, vector<32x64xf32>, vector<32x64xf32> -> vector<32x64xf32>
    %c4_194 = arith.constant 4 : index
    %c0_195 = arith.constant 0 : index
    %c0_196 = arith.constant 0 : index
    %231 = vector.load %arg13[%c4_194, %c0_195, %c0_196] : memref<9x64x32xf32, #tpu.memory_space<vmem>>, vector<1x64x32xf32>
    %232 = vector.shape_cast %231 : vector<1x64x32xf32> to vector<64x32xf32>
    %cst_197 = arith.constant dense<0.000000e+00> : vector<32x32xf32>
    %233 = tpu.matmul %230, %232, %cst_197 {dimension_numbers = #tpu.dot_dimension_numbers<[1], [0], [0], [1], [0, 0, 1, 1], [], []>} : vector<32x64xf32>, vector<64x32xf32>, vector<32x32xf32> -> vector<32x32xf32>
    %234 = arith.addf %227, %233 : vector<32x32xf32>
    %c5_198 = arith.constant 5 : index
    %c0_199 = arith.constant 0 : index
    %c0_200 = arith.constant 0 : index
    %235 = vector.load %arg11[%c5_198, %c0_199, %c0_200] : memref<9x32x32xf32, #tpu.memory_space<vmem>>, vector<1x32x32xf32>
    %236 = vector.shape_cast %235 : vector<1x32x32xf32> to vector<32x32xf32>
    %cst_201 = arith.constant dense<0.000000e+00> : vector<32x64xf32>
    %237 = tpu.matmul %236, %199, %cst_201 {dimension_numbers = #tpu.dot_dimension_numbers<[1], [0], [0], [1], [0, 0, 1, 1], [], []>} : vector<32x32xf32>, vector<32x64xf32>, vector<32x64xf32> -> vector<32x64xf32>
    %c5_202 = arith.constant 5 : index
    %c0_203 = arith.constant 0 : index
    %c0_204 = arith.constant 0 : index
    %238 = vector.load %arg13[%c5_202, %c0_203, %c0_204] : memref<9x64x32xf32, #tpu.memory_space<vmem>>, vector<1x64x32xf32>
    %239 = vector.shape_cast %238 : vector<1x64x32xf32> to vector<64x32xf32>
    %cst_205 = arith.constant dense<0.000000e+00> : vector<32x32xf32>
    %240 = tpu.matmul %237, %239, %cst_205 {dimension_numbers = #tpu.dot_dimension_numbers<[1], [0], [0], [1], [0, 0, 1, 1], [], []>} : vector<32x64xf32>, vector<64x32xf32>, vector<32x32xf32> -> vector<32x32xf32>
    %241 = arith.addf %234, %240 : vector<32x32xf32>
    %c6_206 = arith.constant 6 : index
    %c0_207 = arith.constant 0 : index
    %c0_208 = arith.constant 0 : index
    %242 = vector.load %arg11[%c6_206, %c0_207, %c0_208] : memref<9x32x32xf32, #tpu.memory_space<vmem>>, vector<1x32x32xf32>
    %243 = vector.shape_cast %242 : vector<1x32x32xf32> to vector<32x32xf32>
    %cst_209 = arith.constant dense<0.000000e+00> : vector<32x64xf32>
    %244 = tpu.matmul %243, %199, %cst_209 {dimension_numbers = #tpu.dot_dimension_numbers<[1], [0], [0], [1], [0, 0, 1, 1], [], []>} : vector<32x32xf32>, vector<32x64xf32>, vector<32x64xf32> -> vector<32x64xf32>
    %c6_210 = arith.constant 6 : index
    %c0_211 = arith.constant 0 : index
    %c0_212 = arith.constant 0 : index
    %245 = vector.load %arg13[%c6_210, %c0_211, %c0_212] : memref<9x64x32xf32, #tpu.memory_space<vmem>>, vector<1x64x32xf32>
    %246 = vector.shape_cast %245 : vector<1x64x32xf32> to vector<64x32xf32>
    %cst_213 = arith.constant dense<0.000000e+00> : vector<32x32xf32>
    %247 = tpu.matmul %244, %246, %cst_213 {dimension_numbers = #tpu.dot_dimension_numbers<[1], [0], [0], [1], [0, 0, 1, 1], [], []>} : vector<32x64xf32>, vector<64x32xf32>, vector<32x32xf32> -> vector<32x32xf32>
    %248 = arith.addf %241, %247 : vector<32x32xf32>
    %c7_214 = arith.constant 7 : index
    %c0_215 = arith.constant 0 : index
    %c0_216 = arith.constant 0 : index
    %249 = vector.load %arg11[%c7_214, %c0_215, %c0_216] : memref<9x32x32xf32, #tpu.memory_space<vmem>>, vector<1x32x32xf32>
    %250 = vector.shape_cast %249 : vector<1x32x32xf32> to vector<32x32xf32>
    %cst_217 = arith.constant dense<0.000000e+00> : vector<32x64xf32>
    %251 = tpu.matmul %250, %199, %cst_217 {dimension_numbers = #tpu.dot_dimension_numbers<[1], [0], [0], [1], [0, 0, 1, 1], [], []>} : vector<32x32xf32>, vector<32x64xf32>, vector<32x64xf32> -> vector<32x64xf32>
    %c7_218 = arith.constant 7 : index
    %c0_219 = arith.constant 0 : index
    %c0_220 = arith.constant 0 : index
    %252 = vector.load %arg13[%c7_218, %c0_219, %c0_220] : memref<9x64x32xf32, #tpu.memory_space<vmem>>, vector<1x64x32xf32>
    %253 = vector.shape_cast %252 : vector<1x64x32xf32> to vector<64x32xf32>
    %cst_221 = arith.constant dense<0.000000e+00> : vector<32x32xf32>
    %254 = tpu.matmul %251, %253, %cst_221 {dimension_numbers = #tpu.dot_dimension_numbers<[1], [0], [0], [1], [0, 0, 1, 1], [], []>} : vector<32x64xf32>, vector<64x32xf32>, vector<32x32xf32> -> vector<32x32xf32>
    %255 = arith.addf %248, %254 : vector<32x32xf32>
    %c8_222 = arith.constant 8 : index
    %c0_223 = arith.constant 0 : index
    %c0_224 = arith.constant 0 : index
    %256 = vector.load %arg11[%c8_222, %c0_223, %c0_224] : memref<9x32x32xf32, #tpu.memory_space<vmem>>, vector<1x32x32xf32>
    %257 = vector.shape_cast %256 : vector<1x32x32xf32> to vector<32x32xf32>
    %cst_225 = arith.constant dense<0.000000e+00> : vector<32x64xf32>
    %258 = tpu.matmul %257, %199, %cst_225 {dimension_numbers = #tpu.dot_dimension_numbers<[1], [0], [0], [1], [0, 0, 1, 1], [], []>} : vector<32x32xf32>, vector<32x64xf32>, vector<32x64xf32> -> vector<32x64xf32>
    %c8_226 = arith.constant 8 : index
    %c0_227 = arith.constant 0 : index
    %c0_228 = arith.constant 0 : index
    %259 = vector.load %arg13[%c8_226, %c0_227, %c0_228] : memref<9x64x32xf32, #tpu.memory_space<vmem>>, vector<1x64x32xf32>
    %260 = vector.shape_cast %259 : vector<1x64x32xf32> to vector<64x32xf32>
    %cst_229 = arith.constant dense<0.000000e+00> : vector<32x32xf32>
    %261 = tpu.matmul %258, %260, %cst_229 {dimension_numbers = #tpu.dot_dimension_numbers<[1], [0], [0], [1], [0, 0, 1, 1], [], []>} : vector<32x64xf32>, vector<64x32xf32>, vector<32x32xf32> -> vector<32x32xf32>
    %262 = arith.addf %255, %261 : vector<32x32xf32>
    %263 = vector.broadcast %200 : vector<1x32xf32> to vector<32x32xf32>
    %264 = arith.addf %262, %263 : vector<32x32xf32>
    %c0_230 = arith.constant 0 : index
    %c0_231 = arith.constant 0 : index
    %265 = vector.load %arg15[%c0_230, %c0_231] : memref<1x32xf32, #tpu.memory_space<vmem>>, vector<1x32xf32>
    %c0_232 = arith.constant 0 : index
    %c0_233 = arith.constant 0 : index
    %266 = vector.load %arg16[%c0_232, %c0_233] : memref<1x32xf32, #tpu.memory_space<vmem>>, vector<1x32xf32>
    %cst_234 = arith.constant dense<0.000000e+00> : vector<32xf32>
    %267 = vector.multi_reduction <add>, %264, %cst_234 [0] : vector<32x32xf32> to vector<32xf32>
    %268 = vector.shape_cast %267 : vector<32xf32> to vector<1x32xf32>
    %269 = arith.mulf %264, %264 : vector<32x32xf32>
    %cst_235 = arith.constant dense<0.000000e+00> : vector<32xf32>
    %270 = vector.multi_reduction <add>, %269, %cst_235 [0] : vector<32x32xf32> to vector<32xf32>
    %271 = vector.shape_cast %270 : vector<32xf32> to vector<1x32xf32>
    %cst_236 = arith.constant 3.125000e-02 : f32
    %272 = vector.broadcast %cst_236 : f32 to vector<1x32xf32>
    %273 = arith.mulf %268, %272 : vector<1x32xf32>
    %cst_237 = arith.constant 3.125000e-02 : f32
    %274 = vector.broadcast %cst_237 : f32 to vector<1x32xf32>
    %275 = arith.mulf %271, %274 : vector<1x32xf32>
    %276 = arith.mulf %273, %273 : vector<1x32xf32>
    %277 = arith.subf %275, %276 : vector<1x32xf32>
    %278 = vector.broadcast %273 : vector<1x32xf32> to vector<32x32xf32>
    %279 = arith.subf %264, %278 : vector<32x32xf32>
    %cst_238 = arith.constant 9.99999974E-6 : f32
    %280 = vector.broadcast %cst_238 : f32 to vector<1x32xf32>
    %281 = arith.addf %277, %280 : vector<1x32xf32>
    %282 = math.rsqrt %281 : vector<1x32xf32>
    %283 = vector.broadcast %282 : vector<1x32xf32> to vector<32x32xf32>
    %284 = arith.mulf %279, %283 : vector<32x32xf32>
    %285 = vector.broadcast %265 : vector<1x32xf32> to vector<32x32xf32>
    %286 = arith.mulf %284, %285 : vector<32x32xf32>
    %287 = vector.broadcast %266 : vector<1x32xf32> to vector<32x32xf32>
    %288 = arith.addf %286, %287 : vector<32x32xf32>
    %cst_239 = arith.constant 0.000000e+00 : f32
    %289 = vector.broadcast %cst_239 : f32 to vector<32x32xf32>
    %290 = arith.cmpf oge, %288, %289 : vector<32x32xf32>
    %cst_240 = arith.constant 0.00999999977 : f32
    %291 = vector.broadcast %cst_240 : f32 to vector<32x32xf32>
    %292 = arith.mulf %291, %288 : vector<32x32xf32>
    %293 = arith.select %290, %288, %292 : vector<32x32xi1>, vector<32x32xf32>
    %c0_241 = arith.constant 0 : index
    %c0_242 = arith.constant 0 : index
    %294 = vector.load %arg17[%c0_241, %c0_242] : memref<32x32xf32, #tpu.memory_space<vmem>>, vector<32x32xf32>
    %cst_243 = arith.constant dense<0.000000e+00> : vector<32x32xf32>
    %295 = tpu.matmul %293, %294, %cst_243 {dimension_numbers = #tpu.dot_dimension_numbers<[1], [0], [0], [1], [0, 0, 1, 1], [], []>} : vector<32x32xf32>, vector<32x32xf32>, vector<32x32xf32> -> vector<32x32xf32>
    %c0_244 = arith.constant 0 : index
    %c0_245 = arith.constant 0 : index
    %296 = vector.load %arg18[%c0_244, %c0_245] : memref<1x32xf32, #tpu.memory_space<vmem>>, vector<1x32xf32>
    %297 = vector.broadcast %296 : vector<1x32xf32> to vector<32x32xf32>
    %298 = arith.addf %295, %297 : vector<32x32xf32>
    %c0_246 = arith.constant 0 : index
    %c0_247 = arith.constant 0 : index
    %299 = vector.load %arg19[%c0_246, %c0_247] : memref<1x32xf32, #tpu.memory_space<vmem>>, vector<1x32xf32>
    %c0_248 = arith.constant 0 : index
    %c0_249 = arith.constant 0 : index
    %300 = vector.load %arg20[%c0_248, %c0_249] : memref<1x32xf32, #tpu.memory_space<vmem>>, vector<1x32xf32>
    %cst_250 = arith.constant dense<0.000000e+00> : vector<32xf32>
    %301 = vector.multi_reduction <add>, %298, %cst_250 [0] : vector<32x32xf32> to vector<32xf32>
    %302 = vector.shape_cast %301 : vector<32xf32> to vector<1x32xf32>
    %303 = arith.mulf %298, %298 : vector<32x32xf32>
    %cst_251 = arith.constant dense<0.000000e+00> : vector<32xf32>
    %304 = vector.multi_reduction <add>, %303, %cst_251 [0] : vector<32x32xf32> to vector<32xf32>
    %305 = vector.shape_cast %304 : vector<32xf32> to vector<1x32xf32>
    %cst_252 = arith.constant 3.125000e-02 : f32
    %306 = vector.broadcast %cst_252 : f32 to vector<1x32xf32>
    %307 = arith.mulf %302, %306 : vector<1x32xf32>
    %cst_253 = arith.constant 3.125000e-02 : f32
    %308 = vector.broadcast %cst_253 : f32 to vector<1x32xf32>
    %309 = arith.mulf %305, %308 : vector<1x32xf32>
    %310 = arith.mulf %307, %307 : vector<1x32xf32>
    %311 = arith.subf %309, %310 : vector<1x32xf32>
    %312 = vector.broadcast %307 : vector<1x32xf32> to vector<32x32xf32>
    %313 = arith.subf %298, %312 : vector<32x32xf32>
    %cst_254 = arith.constant 9.99999974E-6 : f32
    %314 = vector.broadcast %cst_254 : f32 to vector<1x32xf32>
    %315 = arith.addf %311, %314 : vector<1x32xf32>
    %316 = math.rsqrt %315 : vector<1x32xf32>
    %317 = vector.broadcast %316 : vector<1x32xf32> to vector<32x32xf32>
    %318 = arith.mulf %313, %317 : vector<32x32xf32>
    %319 = vector.broadcast %299 : vector<1x32xf32> to vector<32x32xf32>
    %320 = arith.mulf %318, %319 : vector<32x32xf32>
    %321 = vector.broadcast %300 : vector<1x32xf32> to vector<32x32xf32>
    %322 = arith.addf %320, %321 : vector<32x32xf32>
    %cst_255 = arith.constant 0.000000e+00 : f32
    %323 = vector.broadcast %cst_255 : f32 to vector<32x32xf32>
    %324 = arith.cmpf oge, %322, %323 : vector<32x32xf32>
    %cst_256 = arith.constant 0.00999999977 : f32
    %325 = vector.broadcast %cst_256 : f32 to vector<32x32xf32>
    %326 = arith.mulf %325, %322 : vector<32x32xf32>
    %327 = arith.select %324, %322, %326 : vector<32x32xi1>, vector<32x32xf32>
    %c0_257 = arith.constant 0 : index
    %c0_258 = arith.constant 0 : index
    %328 = vector.load %arg21[%c0_257, %c0_258] : memref<32x128xf32, #tpu.memory_space<vmem>>, vector<32x128xf32>
    %cst_259 = arith.constant dense<0.000000e+00> : vector<32x128xf32>
    %329 = tpu.matmul %327, %328, %cst_259 {dimension_numbers = #tpu.dot_dimension_numbers<[1], [0], [0], [1], [0, 0, 1, 1], [], []>} : vector<32x32xf32>, vector<32x128xf32>, vector<32x128xf32> -> vector<32x128xf32>
    %c0_260 = arith.constant 0 : index
    %c0_261 = arith.constant 0 : index
    %330 = vector.load %arg22[%c0_260, %c0_261] : memref<1x128xf32, #tpu.memory_space<vmem>>, vector<1x128xf32>
    %331 = vector.broadcast %330 : vector<1x128xf32> to vector<32x128xf32>
    %332 = arith.addf %329, %331 : vector<32x128xf32>
    %c0_262 = arith.constant 0 : index
    %c0_263 = arith.constant 0 : index
    %333 = vector.load %arg23[%c0_262, %c0_263] : memref<32x128xf32, #tpu.memory_space<vmem>>, vector<32x128xf32>
    tpu.vector_store %arg23[%c0_262, %c0_263], %332 {strides = array<i32>} : memref<32x128xf32, #tpu.memory_space<vmem>>, vector<32x128xf32>,
    return
  }
  func.func @transform_0(%arg0: i32) -> (i32, i32) {
    %c0_i32 = arith.constant 0 : i32
    %c0_i32_0 = arith.constant 0 : i32
    %c0_i32_1 = arith.constant 0 : i32
    return %c0_i32, %c0_i32_0 : i32, i32
  }
  func.func @transform_1(%arg0: i32) -> (i32, i32) {
    %c0_i32 = arith.constant 0 : i32
    %c0_i32_0 = arith.constant 0 : i32
    %c0_i32_1 = arith.constant 0 : i32
    return %c0_i32, %c0_i32_0 : i32, i32
  }
  func.func @transform_2(%arg0: i32) -> (i32, i32) {
    %c0_i32 = arith.constant 0 : i32
    %c0_i32_0 = arith.constant 0 : i32
    %c0_i32_1 = arith.constant 0 : i32
    return %c0_i32, %c0_i32_0 : i32, i32
  }
  func.func @transform_3(%arg0: i32) -> (i32, i32) {
    %c0_i32 = arith.constant 0 : i32
    %c0_i32_0 = arith.constant 0 : i32
    %c0_i32_1 = arith.constant 0 : i32
    return %c0_i32, %c0_i32_0 : i32, i32
  }
  func.func @transform_4(%arg0: i32) -> (i32, i32) {
    %c0_i32 = arith.constant 0 : i32
    %c0_i32_0 = arith.constant 0 : i32
    %c0_i32_1 = arith.constant 0 : i32
    return %c0_i32, %c0_i32_0 : i32, i32
  }
  func.func @transform_5(%arg0: i32) -> (i32, i32, i32) {
    %c0_i32 = arith.constant 0 : i32
    %c0_i32_0 = arith.constant 0 : i32
    %c0_i32_1 = arith.constant 0 : i32
    %c0_i32_2 = arith.constant 0 : i32
    return %c0_i32, %c0_i32_0, %c0_i32_1 : i32, i32, i32
  }
  func.func @transform_6(%arg0: i32) -> (i32, i32, i32) {
    %c0_i32 = arith.constant 0 : i32
    %c0_i32_0 = arith.constant 0 : i32
    %c0_i32_1 = arith.constant 0 : i32
    %c0_i32_2 = arith.constant 0 : i32
    return %c0_i32, %c0_i32_0, %c0_i32_1 : i32, i32, i32
  }
  func.func @transform_7(%arg0: i32) -> (i32, i32) {
    %c0_i32 = arith.constant 0 : i32
    %c0_i32_0 = arith.constant 0 : i32
    %c0_i32_1 = arith.constant 0 : i32
    return %c0_i32, %c0_i32_0 : i32, i32
  }
  func.func @transform_8(%arg0: i32) -> (i32, i32) {
    %c0_i32 = arith.constant 0 : i32
    %c0_i32_0 = arith.constant 0 : i32
    %c0_i32_1 = arith.constant 0 : i32
    return %c0_i32, %c0_i32_0 : i32, i32
  }
  func.func @transform_9(%arg0: i32) -> (i32, i32) {
    %c0_i32 = arith.constant 0 : i32
    %c0_i32_0 = arith.constant 0 : i32
    %c0_i32_1 = arith.constant 0 : i32
    return %c0_i32, %c0_i32_0 : i32, i32
  }
  func.func @transform_10(%arg0: i32) -> (i32, i32, i32) {
    %c0_i32 = arith.constant 0 : i32
    %c0_i32_0 = arith.constant 0 : i32
    %c0_i32_1 = arith.constant 0 : i32
    %c0_i32_2 = arith.constant 0 : i32
    return %c0_i32, %c0_i32_0, %c0_i32_1 : i32, i32, i32
  }
  func.func @transform_11(%arg0: i32) -> (i32, i32, i32) {
    %c0_i32 = arith.constant 0 : i32
    %c0_i32_0 = arith.constant 0 : i32
    %c0_i32_1 = arith.constant 0 : i32
    %c0_i32_2 = arith.constant 0 : i32
    return %c0_i32, %c0_i32_0, %c0_i32_1 : i32, i32, i32
  }
  func.func @transform_12(%arg0: i32) -> (i32, i32, i32) {
    %c0_i32 = arith.constant 0 : i32
    %c0_i32_0 = arith.constant 0 : i32
    %c0_i32_1 = arith.constant 0 : i32
    %c0_i32_2 = arith.constant 0 : i32
    return %c0_i32, %c0_i32_0, %c0_i32_1 : i32, i32, i32
  }
  func.func @transform_13(%arg0: i32) -> (i32, i32) {
    %c0_i32 = arith.constant 0 : i32
    %c0_i32_0 = arith.constant 0 : i32
    %c0_i32_1 = arith.constant 0 : i32
    return %c0_i32, %c0_i32_0 : i32, i32
  }
  func.func @transform_14(%arg0: i32) -> (i32, i32) {
    %c0_i32 = arith.constant 0 : i32
    %c0_i32_0 = arith.constant 0 : i32
    %c0_i32_1 = arith.constant 0 : i32
    return %c0_i32, %c0_i32_0 : i32, i32
  }
  func.func @transform_15(%arg0: i32) -> (i32, i32) {
    %c0_i32 = arith.constant 0 : i32
    %c0_i32_0 = arith.constant 0 : i32
    %c0_i32_1 = arith.constant 0 : i32
    return %c0_i32, %c0_i32_0 : i32, i32
  }
  func.func @transform_16(%arg0: i32) -> (i32, i32) {
    %c0_i32 = arith.constant 0 : i32
    %c0_i32_0 = arith.constant 0 : i32
    %c0_i32_1 = arith.constant 0 : i32
    return %c0_i32, %c0_i32_0 : i32, i32
  }
  func.func @transform_17(%arg0: i32) -> (i32, i32) {
    %c0_i32 = arith.constant 0 : i32
    %c0_i32_0 = arith.constant 0 : i32
    %c0_i32_1 = arith.constant 0 : i32
    return %c0_i32, %c0_i32_0 : i32, i32
  }
  func.func @transform_18(%arg0: i32) -> (i32, i32) {
    %c0_i32 = arith.constant 0 : i32
    %c0_i32_0 = arith.constant 0 : i32
    %c0_i32_1 = arith.constant 0 : i32
    return %c0_i32, %c0_i32_0 : i32, i32
  }
  func.func @transform_19(%arg0: i32) -> (i32, i32) {
    %c0_i32 = arith.constant 0 : i32
    %c0_i32_0 = arith.constant 0 : i32
    %c0_i32_1 = arith.constant 0 : i32
    return %c0_i32, %c0_i32_0 : i32, i32
  }
  func.func @transform_20(%arg0: i32) -> (i32, i32) {
    %c0_i32 = arith.constant 0 : i32
    %c0_i32_0 = arith.constant 0 : i32
    %c0_i32_1 = arith.constant 0 : i32
    return %c0_i32, %c0_i32_0 : i32, i32
  }
  func.func @transform_21(%arg0: i32) -> (i32, i32) {
    %c0_i32 = arith.constant 0 : i32
    %c0_i32_0 = arith.constant 0 : i32
    %c0_i32_1 = arith.constant 0 : i32
    return %c0_i32, %c0_i32_0 : i32, i32
  }
  func.func @transform_22(%arg0: i32) -> (i32, i32) {
    %c0_i32 = arith.constant 0 : i32
    %c0_i32_0 = arith.constant 0 : i32
    %c0_i32_1 = arith.constant 0 : i32
    return %c0_i32, %c0_i32_0 : i32, i32
  }
}

</mosaic_0001>

<bundles_post_ra>
// kernel: discriminator_forward.1
= control target key start
LH: loop header
LB: loop body
LE: loop exit
PB: predicated region body
PF: predicated region fallthrough
CT: control target
= control target key end

     0   :  { %vm148_vm0 = vcmask 1043456   ;;  %vm99_vm1 = vcmask 293888   ;;  %vm299_vm2 = vcmask 785408   ;;  %s10196_s1 = inlined_call_operand.vmem [shape: f32[36,96], index: 1, kind: input, shape index: {}]   ;;  %s10197_s0 = inlined_call_operand.vmem [shape: f32[128,36], index: 0, kind: input, shape index: {}]   ;;  %s10198_s5 = inlined_call_operand.vmem [shape: f32[9,32,128], index: 5, kind: input, shape index: {}]   ;;  %s10199_s2 = inlined_call_operand.vmem [shape: f32[1,96], index: 2, kind: input, shape index: {}]   ;;  %s10200_s3 = inlined_call_operand.vmem [shape: f32[1,96], index: 3, kind: input, shape index: {}]   ;;  %s10201_s4 = inlined_call_operand.vmem [shape: f32[1,96], index: 4, kind: input, shape index: {}]   ;;  %s10202_s6 = inlined_call_operand.vmem [shape: f32[9,96,64], index: 6, kind: input, shape index: {}]   ;;  %s10203_s11 = inlined_call_operand.vmem [shape: f32[9,32,1], index: 11, kind: input, shape index: {}]   ;;  %s10204_s10 = inlined_call_operand.vmem [shape: f32[9,32,32], index: 10, kind: input, shape index: {}]   ;;  %s10205_s7 = inlined_call_operand.vmem [shape: f32[1,64], index: 7, kind: input, shape index: {}]   ;;  %s10206_s8 = inlined_call_operand.vmem [shape: f32[1,64], index: 8, kind: input, shape index: {}]   ;;  %s10207_s9 = inlined_call_operand.vmem [shape: f32[1,64], index: 9, kind: input, shape index: {}]   ;;  %s10208_s12 = inlined_call_operand.vmem [shape: f32[9,64,32], index: 12, kind: input, shape index: {}]   ;;  %s10209_s16 = inlined_call_operand.vmem [shape: f32[32,32], index: 16, kind: input, shape index: {}]   ;;  %s10210_s13 = inlined_call_operand.vmem [shape: f32[1,32], index: 13, kind: input, shape index: {}]   ;;  %s10211_s14 = inlined_call_operand.vmem [shape: f32[1,32], index: 14, kind: input, shape index: {}]   ;;  %s10212_s15 = inlined_call_operand.vmem [shape: f32[1,32], index: 15, kind: input, shape index: {}]   ;;  %s10213_s20 = inlined_call_operand.vmem [shape: f32[32,128], index: 20, kind: input, shape index: {}]   ;;  %s10214_s17 = inlined_call_operand.vmem [shape: f32[1,32], index: 17, kind: input, shape index: {}]   ;;  %s10215_s18 = inlined_call_operand.vmem [shape: f32[1,32], index: 18, kind: input, shape index: {}]   ;;  %s10216_s19 = inlined_call_operand.vmem [shape: f32[1,32], index: 19, kind: input, shape index: {}]   ;;  %s10217_s21 = inlined_call_operand.vmem [shape: f32[1,128], index: 21, kind: input, shape index: {}]   ;;  %s10218_s22 = inlined_call_operand.vmem [shape: f32[32,128], index: 22, kind: output, shape index: {}]  }
   0x1   :  { %10253 = sst [smem:[#allocation36_spill]] %s10196_s1 }
   0x2   :  { %10254 = sst [smem:[#allocation37_spill]] %s10197_s0 }
   0x3   :  { %10255 = sst [smem:[#allocation38_spill]] %s10198_s5 }
   0x4   :  { %10256 = sst [smem:[#allocation39_spill]] %s10199_s2 }
   0x5   :  { %10257 = sst [smem:[#allocation40_spill]] %s10200_s3 }
   0x6   :  { %10258 = sst [smem:[#allocation41_spill]] %s10201_s4 }
   0x7   :  { %10259 = sst [smem:[#allocation42_spill]] %s10202_s6 }
   0x8   :  { %s10260_s29 = sld [smem:[#allocation36_spill]] }
   0x9   :  { %s10261_s0 = sld [smem:[#allocation37_spill]] }
   0xa   :  { %s10262_s3 = sld [smem:[#allocation38_spill]] }
   0xb   :  { %s10263_s24 = sld [smem:[#allocation39_spill]] }
   0xc   :  { %s10264_s25 = sld [smem:[#allocation40_spill]] }
   0xd   :  { %s10265_s27 = sld [smem:[#allocation41_spill]] }
   0xe   :  { %v91_v0 = vld [vmem:[%s10260_s29 + $0x20] sm:$0xf]  ;;  %v90_v1 = vld [vmem:[%s10260_s29 + $0x18] sm:$0xff]  ;;  %v89_v3 = vld [vmem:[%s10260_s29 + $0x10] sm:$0xff]  ;;  %s10266_s4 = sld [smem:[#allocation42_spill]] }
   0xf   :  { %6798 = vmatprep.subr.msk.mxu0 %vm148_vm0, %v91_v0  ;;  %v71_v2 = vld [vmem:[%s10261_s0] sm:$0xff]  ;;  %v88_v4 = vld [vmem:[%s10260_s29 + $0x8] sm:$0xff]  ;;  %v73_v7 = vld [vmem:[%s10261_s0 + $0x10] sm:$0xff] }
  0x10   :  { %6799 = vmatpush3.msk.msra.mxu0 %vm148_vm0, %v91_v0  ;;  %6808 = vmatprep.mubr.msk.f32.mxu0 %vm99_vm1, %v71_v2  ;;  %v87_v5 = vld [vmem:[%s10260_s29] sm:$0xff]  ;;  %v72_v6 = vld [vmem:[%s10261_s0 + $0x8] sm:$0xff]  ;;  %v74_v8 = vld [vmem:[%s10261_s0 + $0x18] sm:$0xff] }
  0x11   :  { %6800 = vmatprep.subr.mxu0 %v90_v1  ;;  %v75_v9 = vld [vmem:[%s10261_s0 + $0x20] sm:$0xff]  ;;  %v76_v10 = vld [vmem:[%s10261_s0 + $0x28] sm:$0xff]  ;;  %v77_v11 = vld [vmem:[%s10261_s0 + $0x30] sm:$0xff] }
  0x12   :  { %6801 = vmatpush3.msra.mxu0 %v90_v1  ;;  %v78_v12 = vld [vmem:[%s10261_s0 + $0x38] sm:$0xff]  ;;  %v79_v13 = vld [vmem:[%s10261_s0 + $0x40] sm:$0xff]  ;;  %v80_v14 = vld [vmem:[%s10261_s0 + $0x48] sm:$0xff] }
  0x13   :  { %6802 = vmatprep.subr.mxu0 %v89_v3  ;;  %v81_v15 = vld [vmem:[%s10261_s0 + $0x50] sm:$0xff]  ;;  %v82_v16 = vld [vmem:[%s10261_s0 + $0x58] sm:$0xff]  ;;  %v83_v17 = vld [vmem:[%s10261_s0 + $0x60] sm:$0xff] }
  0x14   :  { %6803 = vmatpush3.msra.mxu0 %v89_v3  ;;  %v84_v18 = vld [vmem:[%s10261_s0 + $0x68] sm:$0xff]  ;;  %v85_v19 = vld [vmem:[%s10261_s0 + $0x70] sm:$0xff]  ;;  %v86_v20 = vld [vmem:[%s10261_s0 + $0x78] sm:$0xff] }
  0x15   :  { %6804 = vmatprep.subr.mxu0 %v88_v4  ;;  %v521_v21 = vld [vmem:[%s10262_s3] sm:$0xff] }
  0x16   :  { %6805 = vmatpush3.msra.mxu0 %v88_v4  ;;  %v5767_v22 = vld [vmem:[%s10262_s3 + $0x20] sm:$0xff]  ;;  %6864 = vmatprep.mubr.f32.mxu1 %v521_v21 }
  0x17   :  { %6806 = vmatprep.subr.mxu0 %v87_v5  ;;  %v8141_v23 = vld [vmem:[%s10263_s24] ss:$0 sm:$0xff] }
  0x18   :  { %6807 = vmatpush3.msra.mxu0 %v87_v5 }
  0x19   :  { %6809 = vmatmul.mubr.msk.f32.vlgmr.msra.gmra.mxu0 %vm99_vm1, %v72_v6 }
  0x1a   :  { %6811 = vmatprep.mubr.msk.f32.mxu0 %vm99_vm1, %v73_v7 }
  0x1d   :  { %6812 = vmatmul.mubr.msk.f32.gmra.mxu0 %vm99_vm1, %v74_v8 }
  0x1e   :  { %6814 = vmatprep.mubr.msk.f32.mxu0 %vm99_vm1, %v75_v9 }
  0x21   :  { %6815 = vmatmul.mubr.msk.f32.gmra.mxu0 %vm99_vm1, %v76_v10 }
  0x22   :  { %6817 = vmatprep.mubr.msk.f32.mxu0 %vm99_vm1, %v77_v11 }
  0x25   :  { %6818 = vmatmul.mubr.msk.f32.gmra.mxu0 %vm99_vm1, %v78_v12 }
  0x26   :  { %6820 = vmatprep.mubr.msk.f32.mxu0 %vm99_vm1, %v79_v13 }
  0x29   :  { %6821 = vmatmul.mubr.msk.f32.gmra.mxu0 %vm99_vm1, %v80_v14 }
  0x2a   :  { %6823 = vmatprep.mubr.msk.f32.mxu0 %vm99_vm1, %v81_v15 }
  0x2d   :  { %6824 = vmatmul.mubr.msk.f32.gmra.mxu0 %vm99_vm1, %v82_v16 }
  0x2e   :  { %6826 = vmatprep.mubr.msk.f32.mxu0 %vm99_vm1, %v83_v17 }
  0x31   :  { %6827 = vmatmul.mubr.msk.f32.gmra.mxu0 %vm99_vm1, %v84_v18 }
  0x32   :  { %6829 = vmatprep.mubr.msk.f32.mxu0 %vm99_vm1, %v85_v19 }
  0x35   :  { %6830 = vmatmul.mubr.msk.f32.gmra.mxu0 %vm99_vm1, %v86_v20 }
  0x36   :  { %6902 = vmatprep.mubr.f32.mxu0 %v5767_v22 }
  0xd9   :  { %v6810_v24 = vpop.f32.mrf.mxu0 }
  0xda   :  { %v8144_v25 = vadd.f32 %v6810_v24, %v8141_v23 }
  0xdb   :  { %v218_v26 = vpop.f32.mrf.mxu0 }
  0xdc   :  { %v8147_v27 = vadd.f32 %v8141_v23, %v218_v26  ;;  %v338_v29 = vmul.f32 %v8144_v25, %v8144_v25  ;;  %v301_v34 = vsel %vm299_vm2, %v8144_v25, 0.0 }
  0xdd   :  { %v6813_v28 = vpop.f32.mrf.mxu0 }
  0xde   :  { %v300_v30 = vsel %vm299_vm2, %v8147_v27, 0.0  ;;  %v337_v31 = vmul.f32 %v8147_v27, %v8147_v27  ;;  %v8156_v32 = vadd.f32 %v6813_v28, %v8141_v23  ;;  %v354_v40 = vsel %vm299_vm2, %v338_v29, 0.0 }
  0xdf   :  { %v228_v33 = vpop.f32.mrf.mxu0  ;;  %v302_v37 = vadd.f32 %v301_v34, %v300_v30 }
  0xe0   :  { %v353_v35 = vsel %vm299_vm2, %v337_v31, 0.0  ;;  %v8162_v36 = vadd.f32 %v8141_v23, %v228_v33  ;;  %v340_v38 = vmul.f32 %v8156_v32, %v8156_v32  ;;  %v305_v47 = vsel %vm299_vm2, %v8156_v32, 0.0 }
  0xe1   :  { %v6816_v39 = vpop.f32.mrf.mxu0  ;;  %v355_v44 = vadd.f32 %v354_v40, %v353_v35 }
  0xe2   :  { %v303_v41 = vsel %vm299_vm2, %v8162_v36, 0.0  ;;  %v339_v42 = vmul.f32 %v8162_v36, %v8162_v36  ;;  %v8172_v43 = vadd.f32 %v6816_v39, %v8141_v23  ;;  %v358_v50 = vsel %vm299_vm2, %v340_v38, 0.0 }
  0xe3   :  { %v304_v45 = vadd.f32 %v303_v41, %v302_v37  ;;  %v238_v46 = vpop.f32.mrf.mxu0 }
  0xe4   :  { %v356_v48 = vsel %vm299_vm2, %v339_v42, 0.0  ;;  %v8178_v49 = vadd.f32 %v8141_v23, %v238_v46  ;;  %v342_v54 = vmul.f32 %v8172_v43, %v8172_v43  ;;  %v309_v61 = vsel %vm299_vm2, %v8172_v43, 0.0 }
  0xe5   :  { %v357_v51 = vadd.f32 %v356_v48, %v355_v44  ;;  %v306_v52 = vadd.f32 %v305_v47, %v304_v45  ;;  %v6819_v53 = vpop.f32.mrf.mxu0 }
  0xe6   :  { %v307_v55 = vsel %vm299_vm2, %v8178_v49, 0.0  ;;  %v341_v56 = vmul.f32 %v8178_v49, %v8178_v49  ;;  %v8188_v57 = vadd.f32 %v6819_v53, %v8141_v23  ;;  %v362_v4 = vsel %vm299_vm2, %v342_v54, 0.0 }
  0xe7   :  { %v308_v58 = vadd.f32 %v307_v55, %v306_v52  ;;  %v359_v59 = vadd.f32 %v358_v50, %v357_v51  ;;  %v248_v60 = vpop.f32.mrf.mxu0 }
  0xe8   :  { %v360_v62 = vsel %vm299_vm2, %v341_v56, 0.0  ;;  %v8194_v63 = vadd.f32 %v8141_v23, %v248_v60  ;;  %v344_v1 = vmul.f32 %v8188_v57, %v8188_v57  ;;  %v313_v11 = vsel %vm299_vm2, %v8188_v57, 0.0 }
  0xe9   :  { %v361_v0 = vadd.f32 %v360_v62, %v359_v59  ;;  %v310_v2 = vadd.f32 %v309_v61, %v308_v58  ;;  %v6822_v3 = vpop.f32.mrf.mxu0 }
  0xea   :  { %v311_v5 = vsel %vm299_vm2, %v8194_v63, 0.0  ;;  %v343_v6 = vmul.f32 %v8194_v63, %v8194_v63  ;;  %v8204_v7 = vadd.f32 %v6822_v3, %v8141_v23  ;;  %v366_v14 = vsel %vm299_vm2, %v344_v1, 0.0 }
  0xeb   :  { %v312_v8 = vadd.f32 %v311_v5, %v310_v2  ;;  %v363_v9 = vadd.f32 %v362_v4, %v361_v0  ;;  %v258_v10 = vpop.f32.mrf.mxu0 }
  0xec   :  { %v364_v12 = vsel %vm299_vm2, %v343_v6, 0.0  ;;  %v8210_v13 = vadd.f32 %v8141_v23, %v258_v10  ;;  %v346_v18 = vmul.f32 %v8204_v7, %v8204_v7  ;;  %v317_v28 = vsel %vm299_vm2, %v8204_v7, 0.0 }
  0xed   :  { %v365_v15 = vadd.f32 %v364_v12, %v363_v9  ;;  %v314_v16 = vadd.f32 %v313_v11, %v312_v8  ;;  %v6825_v17 = vpop.f32.mrf.mxu0 }
  0xee   :  { %v315_v19 = vsel %vm299_vm2, %v8210_v13, 0.0  ;;  %v345_v20 = vmul.f32 %v8210_v13, %v8210_v13  ;;  %v8220_v21 = vadd.f32 %v6825_v17, %v8141_v23  ;;  %v370_v37 = vsel %vm299_vm2, %v346_v18, 0.0 }
  0xef   :  { %v316_v22 = vadd.f32 %v315_v19, %v314_v16  ;;  %v367_v24 = vadd.f32 %v366_v14, %v365_v15  ;;  %v268_v26 = vpop.f32.mrf.mxu0 }
  0xf0   :  { %v368_v29 = vsel %vm299_vm2, %v345_v20, 0.0  ;;  %v8226_v30 = vadd.f32 %v8141_v23, %v268_v26  ;;  %v348_v33 = vmul.f32 %v8220_v21, %v8220_v21  ;;  %v321_v45 = vsel %vm299_vm2, %v8220_v21, 0.0 }
  0xf1   :  { %v369_v31 = vadd.f32 %v368_v29, %v367_v24  ;;  %v318_v34 = vadd.f32 %v317_v28, %v316_v22  ;;  %v6828_v35 = vpop.f32.mrf.mxu0 }
  0xf2   :  { %v319_v38 = vsel %vm299_vm2, %v8226_v30, 0.0  ;;  %v347_v39 = vmul.f32 %v8226_v30, %v8226_v30  ;;  %v8236_v40 = vadd.f32 %v6828_v35, %v8141_v23  ;;  %v374_v48 = vsel %vm299_vm2, %v348_v33, 0.0 }
  0xf3   :  { %v320_v41 = vadd.f32 %v319_v38, %v318_v34  ;;  %v371_v42 = vadd.f32 %v370_v37, %v369_v31  ;;  %v278_v44 = vpop.f32.mrf.mxu0 }
  0xf4   :  { %v372_v46 = vsel %vm299_vm2, %v347_v39, 0.0  ;;  %v279_v47 = vadd.f32 %v8141_v23, %v278_v44  ;;  %v350_v53 = vmul.f32 %v8236_v40, %v8236_v40  ;;  %v325_v61 = vsel %vm299_vm2, %v8236_v40, 0.0 }
  0xf5   :  { %v373_v50 = vadd.f32 %v372_v46, %v371_v42  ;;  %v322_v51 = vadd.f32 %v321_v45, %v320_v41  ;;  %v6831_v52 = vpop.f32.mrf.mxu0 }
  0xf6   :  { %v323_v54 = vsel %vm299_vm2, %v279_v47, 0.0  ;;  %v349_v55 = vmul.f32 %v279_v47, %v279_v47  ;;  %v294_v56 = vadd.f32 %v6831_v52, %v8141_v23  ;;  %v378_v3 = vsel %vm299_vm2, %v350_v53, 0.0 }
  0xf7   :  { %v324_v58 = vadd.f32 %v323_v54, %v322_v51  ;;  %v375_v59 = vadd.f32 %v374_v48, %v373_v50  ;;  %v288_v60 = vpop.f32.mrf.mxu0  ;;  %v8270_v48 = vld [vmem:[%s10264_s25] ss:$0 sm:$0xff] }
  0xf8   :  { %v376_v62 = vsel %vm299_vm2, %v349_v55, 0.0  ;;  %v289_v0 = vadd.f32 %v8141_v23, %v288_v60  ;;  %v352_v4 = vmul.f32 %v294_v56, %v294_v56  ;;  %v329_v10 = vsel %vm299_vm2, %v294_v56, 0.0  ;;  %v8283_v54 = vld [vmem:[%s10265_s27] ss:$0 sm:$0xff] }
  0xf9   :  { %v377_v1 = vadd.f32 %v376_v62, %v375_v59  ;;  %v326_v2 = vadd.f32 %v325_v61, %v324_v58 }
  0xfa   :  { %v327_v5 = vsel %vm299_vm2, %v289_v0, 0.0  ;;  %v351_v6 = vmul.f32 %v289_v0, %v289_v0  ;;  %v382_v15 = vsel %vm299_vm2, %v352_v4, 0.0 }
  0xfb   :  { %v328_v8 = vadd.f32 %v327_v5, %v326_v2  ;;  %v379_v9 = vadd.f32 %v378_v3, %v377_v1 }
  0xfc   :  { %v380_v11 = vsel %vm299_vm2, %v351_v6, 0.0 }
  0xfd   :  { %v330_v12 = vadd.f32 %v329_v10, %v328_v8  ;;  %v381_v14 = vadd.f32 %v380_v11, %v379_v9 }
  0xff   :  { %v331_v16 = vrot.slane %v330_v12, 4  ;;  %v383_v23 = vadd.f32 %v382_v15, %v381_v14 }
 0x101   :  { %v332_v17 = vadd.f32 %v331_v16, %v330_v12  ;;  %v384_v18 = vrot.slane %v383_v23, 4 }
 0x103   :  { %v333_v19 = vrot.slane %v332_v17, 2  ;;  %v385_v20 = vadd.f32 %v384_v18, %v383_v23 }
 0x105   :  { %v334_v22 = vadd.f32 %v333_v19, %v332_v17  ;;  %v386_v24 = vrot.slane %v385_v20, 2 }
 0x107   :  { %v335_v26 = vrot.slane %v334_v22, 1  ;;  %v387_v28 = vadd.f32 %v386_v24, %v385_v20 }
 0x109   :  { %v336_v29 = vadd.f32 %v335_v26, %v334_v22  ;;  %v388_v31 = vrot.slane %v387_v28, 1 }
 0x10b   :  { %v389_v33 = vadd.f32 %v388_v31, %v387_v28  ;;  %v8256_v34 = vmul.f32 0.0078125, %v336_v29 }
 0x10d   :  { %v391_v35 = vmul.f32 0.0078125, %v389_v33  ;;  %v392_v37 = vmul.f32 %v8256_v34, %v8256_v34  ;;  %v408_v41 = vsub.f32 %v289_v0, %v8256_v34  ;;  %v409_v42 = vsub.f32 %v294_v56, %v8256_v34 }
 0x10e   :  { %v407_v44 = vsub.f32 %v8236_v40, %v8256_v34  ;;  %v406_v45 = vsub.f32 %v279_v47, %v8256_v34  ;;  %v405_v50 = vsub.f32 %v8220_v21, %v8256_v34  ;;  %v404_v51 = vsub.f32 %v8226_v30, %v8256_v34 }
 0x10f   :  { %v393_v38 = vsub.f32 %v391_v35, %v392_v37  ;;  %v403_v30 = vsub.f32 %v8204_v7, %v8256_v34  ;;  %v402_v62 = vsub.f32 %v8210_v13, %v8256_v34  ;;  %v401_v12 = vsub.f32 %v8188_v57, %v8256_v34 }
 0x110   :  { %v400_v16 = vsub.f32 %v8194_v63, %v8256_v34  ;;  %v399_v57 = vsub.f32 %v8172_v43, %v8256_v34  ;;  %v398_v18 = vsub.f32 %v8178_v49, %v8256_v34  ;;  %v397_v29 = vsub.f32 %v8156_v32, %v8256_v34 }
 0x111   :  { %v410_v39 = vadd.f32 1e-05, %v393_v38  ;;  %v396_v32 = vsub.f32 %v8162_v36, %v8256_v34 }
 0x113   :  { %7925 = vrsqrt.f32 %v410_v39 }
 0x120   :  { %v8265_v46 = vpop.eup %7925 }
 0x121   :  { %v426_v52 = vmul.f32 %v8265_v46, %v408_v41  ;;  %v427_v53 = vmul.f32 %v8265_v46, %v409_v42  ;;  %v425_v40 = vmul.f32 %v8265_v46, %v407_v44  ;;  %v424_v47 = vmul.f32 %v8265_v46, %v406_v45 }
 0x122   :  { %v423_v55 = vmul.f32 %v8265_v46, %v405_v50  ;;  %v422_v21 = vmul.f32 %v8265_v46, %v404_v51  ;;  %v421_v7 = vmul.f32 %v8265_v46, %v403_v30  ;;  %v420_v4 = vmul.f32 %v8265_v46, %v402_v62 }
 0x123   :  { %v448_v56 = vmul.f32 %v8270_v48, %v426_v52  ;;  %v449_v58 = vmul.f32 %v8270_v48, %v427_v53  ;;  %v447_v59 = vmul.f32 %v8270_v48, %v425_v40  ;;  %v446_v60 = vmul.f32 %v8270_v48, %v424_v47 }
 0x124   :  { %v445_v61 = vmul.f32 %v8270_v48, %v423_v55  ;;  %v444_v3 = vmul.f32 %v8270_v48, %v422_v21  ;;  %v443_v11 = vmul.f32 %v8270_v48, %v421_v7  ;;  %v442_v15 = vmul.f32 %v8270_v48, %v420_v4 }
 0x125   :  { %v470_v0 = vadd.f32 %v8283_v54, %v448_v56  ;;  %v471_v1 = vadd.f32 %v8283_v54, %v449_v58  ;;  %v469_v2 = vadd.f32 %v8283_v54, %v447_v59  ;;  %v468_v8 = vadd.f32 %v8283_v54, %v446_v60 }
 0x126   :  { %v467_v13 = vadd.f32 %v8283_v54, %v445_v61  ;;  %v466_v14 = vadd.f32 %v8283_v54, %v444_v3  ;;  %v419_v63 = vmul.f32 %v8265_v46, %v401_v12  ;;  %v418_v20 = vmul.f32 %v8265_v46, %v400_v16  ;;  %v5782_v16 = vld [vmem:[%s10266_s4 + $0xb8] sm:$0xff] }
 0x127   :  { %v502_v5 = vmul.f32 0.01, %v470_v0  ;;  %vm487_vm3 = vcmp.ge.f32.partialorder %v471_v1, 0.0  ;;  %v503_v6 = vmul.f32 0.01, %v471_v1  ;;  %vm486_vm4 = vcmp.ge.f32.partialorder %v470_v0, 0.0 }
 0x128   :  { %v501_v10 = vmul.f32 0.01, %v469_v2  ;;  %vm485_vm5 = vcmp.ge.f32.partialorder %v469_v2, 0.0  ;;  %v500_v17 = vmul.f32 0.01, %v468_v8  ;;  %vm484_vm6 = vcmp.ge.f32.partialorder %v468_v8, 0.0 }
 0x129   :  { %v8304_v9 = vsel %vm487_vm3, %v471_v1, %v503_v6  ;;  %v8315_v23 = vsel %vm486_vm4, %v470_v0, %v502_v5  ;;  %v499_v19 = vmul.f32 0.01, %v467_v13  ;;  %vm483_vm7 = vcmp.ge.f32.partialorder %v467_v13, 0.0 }
 0x12a   :  { %6832 = vmatprep.subr.mxu1 %v8304_v9  ;;  %6870 = vmatprep.subr.mxu0 %v8304_v9  ;;  %v8330_v22 = vsel %vm485_vm5, %v469_v2, %v501_v10  ;;  %v465_v43 = vadd.f32 %v8283_v54, %v443_v11  ;;  %v417_v49 = vmul.f32 %v8265_v46, %v399_v57  ;;  %v498_v24 = vmul.f32 0.01, %v466_v14  ;;  %v5769_v57 = vld [vmem:[%s10262_s3 + $0x30] sm:$0xff] }
 0x12b   :  { %6833 = vmatpush3.msra.mxu1 %v8304_v9  ;;  %6871 = vmatpush3.msra.mxu0 %v8304_v9  ;;  %v464_v26 = vadd.f32 %v8283_v54, %v442_v15  ;;  %v441_v28 = vmul.f32 %v8270_v48, %v419_v63  ;;  %v8343_v31 = vsel %vm484_vm6, %v468_v8, %v500_v17  ;;  %vm482_vm8 = vcmp.ge.f32.partialorder %v466_v14, 0.0  ;;  %v5768_v15 = vld [vmem:[%s10262_s3 + $0x28] sm:$0xff]  ;;  %v523_v17 = vld [vmem:[%s10262_s3 + $0x10] sm:$0xff]  ;;  %v5770_v63 = vld [vmem:[%s10262_s3 + $0x38] sm:$0xff] }
 0x12c   :  { %6834 = vmatprep.subr.mxu1 %v8315_v23  ;;  %6872 = vmatprep.subr.mxu0 %v8315_v23  ;;  %v440_v33 = vmul.f32 %v8270_v48, %v418_v20  ;;  %v416_v35 = vmul.f32 %v8265_v46, %v398_v18  ;;  %v8350_v37 = vsel %vm483_vm7, %v467_v13, %v499_v19  ;;  %v497_v38 = vmul.f32 0.01, %v465_v43  ;;  %v5781_v18 = vld [vmem:[%s10266_s4 + $0xb0] sm:$0xff]  ;;  %v621_v19 = vld [vmem:[%s10266_s4 + $0x58] sm:$0xff]  ;;  %v5780_v20 = vld [vmem:[%s10266_s4 + $0xa8] sm:$0xff] }
 0x12d   :  { %6835 = vmatpush3.msra.mxu1 %v8315_v23  ;;  %6873 = vmatpush3.msra.mxu0 %v8315_v23  ;;  %v463_v39 = vadd.f32 %v8283_v54, %v441_v28  ;;  %v439_v41 = vmul.f32 %v8270_v48, %v417_v49  ;;  %v415_v42 = vmul.f32 %v8265_v46, %v397_v29  ;;  %vm481_vm9 = vcmp.ge.f32.partialorder %v465_v43, 0.0  ;;  %v5779_v49 = vld [vmem:[%s10266_s4 + $0xa0] sm:$0xff]  ;;  %v619_v28 = vld [vmem:[%s10266_s4 + $0x48] sm:$0xff]  ;;  %v5777_v29 = vld [vmem:[%s10266_s4 + $0x90] sm:$0xff] }
 0x12e   :  { %6836 = vmatprep.subr.mxu1 %v8330_v22  ;;  %6874 = vmatprep.subr.mxu0 %v8330_v22  ;;  %v8361_v44 = vsel %vm482_vm8, %v466_v14, %v498_v24  ;;  %v496_v45 = vmul.f32 0.01, %v464_v26  ;;  %vm480_vm10 = vcmp.ge.f32.partialorder %v464_v26, 0.0  ;;  %v462_v36 = vadd.f32 %v8283_v54, %v440_v33  ;;  %v522_v14 = vld [vmem:[%s10262_s3 + $0x8] sm:$0xff]  ;;  %v620_v24 = vld [vmem:[%s10266_s4 + $0x50] sm:$0xff]  ;;  %v618_v33 = vld [vmem:[%s10266_s4 + $0x40] sm:$0xff] }
 0x12f   :  { %6837 = vmatpush3.msra.mxu1 %v8330_v22  ;;  %6875 = vmatpush3.msra.mxu0 %v8330_v22  ;;  %v438_v50 = vmul.f32 %v8270_v48, %v416_v35  ;;  %v414_v51 = vmul.f32 %v8265_v46, %v396_v32  ;;  %v395_v52 = vsub.f32 %v8144_v25, %v8256_v34  ;;  %v495_v47 = vmul.f32 0.01, %v463_v39  ;;  %v5776_v35 = vld [vmem:[%s10266_s4 + $0x88] sm:$0xff]  ;;  %v617_v32 = vld [vmem:[%s10266_s4 + $0x38] sm:$0xff] }
 0x130   :  { %6838 = vmatprep.subr.mxu1 %v8343_v31  ;;  %6876 = vmatprep.subr.mxu0 %v8343_v31  ;;  %v394_v53 = vsub.f32 %v8147_v27, %v8256_v34  ;;  %v8376_v40 = vsel %vm481_vm9, %v465_v43, %v497_v38  ;;  %v461_v55 = vadd.f32 %v8283_v54, %v439_v41  ;;  %vm479_vm11 = vcmp.ge.f32.partialorder %v463_v39, 0.0  ;;  %v524_v43 = vld [vmem:[%s10262_s3 + $0x18] sm:$0xff]  ;;  %v5775_v38 = vld [vmem:[%s10266_s4 + $0x80] sm:$0xff] }
 0x131   :  { %6839 = vmatpush3.msra.mxu1 %v8343_v31  ;;  %6877 = vmatpush3.msra.mxu0 %v8343_v31  ;;  %v437_v21 = vmul.f32 %v8270_v48, %v415_v42  ;;  %v8383_v25 = vsel %vm480_vm10, %v464_v26, %v496_v45  ;;  %v413_v27 = vmul.f32 %v8265_v46, %v395_v52  ;;  %v494_v34 = vmul.f32 0.01, %v462_v36  ;;  %v5778_v26 = vld [vmem:[%s10266_s4 + $0x98] sm:$0xff]  ;;  %v615_v42 = vld [vmem:[%s10266_s4 + $0x28] sm:$0xff]  ;;  %v5773_v45 = vld [vmem:[%s10266_s4 + $0x70] sm:$0xff] }
 0x132   :  { %6840 = vmatprep.subr.mxu1 %v8350_v37  ;;  %6878 = vmatprep.subr.mxu0 %v8350_v37  ;;  %v460_v30 = vadd.f32 %v8283_v54, %v438_v50  ;;  %v436_v56 = vmul.f32 %v8270_v48, %v414_v51  ;;  %v412_v58 = vmul.f32 %v8265_v46, %v394_v53  ;;  %vm478_vm12 = vcmp.ge.f32.partialorder %v462_v36, 0.0  ;;  %v5774_v41 = vld [vmem:[%s10266_s4 + $0x78] sm:$0xff]  ;;  %v5772_v50 = vld [vmem:[%s10266_s4 + $0x68] sm:$0xff]  ;;  %v5771_v52 = vld [vmem:[%s10266_s4 + $0x60] sm:$0xff] }
 0x133   :  { %6841 = vmatpush3.msra.mxu1 %v8350_v37  ;;  %6879 = vmatpush3.msra.mxu0 %v8350_v37  ;;  %v8395_v59 = vsel %vm479_vm11, %v463_v39, %v495_v47  ;;  %v493_v60 = vmul.f32 0.01, %v461_v55  ;;  %v459_v61 = vadd.f32 %v8283_v54, %v437_v21  ;;  %v435_v62 = vmul.f32 %v8270_v48, %v413_v27  ;;  %v616_v39 = vld [vmem:[%s10266_s4 + $0x30] sm:$0xff]  ;;  %v613_v51 = vld [vmem:[%s10266_s4 + $0x18] sm:$0xff]  ;;  %v611_v47 = vld [vmem:[%s10266_s4 + $0x8] sm:$0xff] }
 0x134   :  { %6842 = vmatprep.subr.mxu1 %v8361_v44  ;;  %6880 = vmatprep.subr.mxu0 %v8361_v44  ;;  %vm477_vm13 = vcmp.ge.f32.partialorder %v461_v55, 0.0  ;;  %v8403_v46 = vsel %vm478_vm12, %v462_v36, %v494_v34  ;;  %v492_v0 = vmul.f32 0.01, %v460_v30  ;;  %v458_v1 = vadd.f32 %v8283_v54, %v436_v56  ;;  %v614_v36 = vld [vmem:[%s10266_s4 + $0x20] sm:$0xff]  ;;  %v612_v53 = vld [vmem:[%s10266_s4 + $0x10] sm:$0xff] }
 0x135   :  { %6843 = vmatpush3.msra.mxu1 %v8361_v44  ;;  %6881 = vmatpush3.msra.mxu0 %v8361_v44  ;;  %v434_v2 = vmul.f32 %v8270_v48, %v412_v58  ;;  %vm476_vm14 = vcmp.ge.f32.partialorder %v460_v30, 0.0  ;;  %v8411_v7 = vsel %vm477_vm13, %v461_v55, %v493_v60  ;;  %v491_v3 = vmul.f32 0.01, %v459_v61  ;;  %v610_v55 = vld [vmem:[%s10266_s4] sm:$0xff] }
 0x136   :  { %6844 = vmatprep.subr.mxu1 %v8376_v40  ;;  %6882 = vmatprep.subr.mxu0 %v8376_v40  ;;  %v457_v4 = vadd.f32 %v8283_v54, %v435_v62  ;;  %vm475_vm15 = vcmp.ge.f32.partialorder %v459_v61, 0.0  ;;  %v8418_v48 = vsel %vm476_vm14, %v460_v30, %v492_v0  ;;  %v490_v5 = vmul.f32 0.01, %v458_v1  ;;  %v5791_v62 = vld [vmem:[%s10262_s3 + $0x40] sm:$0xff]  ;;  %v5792_v0 = vld [vmem:[%s10262_s3 + $0x48] sm:$0xff] }
 0x137   :  { %6845 = vmatpush3.msra.mxu1 %v8376_v40  ;;  %6883 = vmatpush3.msra.mxu0 %v8376_v40  ;;  %v456_v6 = vadd.f32 %v8283_v54, %v434_v2  ;;  %vm474_vm0 = vcmp.ge.f32.partialorder %v458_v1, 0.0  ;;  %v8425_v8 = vsel %vm475_vm15, %v459_v61, %v491_v3  ;;  %v5794_v2 = vld [vmem:[%s10262_s3 + $0x58] sm:$0xff]  ;;  %v5811_v3 = vld [vmem:[%s10262_s3 + $0x60] sm:$0xff]  ;;  %vm2359_vm4 = vcmask 523264  }
 0x138   :  { %6846 = vmatprep.subr.mxu1 %v8383_v25  ;;  %6884 = vmatprep.subr.mxu0 %v8383_v25  ;;  %v489_v13 = vmul.f32 0.01, %v457_v4  ;;  %vm473_vm1 = vcmp.ge.f32.partialorder %v457_v4, 0.0  ;;  %v8431_v54 = vsel %vm474_vm0, %v458_v1, %v490_v5  ;;  %v5793_v1 = vld [vmem:[%s10262_s3 + $0x50] sm:$0xff]  ;;  %v5846_v5 = vld [vmem:[%s10266_s4 + $0x1d8] sm:$0xff] }
 0x139   :  { %6847 = vmatpush3.msra.mxu1 %v8383_v25  ;;  %6885 = vmatpush3.msra.mxu0 %v8383_v25  ;;  %v488_v10 = vmul.f32 0.01, %v456_v6  ;;  %vm472_vm3 = vcmp.ge.f32.partialorder %v456_v6, 0.0 }
 0x13a   :  { %6848 = vmatprep.subr.mxu1 %v8395_v59  ;;  %6886 = vmatprep.subr.mxu0 %v8395_v59  ;;  %v8437_v11 = vsel %vm473_vm1, %v457_v4, %v489_v13  ;;  %v5812_v4 = vld [vmem:[%s10262_s3 + $0x68] sm:$0xff]  ;;  %v5845_v13 = vld [vmem:[%s10266_s4 + $0x1d0] sm:$0xff] }
 0x13b   :  { %6849 = vmatpush3.msra.mxu1 %v8395_v59  ;;  %6887 = vmatpush3.msra.mxu0 %v8395_v59  ;;  %v8443_v12 = vsel %vm472_vm3, %v456_v6, %v488_v10  ;;  %v5813_v6 = vld [vmem:[%s10262_s3 + $0x70] sm:$0xff]  ;;  %v5814_v10 = vld [vmem:[%s10262_s3 + $0x78] sm:$0xff] }
 0x13c   :  { %6850 = vmatprep.subr.mxu1 %v8403_v46  ;;  %6888 = vmatprep.subr.mxu0 %v8403_v46 }
 0x13d   :  { %6851 = vmatpush3.msra.mxu1 %v8403_v46  ;;  %6889 = vmatpush3.msra.mxu0 %v8403_v46 }
 0x13e   :  { %6852 = vmatprep.subr.mxu1 %v8411_v7  ;;  %6890 = vmatprep.subr.mxu0 %v8411_v7 }
 0x13f   :  { %6853 = vmatpush3.msra.mxu1 %v8411_v7  ;;  %6891 = vmatpush3.msra.mxu0 %v8411_v7 }
 0x140   :  { %6854 = vmatprep.subr.mxu1 %v8418_v48  ;;  %6892 = vmatprep.subr.mxu0 %v8418_v48 }
 0x141   :  { %6855 = vmatpush3.msra.mxu1 %v8418_v48  ;;  %6893 = vmatpush3.msra.mxu0 %v8418_v48 }
 0x142   :  { %6856 = vmatprep.subr.mxu1 %v8425_v8  ;;  %6894 = vmatprep.subr.mxu0 %v8425_v8 }
 0x143   :  { %6857 = vmatpush3.msra.mxu1 %v8425_v8  ;;  %6895 = vmatpush3.msra.mxu0 %v8425_v8 }
 0x144   :  { %6858 = vmatprep.subr.mxu1 %v8431_v54  ;;  %6896 = vmatprep.subr.mxu0 %v8431_v54 }
 0x145   :  { %6859 = vmatpush3.msra.mxu1 %v8431_v54  ;;  %6897 = vmatpush3.msra.mxu0 %v8431_v54 }
 0x146   :  { %6860 = vmatprep.subr.mxu1 %v8437_v11  ;;  %6898 = vmatprep.subr.mxu0 %v8437_v11 }
 0x147   :  { %6861 = vmatpush3.msra.mxu1 %v8437_v11  ;;  %6899 = vmatpush3.msra.mxu0 %v8437_v11 }
 0x148   :  { %6862 = vmatprep.subr.mxu1 %v8443_v12  ;;  %6900 = vmatprep.subr.mxu0 %v8443_v12 }
 0x149   :  { %6863 = vmatpush3.msra.mxu1 %v8443_v12  ;;  %6901 = vmatpush3.msra.mxu0 %v8443_v12 }
 0x14a   :  { %6865 = vmatmul.mubr.f32.vlgmr.msra.gmra.mxu1 %v522_v14  ;;  %6903 = vmatmul.mubr.f32.vlgmr.msra.gmra.mxu0 %v5768_v15  ;;  %v5844_v14 = vld [vmem:[%s10266_s4 + $0x1c8] sm:$0xff]  ;;  %v5843_v15 = vld [vmem:[%s10266_s4 + $0x1c0] sm:$0xff] }
 0x14b   :  { %6908 = vmatprep.subr.mxu1 %v5782_v16  ;;  %6867 = vmatprep.mubr.f32.mxu1 %v523_v17  ;;  %v5805_v17 = vld [vmem:[%s10266_s4 + $0x110] sm:$0xff] }
 0x14c   :  { %6909 = vmatpush3.msra.mxu1 %v5782_v16  ;;  %6905 = vmatprep.mubr.f32.mxu0 %v5769_v57  ;;  %v5806_v16 = vld [vmem:[%s10266_s4 + $0x118] sm:$0xff] }
 0x14d   :  { %6910 = vmatprep.subr.mxu1 %v5781_v18  ;;  %6938 = vmatprep.subr.mxu0 %v621_v19  ;;  %v5842_v57 = vld [vmem:[%s10266_s4 + $0x1b8] sm:$0xff] }
 0x14e   :  { %6911 = vmatpush3.msra.mxu1 %v5781_v18  ;;  %6906 = vmatmul.mubr.f32.gmra.mxu0 %v5770_v63  ;;  %v5804_v18 = vld [vmem:[%s10266_s4 + $0x108] sm:$0xff]  ;;  %v5803_v63 = vld [vmem:[%s10266_s4 + $0x100] sm:$0xff] }
 0x14f   :  { %6912 = vmatprep.subr.mxu1 %v5780_v20  ;;  %6868 = vmatmul.mubr.f32.gmra.mxu1 %v524_v43  ;;  %v5802_v43 = vld [vmem:[%s10266_s4 + $0xf8] sm:$0xff] }
 0x150   :  { %6913 = vmatpush3.msra.mxu1 %v5780_v20  ;;  %6939 = vmatpush3.msra.mxu0 %v621_v19  ;;  %v5841_v19 = vld [vmem:[%s10266_s4 + $0x1b0] sm:$0xff]  ;;  %v5840_v20 = vld [vmem:[%s10266_s4 + $0x1a8] sm:$0xff] }
 0x151   :  { %6914 = vmatprep.subr.mxu1 %v5779_v49  ;;  %6940 = vmatprep.subr.mxu0 %v620_v24 }
 0x152   :  { %6915 = vmatpush3.msra.mxu1 %v5779_v49  ;;  %6941 = vmatpush3.msra.mxu0 %v620_v24  ;;  %v5839_v49 = vld [vmem:[%s10266_s4 + $0x1a0] sm:$0xff]  ;;  %v5801_v24 = vld [vmem:[%s10266_s4 + $0xf0] sm:$0xff] }
 0x153   :  { %6916 = vmatprep.subr.mxu1 %v5778_v26  ;;  %6942 = vmatprep.subr.mxu0 %v619_v28 }
 0x154   :  { %6917 = vmatpush3.msra.mxu1 %v5778_v26  ;;  %6943 = vmatpush3.msra.mxu0 %v619_v28  ;;  %v5838_v26 = vld [vmem:[%s10266_s4 + $0x198] sm:$0xff]  ;;  %v5800_v28 = vld [vmem:[%s10266_s4 + $0xe8] sm:$0xff] }
 0x155   :  { %6918 = vmatprep.subr.mxu1 %v5777_v29  ;;  %6944 = vmatprep.subr.mxu0 %v618_v33 }
 0x156   :  { %6919 = vmatpush3.msra.mxu1 %v5777_v29  ;;  %6945 = vmatpush3.msra.mxu0 %v618_v33  ;;  %v5837_v29 = vld [vmem:[%s10266_s4 + $0x190] sm:$0xff]  ;;  %v5799_v33 = vld [vmem:[%s10266_s4 + $0xe0] sm:$0xff] }
 0x157   :  { %6920 = vmatprep.subr.mxu1 %v5776_v35  ;;  %6946 = vmatprep.subr.mxu0 %v617_v32 }
 0x158   :  { %6921 = vmatpush3.msra.mxu1 %v5776_v35  ;;  %6947 = vmatpush3.msra.mxu0 %v617_v32  ;;  %v5836_v35 = vld [vmem:[%s10266_s4 + $0x188] sm:$0xff]  ;;  %v5798_v32 = vld [vmem:[%s10266_s4 + $0xd8] sm:$0xff] }
 0x159   :  { %6922 = vmatprep.subr.mxu1 %v5775_v38  ;;  %6948 = vmatprep.subr.mxu0 %v616_v39 }
 0x15a   :  { %6923 = vmatpush3.msra.mxu1 %v5775_v38  ;;  %6949 = vmatpush3.msra.mxu0 %v616_v39  ;;  %v5835_v38 = vld [vmem:[%s10266_s4 + $0x180] sm:$0xff]  ;;  %v5797_v39 = vld [vmem:[%s10266_s4 + $0xd0] sm:$0xff] }
 0x15b   :  { %6924 = vmatprep.subr.mxu1 %v5774_v41  ;;  %6950 = vmatprep.subr.mxu0 %v615_v42 }
 0x15c   :  { %6925 = vmatpush3.msra.mxu1 %v5774_v41  ;;  %6951 = vmatpush3.msra.mxu0 %v615_v42  ;;  %v5796_v41 = vld [vmem:[%s10266_s4 + $0xc8] sm:$0xff]  ;;  %v5795_v42 = vld [vmem:[%s10266_s4 + $0xc0] sm:$0xff] }
 0x15d   :  { %6926 = vmatprep.subr.mxu1 %v5773_v45  ;;  %6952 = vmatprep.subr.mxu0 %v614_v36 }
 0x15e   :  { %6927 = vmatpush3.msra.mxu1 %v5773_v45  ;;  %6953 = vmatpush3.msra.mxu0 %v614_v36  ;;  %v5826_v45 = vld [vmem:[%s10266_s4 + $0x178] sm:$0xff] }
 0x15f   :  { %6928 = vmatprep.subr.mxu1 %v5772_v50  ;;  %6954 = vmatprep.subr.mxu0 %v613_v51 }
 0x160   :  { %6929 = vmatpush3.msra.mxu1 %v5772_v50  ;;  %6955 = vmatpush3.msra.mxu0 %v613_v51 }
 0x161   :  { %6930 = vmatprep.subr.mxu1 %v5771_v52  ;;  %6956 = vmatprep.subr.mxu0 %v612_v53 }
 0x162   :  { %6931 = vmatpush3.msra.mxu1 %v5771_v52  ;;  %6957 = vmatpush3.msra.mxu0 %v612_v53 }
 0x163   :  { %6968 = vmatprep.subr.mxu1 %v8304_v9  ;;  %6958 = vmatprep.subr.mxu0 %v611_v47 }
 0x164   :  { %6959 = vmatpush3.msra.mxu0 %v611_v47 }
 0x165   :  { %6960 = vmatprep.subr.mxu0 %v610_v55 }
 0x166   :  { %6961 = vmatpush3.msra.mxu0 %v610_v55 }
 0x167   :  { %7006 = vmatprep.subr.mxu0 %v5806_v16 }
 0x20a   :  { %v6866_v21 = vpop.f32.mrf.mxu1  ;;  %v6904_v27 = vpop.f32.mrf.mxu0 }
 0x20c   :  { %v591_v34 = vpop.f32.mrf.mxu1  ;;  %v693_v30 = vpop.f32.mrf.mxu0 }
 0x20d   :  { %6932 = vmatprep.mubr.msk.f32.mxu1 %vm299_vm2, %v693_v30  ;;  %6962 = vmatprep.mubr.msk.f32.mxu0 %vm299_vm2, %v591_v34 }
 0x20e   :  { %6933 = vmatmul.mubr.msk.f32.vlgmr.msra.gmra.mxu1 %vm299_vm2, %v6904_v27  ;;  %6963 = vmatmul.mubr.msk.f32.vlgmr.msra.gmra.mxu0 %vm299_vm2, %v6866_v21  ;;  %v6907_v56 = vpop.f32.mrf.mxu0 }
 0x20f   :  { %6969 = vmatpush3.msra.mxu1 %v8304_v9  ;;  %v6869_v58 = vpop.f32.mrf.mxu1  ;;  %7007 = vmatpush3.msra.mxu0 %v5806_v16 }
 0x210   :  { %6970 = vmatprep.subr.mxu1 %v8315_v23  ;;  %v703_v60 = vpop.f32.mrf.mxu0  ;;  %7008 = vmatprep.subr.mxu0 %v5805_v17 }
 0x211   :  { %6971 = vmatpush3.msra.mxu1 %v8315_v23  ;;  %v601_v61 = vpop.f32.mrf.mxu1  ;;  %6935 = vmatprep.mubr.msk.f32.mxu1 %vm299_vm2, %v703_v60 }
 0x212   :  { %6972 = vmatprep.subr.mxu1 %v8330_v22  ;;  %6965 = vmatprep.mubr.msk.f32.mxu0 %vm299_vm2, %v601_v61  ;;  %v5824_v61 = vld [vmem:[%s10266_s4 + $0x168] sm:$0xff] }
 0x213   :  { %6973 = vmatpush3.msra.mxu1 %v8330_v22  ;;  %6966 = vmatmul.mubr.msk.f32.gmra.mxu0 %vm299_vm2, %v6869_v58  ;;  %v5825_v58 = vld [vmem:[%s10266_s4 + $0x170] sm:$0xff] }
 0x214   :  { %6974 = vmatprep.subr.mxu1 %v8343_v31  ;;  %6936 = vmatmul.mubr.msk.f32.gmra.mxu1 %vm299_vm2, %v6907_v56 }
 0x215   :  { %6975 = vmatpush3.msra.mxu1 %v8343_v31  ;;  %7000 = vmatprep.mubr.f32.mxu1 %v5791_v62 }
 0x216   :  { %6976 = vmatprep.subr.mxu1 %v8350_v37  ;;  %7009 = vmatpush3.msra.mxu0 %v5805_v17 }
 0x217   :  { %6977 = vmatpush3.msra.mxu1 %v8350_v37  ;;  %7010 = vmatprep.subr.mxu0 %v5804_v18 }
 0x218   :  { %6978 = vmatprep.subr.mxu1 %v8361_v44  ;;  %7011 = vmatpush3.msra.mxu0 %v5804_v18  ;;  %v5832_v18 = vld [vmem:[%s10262_s3 + $0x88] sm:$0xff] }
 0x219   :  { %6979 = vmatpush3.msra.mxu1 %v8361_v44  ;;  %7012 = vmatprep.subr.mxu0 %v5803_v63 }
 0x21a   :  { %6980 = vmatprep.subr.mxu1 %v8376_v40  ;;  %7013 = vmatpush3.msra.mxu0 %v5803_v63  ;;  %v5833_v63 = vld [vmem:[%s10262_s3 + $0x90] sm:$0xff] }
 0x21b   :  { %6981 = vmatpush3.msra.mxu1 %v8376_v40  ;;  %7014 = vmatprep.subr.mxu0 %v5802_v43 }
 0x21c   :  { %6982 = vmatprep.subr.mxu1 %v8383_v25  ;;  %7015 = vmatpush3.msra.mxu0 %v5802_v43  ;;  %v5834_v43 = vld [vmem:[%s10262_s3 + $0x98] sm:$0xff] }
 0x21d   :  { %6983 = vmatpush3.msra.mxu1 %v8383_v25  ;;  %7016 = vmatprep.subr.mxu0 %v5801_v24 }
 0x21e   :  { %6984 = vmatprep.subr.mxu1 %v8395_v59  ;;  %7017 = vmatpush3.msra.mxu0 %v5801_v24  ;;  %v5863_v24 = vld [vmem:[%s10266_s4 + $0x220] sm:$0xff] }
 0x21f   :  { %6985 = vmatpush3.msra.mxu1 %v8395_v59  ;;  %7018 = vmatprep.subr.mxu0 %v5800_v28 }
 0x220   :  { %6986 = vmatprep.subr.mxu1 %v8403_v46  ;;  %7019 = vmatpush3.msra.mxu0 %v5800_v28  ;;  %v5861_v28 = vld [vmem:[%s10266_s4 + $0x210] sm:$0xff] }
 0x221   :  { %6987 = vmatpush3.msra.mxu1 %v8403_v46  ;;  %7020 = vmatprep.subr.mxu0 %v5799_v33 }
 0x222   :  { %6988 = vmatprep.subr.mxu1 %v8411_v7  ;;  %7021 = vmatpush3.msra.mxu0 %v5799_v33  ;;  %v5859_v33 = vld [vmem:[%s10266_s4 + $0x200] sm:$0xff] }
 0x223   :  { %6989 = vmatpush3.msra.mxu1 %v8411_v7  ;;  %7022 = vmatprep.subr.mxu0 %v5798_v32 }
 0x224   :  { %6990 = vmatprep.subr.mxu1 %v8418_v48  ;;  %7023 = vmatpush3.msra.mxu0 %v5798_v32  ;;  %v5857_v32 = vld [vmem:[%s10266_s4 + $0x1f0] sm:$0xff] }
 0x225   :  { %6991 = vmatpush3.msra.mxu1 %v8418_v48  ;;  %7024 = vmatprep.subr.mxu0 %v5797_v39 }
 0x226   :  { %6992 = vmatprep.subr.mxu1 %v8425_v8  ;;  %7025 = vmatpush3.msra.mxu0 %v5797_v39  ;;  %v5855_v39 = vld [vmem:[%s10266_s4 + $0x1e0] sm:$0xff] }
 0x227   :  { %6993 = vmatpush3.msra.mxu1 %v8425_v8  ;;  %7026 = vmatprep.subr.mxu0 %v5796_v41 }
 0x228   :  { %6994 = vmatprep.subr.mxu1 %v8431_v54  ;;  %7027 = vmatpush3.msra.mxu0 %v5796_v41 }
 0x229   :  { %6995 = vmatpush3.msra.mxu1 %v8431_v54  ;;  %7028 = vmatprep.subr.mxu0 %v5795_v42 }
 0x22a   :  { %6996 = vmatprep.subr.mxu1 %v8437_v11  ;;  %7029 = vmatpush3.msra.mxu0 %v5795_v42 }
 0x22b   :  { %6997 = vmatpush3.msra.mxu1 %v8437_v11  ;;  %7074 = vmatprep.subr.mxu0 %v5826_v45 }
 0x22c   :  { %6998 = vmatprep.subr.mxu1 %v8443_v12 }
 0x22d   :  { %6999 = vmatpush3.msra.mxu1 %v8443_v12 }
 0x22e   :  { %7001 = vmatmul.mubr.f32.vlgmr.msra.gmra.mxu1 %v5792_v0  ;;  %7036 = vmatprep.subr.mxu1 %v8304_v9  ;;  %v5823_v0 = vld [vmem:[%s10266_s4 + $0x160] sm:$0xff] }
 0x22f   :  { %7037 = vmatpush3.msra.mxu1 %v8304_v9  ;;  %7003 = vmatprep.mubr.f32.mxu1 %v5793_v1  ;;  %v5822_v1 = vld [vmem:[%s10266_s4 + $0x158] sm:$0xff] }
 0x230   :  { %7038 = vmatprep.subr.mxu1 %v8315_v23 }
 0x231   :  { %7039 = vmatpush3.msra.mxu1 %v8315_v23 }
 0x232   :  { %7004 = vmatmul.mubr.f32.gmra.mxu1 %v5794_v2  ;;  %7040 = vmatprep.subr.mxu1 %v8330_v22  ;;  %v5821_v2 = vld [vmem:[%s10266_s4 + $0x150] sm:$0xff] }
 0x233   :  { %7041 = vmatpush3.msra.mxu1 %v8330_v22  ;;  %7068 = vmatprep.mubr.f32.mxu1 %v5811_v3  ;;  %v5820_v3 = vld [vmem:[%s10266_s4 + $0x148] sm:$0xff] }
 0x234   :  { %7042 = vmatprep.subr.mxu1 %v8343_v31 }
 0x235   :  { %7043 = vmatpush3.msra.mxu1 %v8343_v31 }
 0x236   :  { %7044 = vmatprep.subr.mxu1 %v8350_v37 }
 0x237   :  { %7045 = vmatpush3.msra.mxu1 %v8350_v37 }
 0x238   :  { %7046 = vmatprep.subr.mxu1 %v8361_v44 }
 0x239   :  { %7047 = vmatpush3.msra.mxu1 %v8361_v44 }
 0x23a   :  { %7048 = vmatprep.subr.mxu1 %v8376_v40 }
 0x23b   :  { %7049 = vmatpush3.msra.mxu1 %v8376_v40 }
 0x23c   :  { %7050 = vmatprep.subr.mxu1 %v8383_v25 }
 0x23d   :  { %7051 = vmatpush3.msra.mxu1 %v8383_v25 }
 0x23e   :  { %7052 = vmatprep.subr.mxu1 %v8395_v59 }
 0x23f   :  { %7053 = vmatpush3.msra.mxu1 %v8395_v59 }
 0x240   :  { %7054 = vmatprep.subr.mxu1 %v8403_v46 }
 0x241   :  { %7055 = vmatpush3.msra.mxu1 %v8403_v46 }
 0x242   :  { %7056 = vmatprep.subr.mxu1 %v8411_v7 }
 0x243   :  { %7057 = vmatpush3.msra.mxu1 %v8411_v7 }
 0x244   :  { %7058 = vmatprep.subr.mxu1 %v8418_v48 }
 0x245   :  { %7059 = vmatpush3.msra.mxu1 %v8418_v48 }
 0x246   :  { %7060 = vmatprep.subr.mxu1 %v8425_v8 }
 0x247   :  { %7061 = vmatpush3.msra.mxu1 %v8425_v8 }
 0x248   :  { %7062 = vmatprep.subr.mxu1 %v8431_v54 }
 0x249   :  { %7063 = vmatpush3.msra.mxu1 %v8431_v54 }
 0x24a   :  { %7064 = vmatprep.subr.mxu1 %v8437_v11 }
 0x24b   :  { %7065 = vmatpush3.msra.mxu1 %v8437_v11 }
 0x24c   :  { %7066 = vmatprep.subr.mxu1 %v8443_v12 }
 0x24d   :  { %7067 = vmatpush3.msra.mxu1 %v8443_v12 }
 0x24e   :  { %7069 = vmatmul.mubr.f32.vlgmr.msra.gmra.mxu1 %v5812_v4  ;;  %7142 = vmatprep.subr.mxu1 %v5846_v5  ;;  %v5819_v4 = vld [vmem:[%s10266_s4 + $0x140] sm:$0xff] }
 0x24f   :  { %7143 = vmatpush3.msra.mxu1 %v5846_v5  ;;  %7071 = vmatprep.mubr.f32.mxu1 %v5813_v6  ;;  %v5818_v5 = vld [vmem:[%s10266_s4 + $0x138] sm:$0xff]  ;;  %v5817_v6 = vld [vmem:[%s10266_s4 + $0x130] sm:$0xff] }
 0x250   :  { %7144 = vmatprep.subr.mxu1 %v5845_v13 }
 0x251   :  { %7145 = vmatpush3.msra.mxu1 %v5845_v13  ;;  %v5816_v13 = vld [vmem:[%s10266_s4 + $0x128] sm:$0xff] }
 0x252   :  { %7072 = vmatmul.mubr.f32.gmra.mxu1 %v5814_v10  ;;  %7146 = vmatprep.subr.mxu1 %v5844_v14  ;;  %v5815_v10 = vld [vmem:[%s10266_s4 + $0x120] sm:$0xff] }
 0x253   :  { %7147 = vmatpush3.msra.mxu1 %v5844_v14 }
 0x254   :  { %7148 = vmatprep.subr.mxu1 %v5843_v15 }
 0x255   :  { %7149 = vmatpush3.msra.mxu1 %v5843_v15 }
 0x256   :  { %7150 = vmatprep.subr.mxu1 %v5842_v57 }
 0x257   :  { %7151 = vmatpush3.msra.mxu1 %v5842_v57  ;;  %v5831_v57 = vld [vmem:[%s10262_s3 + $0x80] sm:$0xff] }
 0x258   :  { %7152 = vmatprep.subr.mxu1 %v5841_v19 }
 0x259   :  { %7153 = vmatpush3.msra.mxu1 %v5841_v19  ;;  %v5866_v19 = vld [vmem:[%s10266_s4 + $0x238] sm:$0xff] }
 0x25a   :  { %7154 = vmatprep.subr.mxu1 %v5840_v20 }
 0x25b   :  { %7155 = vmatpush3.msra.mxu1 %v5840_v20  ;;  %v5865_v20 = vld [vmem:[%s10266_s4 + $0x230] sm:$0xff] }
 0x25c   :  { %7156 = vmatprep.subr.mxu1 %v5839_v49 }
 0x25d   :  { %7157 = vmatpush3.msra.mxu1 %v5839_v49  ;;  %v5864_v49 = vld [vmem:[%s10266_s4 + $0x228] sm:$0xff] }
 0x25e   :  { %7158 = vmatprep.subr.mxu1 %v5838_v26 }
 0x25f   :  { %7159 = vmatpush3.msra.mxu1 %v5838_v26  ;;  %v5862_v26 = vld [vmem:[%s10266_s4 + $0x218] sm:$0xff] }
 0x260   :  { %7160 = vmatprep.subr.mxu1 %v5837_v29 }
 0x261   :  { %7161 = vmatpush3.msra.mxu1 %v5837_v29  ;;  %v5860_v29 = vld [vmem:[%s10266_s4 + $0x208] sm:$0xff] }
 0x262   :  { %7162 = vmatprep.subr.mxu1 %v5836_v35 }
 0x263   :  { %7163 = vmatpush3.msra.mxu1 %v5836_v35  ;;  %v5858_v35 = vld [vmem:[%s10266_s4 + $0x1f8] sm:$0xff] }
 0x264   :  { %7164 = vmatprep.subr.mxu1 %v5835_v38 }
 0x265   :  { %7165 = vmatpush3.msra.mxu1 %v5835_v38  ;;  %v5856_v38 = vld [vmem:[%s10266_s4 + $0x1e8] sm:$0xff] }
 0x266   :  { %7172 = vmatprep.subr.mxu1 %v8304_v9 }
 0x2ce   :  { %v6934_v36 = vpop.f32.mrf.mxu1  ;;  %v6964_v50 = vpop.f32.mrf.mxu0 }
 0x2cf   :  { %v8711_v51 = vadd.f32 %v6964_v50, %v6934_v36 }
 0x2d0   :  { %v803_v52 = vpop.f32.mrf.mxu1  ;;  %v900_v53 = vpop.f32.mrf.mxu0 }
 0x2d1   :  { %v8713_v47 = vadd.f32 %v900_v53, %v803_v52 }
 0x2d3   :  { %v6967_v21 = vpop.f32.mrf.mxu0 }
 0x2d4   :  { %v6937_v55 = vpop.f32.mrf.mxu1 }
 0x2d5   :  { %v8715_v27 = vadd.f32 %v6967_v21, %v6937_v55  ;;  %v910_v41 = vpop.f32.mrf.mxu0 }
 0x2d6   :  { %v8717_v34 = vpop.f32.mrf.mxu1 }
 0x2d7   :  { %v911_v53 = vadd.f32 %v910_v41, %v8717_v34 }
 0x2ee   :  { %v7002_v30 = vpop.f32.mrf.mxu1 }
 0x2f0   :  { %v990_v56 = vpop.f32.mrf.mxu1 }
 0x2f1   :  { %7030 = vmatprep.mubr.msk.f32.mxu0 %vm299_vm2, %v990_v56 }
 0x2f2   :  { %v7005_v60 = vpop.f32.mrf.mxu1  ;;  %7031 = vmatmul.mubr.msk.f32.vlgmr.msra.gmra.mxu0 %vm299_vm2, %v7002_v30 }
 0x2f3   :  { %7075 = vmatpush3.msra.mxu0 %v5826_v45 }
 0x2f4   :  { %7076 = vmatprep.subr.mxu0 %v5825_v58  ;;  %v1000_v62 = vpop.f32.mrf.mxu1 }
 0x2f5   :  { %7077 = vmatpush3.msra.mxu0 %v5825_v58  ;;  %7033 = vmatprep.mubr.msk.f32.mxu0 %vm299_vm2, %v1000_v62 }
 0x2f6   :  { %7078 = vmatprep.subr.mxu0 %v5824_v61  ;;  %7034 = vmatmul.mubr.msk.f32.gmra.mxu0 %vm299_vm2, %v7005_v60 }
 0x2f7   :  { %7079 = vmatpush3.msra.mxu0 %v5824_v61 }
 0x2f8   :  { %7080 = vmatprep.subr.mxu0 %v5823_v0 }
 0x2f9   :  { %7081 = vmatpush3.msra.mxu0 %v5823_v0 }
 0x2fa   :  { %7082 = vmatprep.subr.mxu0 %v5822_v1 }
 0x2fb   :  { %7083 = vmatpush3.msra.mxu0 %v5822_v1 }
 0x2fc   :  { %7084 = vmatprep.subr.mxu0 %v5821_v2 }
 0x2fd   :  { %7085 = vmatpush3.msra.mxu0 %v5821_v2 }
 0x2fe   :  { %7086 = vmatprep.subr.mxu0 %v5820_v3 }
 0x2ff   :  { %7087 = vmatpush3.msra.mxu0 %v5820_v3  ;;  %v5851_v3 = vld [vmem:[%s10262_s3 + $0xa0] sm:$0xff] }
 0x300   :  { %7088 = vmatprep.subr.mxu0 %v5819_v4 }
 0x301   :  { %7089 = vmatpush3.msra.mxu0 %v5819_v4  ;;  %v5852_v4 = vld [vmem:[%s10262_s3 + $0xa8] sm:$0xff] }
 0x302   :  { %7090 = vmatprep.subr.mxu0 %v5818_v5 }
 0x303   :  { %7091 = vmatpush3.msra.mxu0 %v5818_v5  ;;  %v5886_v5 = vld [vmem:[%s10266_s4 + $0x298] sm:$0xff] }
 0x304   :  { %7092 = vmatprep.subr.mxu0 %v5817_v6 }
 0x305   :  { %7093 = vmatpush3.msra.mxu0 %v5817_v6  ;;  %v5853_v6 = vld [vmem:[%s10262_s3 + $0xb0] sm:$0xff] }
 0x306   :  { %7094 = vmatprep.subr.mxu0 %v5816_v13 }
 0x307   :  { %7095 = vmatpush3.msra.mxu0 %v5816_v13  ;;  %v5885_v13 = vld [vmem:[%s10266_s4 + $0x290] sm:$0xff] }
 0x308   :  { %7096 = vmatprep.subr.mxu0 %v5815_v10 }
 0x309   :  { %7097 = vmatpush3.msra.mxu0 %v5815_v10  ;;  %v5854_v10 = vld [vmem:[%s10262_s3 + $0xb8] sm:$0xff] }
 0x30a   :  { %7104 = vmatprep.subr.mxu0 %v8304_v9 }
 0x30e   :  { %v7070_v14 = vpop.f32.mrf.mxu1 }
 0x310   :  { %v1194_v15 = vpop.f32.mrf.mxu1 }
 0x311   :  { %7098 = vmatprep.mubr.msk.f32.mxu0 %vm299_vm2, %v1194_v15  ;;  %v5883_v15 = vld [vmem:[%s10266_s4 + $0x280] sm:$0xff] }
 0x312   :  { %v7073_v16 = vpop.f32.mrf.mxu1  ;;  %7099 = vmatmul.mubr.msk.f32.vlgmr.msra.gmra.mxu0 %vm299_vm2, %v7070_v14  ;;  %v5884_v14 = vld [vmem:[%s10266_s4 + $0x288] sm:$0xff] }
 0x313   :  { %7105 = vmatpush3.msra.mxu0 %v8304_v9 }
 0x314   :  { %7106 = vmatprep.subr.mxu0 %v8315_v23  ;;  %v1204_v17 = vpop.f32.mrf.mxu1 }
 0x315   :  { %7107 = vmatpush3.msra.mxu0 %v8315_v23  ;;  %7101 = vmatprep.mubr.msk.f32.mxu0 %vm299_vm2, %v1204_v17  ;;  %v5881_v17 = vld [vmem:[%s10266_s4 + $0x270] sm:$0xff] }
 0x316   :  { %7108 = vmatprep.subr.mxu0 %v8330_v22  ;;  %7102 = vmatmul.mubr.msk.f32.gmra.mxu0 %vm299_vm2, %v7073_v16  ;;  %v5882_v16 = vld [vmem:[%s10266_s4 + $0x278] sm:$0xff] }
 0x317   :  { %7109 = vmatpush3.msra.mxu0 %v8330_v22  ;;  %7136 = vmatprep.mubr.f32.mxu0 %v5831_v57  ;;  %v5880_v57 = vld [vmem:[%s10266_s4 + $0x268] sm:$0xff] }
 0x318   :  { %7110 = vmatprep.subr.mxu0 %v8343_v31 }
 0x319   :  { %7111 = vmatpush3.msra.mxu0 %v8343_v31 }
 0x31a   :  { %7112 = vmatprep.subr.mxu0 %v8350_v37 }
 0x31b   :  { %7113 = vmatpush3.msra.mxu0 %v8350_v37 }
 0x31c   :  { %7114 = vmatprep.subr.mxu0 %v8361_v44 }
 0x31d   :  { %7115 = vmatpush3.msra.mxu0 %v8361_v44 }
 0x31e   :  { %7116 = vmatprep.subr.mxu0 %v8376_v40 }
 0x31f   :  { %7117 = vmatpush3.msra.mxu0 %v8376_v40 }
 0x320   :  { %7118 = vmatprep.subr.mxu0 %v8383_v25 }
 0x321   :  { %7119 = vmatpush3.msra.mxu0 %v8383_v25 }
 0x322   :  { %7120 = vmatprep.subr.mxu0 %v8395_v59 }
 0x323   :  { %7121 = vmatpush3.msra.mxu0 %v8395_v59 }
 0x324   :  { %7122 = vmatprep.subr.mxu0 %v8403_v46 }
 0x325   :  { %7123 = vmatpush3.msra.mxu0 %v8403_v46 }
 0x326   :  { %7124 = vmatprep.subr.mxu0 %v8411_v7 }
 0x327   :  { %7125 = vmatpush3.msra.mxu0 %v8411_v7 }
 0x328   :  { %7126 = vmatprep.subr.mxu0 %v8418_v48 }
 0x329   :  { %7127 = vmatpush3.msra.mxu0 %v8418_v48 }
 0x32a   :  { %7128 = vmatprep.subr.mxu0 %v8425_v8 }
 0x32b   :  { %7129 = vmatpush3.msra.mxu0 %v8425_v8 }
 0x32c   :  { %7130 = vmatprep.subr.mxu0 %v8431_v54 }
 0x32d   :  { %7131 = vmatpush3.msra.mxu0 %v8431_v54 }
 0x32e   :  { %7132 = vmatprep.subr.mxu0 %v8437_v11 }
 0x32f   :  { %7133 = vmatpush3.msra.mxu0 %v8437_v11 }
 0x330   :  { %7134 = vmatprep.subr.mxu0 %v8443_v12 }
 0x331   :  { %7135 = vmatpush3.msra.mxu0 %v8443_v12 }
 0x332   :  { %7137 = vmatmul.mubr.f32.vlgmr.msra.gmra.mxu0 %v5832_v18  ;;  %7210 = vmatprep.subr.mxu0 %v5866_v19  ;;  %v5879_v18 = vld [vmem:[%s10266_s4 + $0x260] sm:$0xff] }
 0x333   :  { %7211 = vmatpush3.msra.mxu0 %v5866_v19  ;;  %7139 = vmatprep.mubr.f32.mxu0 %v5833_v63  ;;  %v5878_v19 = vld [vmem:[%s10266_s4 + $0x258] sm:$0xff]  ;;  %v5877_v63 = vld [vmem:[%s10266_s4 + $0x250] sm:$0xff] }
 0x334   :  { %7212 = vmatprep.subr.mxu0 %v5865_v20 }
 0x335   :  { %7213 = vmatpush3.msra.mxu0 %v5865_v20  ;;  %v5876_v20 = vld [vmem:[%s10266_s4 + $0x248] sm:$0xff] }
 0x336   :  { %7140 = vmatmul.mubr.f32.gmra.mxu0 %v5834_v43  ;;  %7214 = vmatprep.subr.mxu0 %v5864_v49  ;;  %v5875_v43 = vld [vmem:[%s10266_s4 + $0x240] sm:$0xff] }
 0x337   :  { %7215 = vmatpush3.msra.mxu0 %v5864_v49 }
 0x338   :  { %7216 = vmatprep.subr.mxu0 %v5863_v24 }
 0x339   :  { %7217 = vmatpush3.msra.mxu0 %v5863_v24 }
 0x33a   :  { %7218 = vmatprep.subr.mxu0 %v5862_v26 }
 0x33b   :  { %7219 = vmatpush3.msra.mxu0 %v5862_v26 }
 0x33c   :  { %7220 = vmatprep.subr.mxu0 %v5861_v28 }
 0x33d   :  { %7221 = vmatpush3.msra.mxu0 %v5861_v28 }
 0x33e   :  { %7222 = vmatprep.subr.mxu0 %v5860_v29 }
 0x33f   :  { %7223 = vmatpush3.msra.mxu0 %v5860_v29 }
 0x340   :  { %7224 = vmatprep.subr.mxu0 %v5859_v33 }
 0x341   :  { %7225 = vmatpush3.msra.mxu0 %v5859_v33 }
 0x342   :  { %7226 = vmatprep.subr.mxu0 %v5858_v35 }
 0x343   :  { %7227 = vmatpush3.msra.mxu0 %v5858_v35 }
 0x344   :  { %7228 = vmatprep.subr.mxu0 %v5857_v32 }
 0x345   :  { %7229 = vmatpush3.msra.mxu0 %v5857_v32 }
 0x346   :  { %7230 = vmatprep.subr.mxu0 %v5856_v38 }
 0x347   :  { %7231 = vmatpush3.msra.mxu0 %v5856_v38 }
 0x348   :  { %7232 = vmatprep.subr.mxu0 %v5855_v39 }
 0x349   :  { %7233 = vmatpush3.msra.mxu0 %v5855_v39 }
 0x34a   :  { %7240 = vmatprep.subr.mxu0 %v8304_v9 }
 0x3b2   :  { %v7032_v42 = vpop.f32.mrf.mxu0 }
 0x3b3   :  { %v1120_v45 = vadd.f32 %v7032_v42, %v8711_v51 }
 0x3b4   :  { %v1100_v36 = vpop.f32.mrf.mxu0 }
 0x3b5   :  { %v1119_v50 = vadd.f32 %v1100_v36, %v8713_v47  ;;  %v5872_v36 = vld [vmem:[%s10262_s3 + $0xc8] sm:$0xff] }
 0x3b6   :  { %v7035_v52 = vpop.f32.mrf.mxu0 }
 0x3b7   :  { %v1122_v55 = vadd.f32 %v7035_v52, %v8715_v27  ;;  %v5873_v52 = vld [vmem:[%s10262_s3 + $0xd0] sm:$0xff] }
 0x3b8   :  { %v1110_v21 = vpop.f32.mrf.mxu0 }
 0x3b9   :  { %v1121_v30 = vadd.f32 %v1110_v21, %v911_v53  ;;  %v5905_v53 = vld [vmem:[%s10266_s4 + $0x2f0] sm:$0xff]  ;;  %v5904_v21 = vld [vmem:[%s10266_s4 + $0x2e8] sm:$0xff] }
 0x3d2   :  { %v7100_v56 = vpop.f32.mrf.mxu0 }
 0x3d3   :  { %v8845_v58 = vadd.f32 %v7100_v56, %v1120_v45  ;;  %v5871_v45 = vld [vmem:[%s10262_s3 + $0xc0] sm:$0xff]  ;;  %v5902_v56 = vld [vmem:[%s10266_s4 + $0x2d8] sm:$0xff] }
 0x3d4   :  { %v1304_v60 = vpop.f32.mrf.mxu0 }
 0x3d5   :  { %v8847_v61 = vadd.f32 %v1304_v60, %v1119_v50  ;;  %v5906_v50 = vld [vmem:[%s10266_s4 + $0x2f8] sm:$0xff]  ;;  %v5900_v60 = vld [vmem:[%s10266_s4 + $0x2c8] sm:$0xff] }
 0x3d6   :  { %v7103_v62 = vpop.f32.mrf.mxu0 }
 0x3d7   :  { %v8849_v0 = vadd.f32 %v7103_v62, %v1122_v55  ;;  %v5874_v55 = vld [vmem:[%s10262_s3 + $0xd8] sm:$0xff] }
 0x3d8   :  { %v1314_v51 = vpop.f32.mrf.mxu0  ;;  %v5898_v62 = vld [vmem:[%s10266_s4 + $0x2b8] sm:$0xff] }
 0x3d9   :  { %v8851_v1 = vadd.f32 %v1314_v51, %v1121_v30  ;;  %v5903_v30 = vld [vmem:[%s10266_s4 + $0x2e0] sm:$0xff]  ;;  %v5896_v51 = vld [vmem:[%s10266_s4 + $0x2a8] sm:$0xff] }
 0x3f2   :  { %v7138_v47 = vpop.f32.mrf.mxu0 }
 0x3f4   :  { %v1398_v2 = vpop.f32.mrf.mxu0 }
 0x3f5   :  { %7166 = vmatprep.mubr.msk.f32.mxu1 %vm299_vm2, %v1398_v2 }
 0x3f6   :  { %v7141_v34 = vpop.f32.mrf.mxu0  ;;  %7167 = vmatmul.mubr.msk.f32.vlgmr.msra.gmra.mxu1 %vm299_vm2, %v7138_v47 }
 0x3f7   :  { %7173 = vmatpush3.msra.mxu1 %v8304_v9 }
 0x3f8   :  { %7174 = vmatprep.subr.mxu1 %v8315_v23  ;;  %v1408_v27 = vpop.f32.mrf.mxu0 }
 0x3f9   :  { %7175 = vmatpush3.msra.mxu1 %v8315_v23  ;;  %7169 = vmatprep.mubr.msk.f32.mxu1 %vm299_vm2, %v1408_v27 }
 0x3fa   :  { %7176 = vmatprep.subr.mxu1 %v8330_v22  ;;  %7170 = vmatmul.mubr.msk.f32.gmra.mxu1 %vm299_vm2, %v7141_v34 }
 0x3fb   :  { %7177 = vmatpush3.msra.mxu1 %v8330_v22  ;;  %7204 = vmatprep.mubr.f32.mxu1 %v5851_v3 }
 0x3fc   :  { %7178 = vmatprep.subr.mxu1 %v8343_v31 }
 0x3fd   :  { %7179 = vmatpush3.msra.mxu1 %v8343_v31 }
 0x3fe   :  { %7180 = vmatprep.subr.mxu1 %v8350_v37 }
 0x3ff   :  { %7181 = vmatpush3.msra.mxu1 %v8350_v37 }
 0x400   :  { %7182 = vmatprep.subr.mxu1 %v8361_v44 }
 0x401   :  { %7183 = vmatpush3.msra.mxu1 %v8361_v44 }
 0x402   :  { %7184 = vmatprep.subr.mxu1 %v8376_v40 }
 0x403   :  { %7185 = vmatpush3.msra.mxu1 %v8376_v40 }
 0x404   :  { %7186 = vmatprep.subr.mxu1 %v8383_v25 }
 0x405   :  { %7187 = vmatpush3.msra.mxu1 %v8383_v25 }
 0x406   :  { %7188 = vmatprep.subr.mxu1 %v8395_v59 }
 0x407   :  { %7189 = vmatpush3.msra.mxu1 %v8395_v59 }
 0x408   :  { %7190 = vmatprep.subr.mxu1 %v8403_v46 }
 0x409   :  { %7191 = vmatpush3.msra.mxu1 %v8403_v46 }
 0x40a   :  { %7192 = vmatprep.subr.mxu1 %v8411_v7 }
 0x40b   :  { %7193 = vmatpush3.msra.mxu1 %v8411_v7 }
 0x40c   :  { %7194 = vmatprep.subr.mxu1 %v8418_v48 }
 0x40d   :  { %7195 = vmatpush3.msra.mxu1 %v8418_v48 }
 0x40e   :  { %7196 = vmatprep.subr.mxu1 %v8425_v8 }
 0x40f   :  { %7197 = vmatpush3.msra.mxu1 %v8425_v8 }
 0x410   :  { %7198 = vmatprep.subr.mxu1 %v8431_v54 }
 0x411   :  { %7199 = vmatpush3.msra.mxu1 %v8431_v54 }
 0x412   :  { %7200 = vmatprep.subr.mxu1 %v8437_v11 }
 0x413   :  { %7201 = vmatpush3.msra.mxu1 %v8437_v11 }
 0x414   :  { %7202 = vmatprep.subr.mxu1 %v8443_v12 }
 0x415   :  { %7203 = vmatpush3.msra.mxu1 %v8443_v12 }
 0x416   :  { %7205 = vmatmul.mubr.f32.vlgmr.msra.gmra.mxu1 %v5852_v4  ;;  %7278 = vmatprep.subr.mxu1 %v5886_v5 }
 0x417   :  { %7279 = vmatpush3.msra.mxu1 %v5886_v5  ;;  %7207 = vmatprep.mubr.f32.mxu1 %v5853_v6 }
 0x418   :  { %7280 = vmatprep.subr.mxu1 %v5885_v13 }
 0x419   :  { %7281 = vmatpush3.msra.mxu1 %v5885_v13 }
 0x41a   :  { %7208 = vmatmul.mubr.f32.gmra.mxu1 %v5854_v10  ;;  %7282 = vmatprep.subr.mxu1 %v5884_v14 }
 0x41b   :  { %7283 = vmatpush3.msra.mxu1 %v5884_v14 }
 0x41c   :  { %7284 = vmatprep.subr.mxu1 %v5883_v15 }
 0x41d   :  { %7285 = vmatpush3.msra.mxu1 %v5883_v15 }
 0x41e   :  { %7286 = vmatprep.subr.mxu1 %v5882_v16 }
 0x41f   :  { %7287 = vmatpush3.msra.mxu1 %v5882_v16  ;;  %v5891_v16 = vld [vmem:[%s10262_s3 + $0xe0] sm:$0xff] }
 0x420   :  { %7288 = vmatprep.subr.mxu1 %v5881_v17 }
 0x421   :  { %7289 = vmatpush3.msra.mxu1 %v5881_v17  ;;  %v5892_v17 = vld [vmem:[%s10262_s3 + $0xe8] sm:$0xff] }
 0x422   :  { %7290 = vmatprep.subr.mxu1 %v5880_v57 }
 0x423   :  { %7291 = vmatpush3.msra.mxu1 %v5880_v57  ;;  %v5893_v57 = vld [vmem:[%s10262_s3 + $0xf0] sm:$0xff] }
 0x424   :  { %7292 = vmatprep.subr.mxu1 %v5879_v18 }
 0x425   :  { %7293 = vmatpush3.msra.mxu1 %v5879_v18  ;;  %v5894_v18 = vld [vmem:[%s10262_s3 + $0xf8] sm:$0xff] }
 0x426   :  { %7294 = vmatprep.subr.mxu1 %v5878_v19 }
 0x427   :  { %7295 = vmatpush3.msra.mxu1 %v5878_v19 }
 0x428   :  { %7296 = vmatprep.subr.mxu1 %v5877_v63 }
 0x429   :  { %7297 = vmatpush3.msra.mxu1 %v5877_v63 }
 0x42a   :  { %7298 = vmatprep.subr.mxu1 %v5876_v20 }
 0x42b   :  { %7299 = vmatpush3.msra.mxu1 %v5876_v20 }
 0x42c   :  { %7300 = vmatprep.subr.mxu1 %v5875_v43 }
 0x42d   :  { %7301 = vmatpush3.msra.mxu1 %v5875_v43 }
 0x42e   :  { %7308 = vmatprep.subr.mxu1 %v8304_v9 }
 0x4b6   :  { %v7168_v49 = vpop.f32.mrf.mxu1 }
 0x4b7   :  { %v8938_v24 = vadd.f32 %v7168_v49, %v8845_v58  ;;  %v5901_v58 = vld [vmem:[%s10266_s4 + $0x2d0] sm:$0xff] }
 0x4b8   :  { %v1508_v26 = vpop.f32.mrf.mxu1 }
 0x4b9   :  { %v8941_v28 = vadd.f32 %v1508_v26, %v8847_v61  ;;  %v5899_v61 = vld [vmem:[%s10266_s4 + $0x2c0] sm:$0xff] }
 0x4ba   :  { %v7171_v29 = vpop.f32.mrf.mxu1 }
 0x4bb   :  { %v8944_v33 = vadd.f32 %v7171_v29, %v8849_v0  ;;  %v5897_v0 = vld [vmem:[%s10266_s4 + $0x2b0] sm:$0xff] }
 0x4bc   :  { %v1518_v35 = vpop.f32.mrf.mxu1 }
 0x4bd   :  { %v8947_v32 = vadd.f32 %v1518_v35, %v8851_v1  ;;  %v5895_v1 = vld [vmem:[%s10266_s4 + $0x2a0] sm:$0xff] }
 0x4d6   :  { %v7206_v38 = vpop.f32.mrf.mxu1 }
 0x4d8   :  { %v1602_v39 = vpop.f32.mrf.mxu1 }
 0x4d9   :  { %7234 = vmatprep.mubr.msk.f32.mxu0 %vm299_vm2, %v1602_v39 }
 0x4da   :  { %v7209_v41 = vpop.f32.mrf.mxu1  ;;  %7235 = vmatmul.mubr.msk.f32.vlgmr.msra.gmra.mxu0 %vm299_vm2, %v7206_v38  ;;  %v5911_v38 = vld [vmem:[%s10262_s3 + $0x100] sm:$0xff] }
 0x4db   :  { %7241 = vmatpush3.msra.mxu0 %v8304_v9 }
 0x4dc   :  { %7242 = vmatprep.subr.mxu0 %v8315_v23  ;;  %v1612_v42 = vpop.f32.mrf.mxu1 }
 0x4dd   :  { %7243 = vmatpush3.msra.mxu0 %v8315_v23  ;;  %7237 = vmatprep.mubr.msk.f32.mxu0 %vm299_vm2, %v1612_v42 }
 0x4de   :  { %7244 = vmatprep.subr.mxu0 %v8330_v22  ;;  %7238 = vmatmul.mubr.msk.f32.gmra.mxu0 %vm299_vm2, %v7209_v41 }
 0x4df   :  { %7245 = vmatpush3.msra.mxu0 %v8330_v22  ;;  %7272 = vmatprep.mubr.f32.mxu0 %v5871_v45 }
 0x4e0   :  { %7246 = vmatprep.subr.mxu0 %v8343_v31 }
 0x4e1   :  { %7247 = vmatpush3.msra.mxu0 %v8343_v31 }
 0x4e2   :  { %7248 = vmatprep.subr.mxu0 %v8350_v37 }
 0x4e3   :  { %7249 = vmatpush3.msra.mxu0 %v8350_v37 }
 0x4e4   :  { %7250 = vmatprep.subr.mxu0 %v8361_v44 }
 0x4e5   :  { %7251 = vmatpush3.msra.mxu0 %v8361_v44 }
 0x4e6   :  { %7252 = vmatprep.subr.mxu0 %v8376_v40 }
 0x4e7   :  { %7253 = vmatpush3.msra.mxu0 %v8376_v40 }
 0x4e8   :  { %7254 = vmatprep.subr.mxu0 %v8383_v25 }
 0x4e9   :  { %7255 = vmatpush3.msra.mxu0 %v8383_v25 }
 0x4ea   :  { %7256 = vmatprep.subr.mxu0 %v8395_v59 }
 0x4eb   :  { %7257 = vmatpush3.msra.mxu0 %v8395_v59 }
 0x4ec   :  { %7258 = vmatprep.subr.mxu0 %v8403_v46 }
 0x4ed   :  { %7259 = vmatpush3.msra.mxu0 %v8403_v46 }
 0x4ee   :  { %7260 = vmatprep.subr.mxu0 %v8411_v7 }
 0x4ef   :  { %7261 = vmatpush3.msra.mxu0 %v8411_v7 }
 0x4f0   :  { %7262 = vmatprep.subr.mxu0 %v8418_v48 }
 0x4f1   :  { %7263 = vmatpush3.msra.mxu0 %v8418_v48 }
 0x4f2   :  { %7264 = vmatprep.subr.mxu0 %v8425_v8 }
 0x4f3   :  { %7265 = vmatpush3.msra.mxu0 %v8425_v8 }
 0x4f4   :  { %7266 = vmatprep.subr.mxu0 %v8431_v54 }
 0x4f5   :  { %7267 = vmatpush3.msra.mxu0 %v8431_v54 }
 0x4f6   :  { %7268 = vmatprep.subr.mxu0 %v8437_v11 }
 0x4f7   :  { %7269 = vmatpush3.msra.mxu0 %v8437_v11 }
 0x4f8   :  { %7270 = vmatprep.subr.mxu0 %v8443_v12 }
 0x4f9   :  { %7271 = vmatpush3.msra.mxu0 %v8443_v12 }
 0x4fa   :  { %7273 = vmatmul.mubr.f32.vlgmr.msra.gmra.mxu0 %v5872_v36  ;;  %7346 = vmatprep.subr.mxu0 %v5906_v50 }
 0x4fb   :  { %7347 = vmatpush3.msra.mxu0 %v5906_v50  ;;  %7275 = vmatprep.mubr.f32.mxu0 %v5873_v52 }
 0x4fc   :  { %7348 = vmatprep.subr.mxu0 %v5905_v53 }
 0x4fd   :  { %7349 = vmatpush3.msra.mxu0 %v5905_v53 }
 0x4fe   :  { %7276 = vmatmul.mubr.f32.gmra.mxu0 %v5874_v55  ;;  %7350 = vmatprep.subr.mxu0 %v5904_v21 }
 0x4ff   :  { %7351 = vmatpush3.msra.mxu0 %v5904_v21 }
 0x500   :  { %7352 = vmatprep.subr.mxu0 %v5903_v30 }
 0x501   :  { %7353 = vmatpush3.msra.mxu0 %v5903_v30 }
 0x502   :  { %7354 = vmatprep.subr.mxu0 %v5902_v56 }
 0x503   :  { %7355 = vmatpush3.msra.mxu0 %v5902_v56  ;;  %v7937_v56 = vmov 0  }
 0x504   :  { %7356 = vmatprep.subr.mxu0 %v5901_v58  ;;  %7923 = vset.pattern.permute.xlu0 %v7937_v56 }
 0x505   :  { %7357 = vmatpush3.msra.mxu0 %v5901_v58  ;;  %v2443_v58 = vld [vmem:[%s10203_s11 + $0x18] sm:$0xff]  ;;  %7924 = vset.pattern.permute.xlu1 %v7937_v56 }
 0x506   :  { %7358 = vmatprep.subr.mxu0 %v5900_v60  ;;  %2461 = vperm.xlu0 %7923, %v2443_v58  }
 0x507   :  { %7359 = vmatpush3.msra.mxu0 %v5900_v60  ;;  %v2442_v60 = vld [vmem:[%s10203_s11 + $0x10] sm:$0xff] }
 0x508   :  { %7360 = vmatprep.subr.mxu0 %v5899_v61  ;;  %2456 = vperm.xlu1 %7924, %v2442_v60  }
 0x509   :  { %7361 = vmatpush3.msra.mxu0 %v5899_v61  ;;  %v5945_v61 = vld [vmem:[%s10203_s11 + $0x38] sm:$0xff] }
 0x50a   :  { %7362 = vmatprep.subr.mxu0 %v5898_v62  ;;  %2589 = vperm.xlu0 %7923, %v5945_v61  }
 0x50b   :  { %7363 = vmatpush3.msra.mxu0 %v5898_v62  ;;  %v5944_v62 = vld [vmem:[%s10203_s11 + $0x30] sm:$0xff] }
 0x50c   :  { %7364 = vmatprep.subr.mxu0 %v5897_v0  ;;  %2584 = vperm.xlu1 %7924, %v5944_v62  }
 0x50d   :  { %7365 = vmatpush3.msra.mxu0 %v5897_v0  ;;  %v5957_v0 = vld [vmem:[%s10203_s11 + $0x58] sm:$0xff] }
 0x50e   :  { %7366 = vmatprep.subr.mxu0 %v5896_v51  ;;  %2720 = vperm.xlu0 %7923, %v5957_v0  }
 0x50f   :  { %7367 = vmatpush3.msra.mxu0 %v5896_v51  ;;  %v2441_v51 = vld [vmem:[%s10203_s11 + $0x8] sm:$0xff] }
 0x510   :  { %7368 = vmatprep.subr.mxu0 %v5895_v1  ;;  %2451 = vperm.xlu1 %7924, %v2441_v51  }
 0x511   :  { %7369 = vmatpush3.msra.mxu0 %v5895_v1  ;;  %v5943_v1 = vld [vmem:[%s10203_s11 + $0x28] sm:$0xff] }
 0x512   :  { %7376 = vmatprep.subr.mxu0 %v8304_v9  ;;  %2579 = vperm.xlu0 %7923, %v5943_v1  }
 0x59a   :  { %v7236_v47 = vpop.f32.mrf.mxu0 }
 0x59b   :  { %v1732_v2 = vadd.f32 %v7236_v47, %v8938_v24  ;;  %v5956_v47 = vld [vmem:[%s10203_s11 + $0x50] sm:$0xff] }
 0x59c   :  { %v1712_v34 = vpop.f32.mrf.mxu0  ;;  %2715 = vperm.xlu1 %7924, %v5956_v47  }
 0x59d   :  { %v1731_v27 = vadd.f32 %v1712_v34, %v8941_v28  ;;  %v2440_v34 = vld [vmem:[%s10203_s11] sm:$0xff] }
 0x59e   :  { %v7239_v3 = vpop.f32.mrf.mxu0 }
 0x59f   :  { %v1734_v4 = vadd.f32 %v7239_v3, %v8944_v33  ;;  %v9229_v3 = vld [vmem:[%s10204_s10 + $0x20] sm:$0xff] }
 0x5a0   :  { %v1722_v5 = vpop.f32.mrf.mxu0  ;;  %2446 = vperm.xlu1 %7924, %v2440_v34  }
 0x5a1   :  { %v1733_v6 = vadd.f32 %v1722_v5, %v8947_v32  ;;  %v5955_v5 = vld [vmem:[%s10203_s11 + $0x48] sm:$0xff] }
 0x5a4   :  { %2710 = vperm.xlu1 %7924, %v5955_v5  }
 0x5ba   :  { %v7274_v13 = vpop.f32.mrf.mxu0 }
 0x5bc   :  { %v1806_v10 = vpop.f32.mrf.mxu0 }
 0x5bd   :  { %7302 = vmatprep.mubr.msk.f32.mxu1 %vm299_vm2, %v1806_v10  ;;  %v5954_v10 = vld [vmem:[%s10203_s11 + $0x40] sm:$0xff] }
 0x5be   :  { %v7277_v14 = vpop.f32.mrf.mxu0  ;;  %7303 = vmatmul.mubr.msk.f32.vlgmr.msra.gmra.mxu1 %vm299_vm2, %v7274_v13  ;;  %v5981_v13 = vld [vmem:[%s10203_s11 + $0x98] sm:$0xff] }
 0x5bf   :  { %7309 = vmatpush3.msra.mxu1 %v8304_v9  ;;  %2982 = vperm.xlu1 %7924, %v5981_v13  }
 0x5c0   :  { %7310 = vmatprep.subr.mxu1 %v8315_v23  ;;  %v1816_v15 = vpop.f32.mrf.mxu0 }
 0x5c1   :  { %7311 = vmatpush3.msra.mxu1 %v8315_v23  ;;  %7305 = vmatprep.mubr.msk.f32.mxu1 %vm299_vm2, %v1816_v15  ;;  %v5980_v15 = vld [vmem:[%s10203_s11 + $0x90] sm:$0xff] }
 0x5c2   :  { %7312 = vmatprep.subr.mxu1 %v8330_v22  ;;  %7306 = vmatmul.mubr.msk.f32.gmra.mxu1 %vm299_vm2, %v7277_v14  ;;  %v5967_v14 = vld [vmem:[%s10203_s11 + $0x68] sm:$0xff] }
 0x5c3   :  { %7313 = vmatpush3.msra.mxu1 %v8330_v22  ;;  %7340 = vmatprep.mubr.f32.mxu1 %v5891_v16  ;;  %v5993_v16 = vld [vmem:[%s10203_s11 + $0xb8] sm:$0xff] }
 0x5c4   :  { %7314 = vmatprep.subr.mxu1 %v8343_v31  ;;  %2841 = vperm.xlu1 %7924, %v5967_v14  }
 0x5c5   :  { %7315 = vmatpush3.msra.mxu1 %v8343_v31 }
 0x5c6   :  { %7316 = vmatprep.subr.mxu1 %v8350_v37 }
 0x5c7   :  { %7317 = vmatpush3.msra.mxu1 %v8350_v37 }
 0x5c8   :  { %7318 = vmatprep.subr.mxu1 %v8361_v44  ;;  %3113 = vperm.xlu1 %7924, %v5993_v16  }
 0x5c9   :  { %7319 = vmatpush3.msra.mxu1 %v8361_v44 }
 0x5ca   :  { %7320 = vmatprep.subr.mxu1 %v8376_v40 }
 0x5cb   :  { %7321 = vmatpush3.msra.mxu1 %v8376_v40 }
 0x5cc   :  { %7322 = vmatprep.subr.mxu1 %v8383_v25 }
 0x5cd   :  { %7323 = vmatpush3.msra.mxu1 %v8383_v25 }
 0x5ce   :  { %7324 = vmatprep.subr.mxu1 %v8395_v59 }
 0x5cf   :  { %7325 = vmatpush3.msra.mxu1 %v8395_v59 }
 0x5d0   :  { %7326 = vmatprep.subr.mxu1 %v8403_v46 }
 0x5d1   :  { %7327 = vmatpush3.msra.mxu1 %v8403_v46 }
 0x5d2   :  { %7328 = vmatprep.subr.mxu1 %v8411_v7 }
 0x5d3   :  { %7329 = vmatpush3.msra.mxu1 %v8411_v7 }
 0x5d4   :  { %7330 = vmatprep.subr.mxu1 %v8418_v48 }
 0x5d5   :  { %7331 = vmatpush3.msra.mxu1 %v8418_v48 }
 0x5d6   :  { %7332 = vmatprep.subr.mxu1 %v8425_v8 }
 0x5d7   :  { %7333 = vmatpush3.msra.mxu1 %v8425_v8 }
 0x5d8   :  { %7334 = vmatprep.subr.mxu1 %v8431_v54 }
 0x5d9   :  { %7335 = vmatpush3.msra.mxu1 %v8431_v54 }
 0x5da   :  { %7336 = vmatprep.subr.mxu1 %v8437_v11 }
 0x5db   :  { %7337 = vmatpush3.msra.mxu1 %v8437_v11 }
 0x5dc   :  { %7338 = vmatprep.subr.mxu1 %v8443_v12 }
 0x5dd   :  { %7339 = vmatpush3.msra.mxu1 %v8443_v12 }
 0x5de   :  { %7341 = vmatmul.mubr.f32.vlgmr.msra.gmra.mxu1 %v5892_v17  ;;  %v5966_v17 = vld [vmem:[%s10203_s11 + $0x60] sm:$0xff] }
 0x5df   :  { %7343 = vmatprep.mubr.f32.mxu1 %v5893_v57  ;;  %v5979_v57 = vld [vmem:[%s10203_s11 + $0x88] sm:$0xff] }
 0x5e0   :  { %2972 = vperm.xlu1 %7924, %v5979_v57  }
 0x5e2   :  { %7344 = vmatmul.mubr.f32.gmra.mxu1 %v5894_v18  ;;  %v5992_v18 = vld [vmem:[%s10203_s11 + $0xb0] sm:$0xff] }
 0x67e   :  { %v7304_v19 = vpop.f32.mrf.mxu1 }
 0x67f   :  { %v9084_v63 = vadd.f32 %v7304_v19, %v1732_v2  ;;  %v5969_v2 = vld [vmem:[%s10203_s11 + $0x78] sm:$0xff] }
 0x680   :  { %v1916_v20 = vpop.f32.mrf.mxu1  ;;  %2851 = vperm.xlu0 %7923, %v5969_v2   ;;  %v6005_v19 = vld [vmem:[%s10203_s11 + $0xd8] sm:$0xff] }
 0x681   :  { %v9086_v43 = vadd.f32 %v1916_v20, %v1731_v27  ;;  %v9224_v27 = vld [vmem:[%s10204_s10] sm:$0xff]  ;;  %3244 = vperm.xlu1 %7924, %v6005_v19   ;;  %v5991_v20 = vld [vmem:[%s10203_s11 + $0xa8] sm:$0xff] }
 0x682   :  { %v7307_v49 = vpop.f32.mrf.mxu1 }
 0x683   :  { %v9088_v24 = vadd.f32 %v7307_v49, %v1734_v4  ;;  %v5942_v4 = vld [vmem:[%s10203_s11 + $0x20] sm:$0xff]  ;;  %v6017_v49 = vld [vmem:[%s10203_s11 + $0xf8] sm:$0xff] }
 0x684   :  { %v1926_v26 = vpop.f32.mrf.mxu1  ;;  %2574 = vperm.xlu0 %7923, %v5942_v4  }
 0x685   :  { %v9090_v28 = vadd.f32 %v1926_v26, %v1733_v6  ;;  %v5968_v6 = vld [vmem:[%s10203_s11 + $0x70] sm:$0xff]  ;;  %3103 = vperm.xlu1 %7924, %v5991_v20   ;;  %v6003_v26 = vld [vmem:[%s10203_s11 + $0xc8] sm:$0xff] }
 0x688   :  { %2846 = vperm.xlu0 %7923, %v5968_v6  }
 0x689   :  { %3375 = vperm.xlu1 %7924, %v6017_v49  }
 0x68c   :  { %2705 = vperm.xlu0 %7923, %v5954_v10  }
 0x68d   :  { %3234 = vperm.xlu1 %7924, %v6003_v26   ;;  %v5932_v26 = vld [vmem:[%s10206_s8] ss:$0 sm:$0xff] }
 0x690   :  { %2977 = vperm.xlu0 %7923, %v5980_v15  }
 0x694   :  { %2836 = vperm.xlu0 %7923, %v5966_v17  }
 0x698   :  { %3108 = vperm.xlu0 %7923, %v5992_v18  }
 0x69e   :  { %v7342_v29 = vpop.f32.mrf.mxu1 }
 0x6a0   :  { %v2010_v33 = vpop.f32.mrf.mxu1 }
 0x6a1   :  { %7370 = vmatprep.mubr.msk.f32.mxu0 %vm299_vm2, %v2010_v33  ;;  %v6002_v33 = vld [vmem:[%s10203_s11 + $0xc0] sm:$0xff] }
 0x6a2   :  { %v7345_v35 = vpop.f32.mrf.mxu1  ;;  %7371 = vmatmul.mubr.msk.f32.vlgmr.msra.gmra.mxu0 %vm299_vm2, %v7342_v29  ;;  %v6029_v29 = vld [vmem:[%s10203_s11 + $0x118] sm:$0xff] }
 0x6a3   :  { %7377 = vmatpush3.msra.mxu0 %v8304_v9  ;;  %v5912_v9 = vld [vmem:[%s10262_s3 + $0x108] sm:$0xff]  ;;  %3506 = vperm.xlu1 %7924, %v6029_v29  }
 0x6a4   :  { %7378 = vmatprep.subr.mxu0 %v8315_v23  ;;  %v2020_v32 = vpop.f32.mrf.mxu1 }
 0x6a5   :  { %7379 = vmatpush3.msra.mxu0 %v8315_v23  ;;  %7373 = vmatprep.mubr.msk.f32.mxu0 %vm299_vm2, %v2020_v32  ;;  %v5913_v23 = vld [vmem:[%s10262_s3 + $0x110] sm:$0xff] }
 0x6a6   :  { %7380 = vmatprep.subr.mxu0 %v8330_v22  ;;  %7374 = vmatmul.mubr.msk.f32.gmra.mxu0 %vm299_vm2, %v7345_v35  ;;  %v6015_v35 = vld [vmem:[%s10203_s11 + $0xe8] sm:$0xff]  ;;  %v6028_v32 = vld [vmem:[%s10203_s11 + $0x110] sm:$0xff] }
 0x6a7   :  { %7381 = vmatpush3.msra.mxu0 %v8330_v22  ;;  %7408 = vmatprep.mubr.f32.mxu0 %v5911_v38  ;;  %v5914_v22 = vld [vmem:[%s10262_s3 + $0x118] sm:$0xff]  ;;  %v6014_v38 = vld [vmem:[%s10203_s11 + $0xe0] sm:$0xff] }
 0x6a8   :  { %7382 = vmatprep.subr.mxu0 %v8343_v31  ;;  %3365 = vperm.xlu1 %7924, %v6015_v35  }
 0x6a9   :  { %7383 = vmatpush3.msra.mxu0 %v8343_v31  ;;  %v5926_v31 = vld [vmem:[%s10266_s4 + $0x358] sm:$0xff] }
 0x6aa   :  { %7384 = vmatprep.subr.mxu0 %v8350_v37  ;;  %7414 = vmatprep.subr.mxu1 %v5926_v31 }
 0x6ab   :  { %7385 = vmatpush3.msra.mxu0 %v8350_v37  ;;  %v5925_v37 = vld [vmem:[%s10266_s4 + $0x350] sm:$0xff]  ;;  %7415 = vmatpush3.msra.mxu1 %v5926_v31 }
 0x6ac   :  { %7386 = vmatprep.subr.mxu0 %v8361_v44  ;;  %7416 = vmatprep.subr.mxu1 %v5925_v37 }
 0x6ad   :  { %7387 = vmatpush3.msra.mxu0 %v8361_v44  ;;  %v5924_v44 = vld [vmem:[%s10266_s4 + $0x348] sm:$0xff]  ;;  %7417 = vmatpush3.msra.mxu1 %v5925_v37 }
 0x6ae   :  { %7388 = vmatprep.subr.mxu0 %v8376_v40  ;;  %7418 = vmatprep.subr.mxu1 %v5924_v44 }
 0x6af   :  { %7389 = vmatpush3.msra.mxu0 %v8376_v40  ;;  %v5923_v40 = vld [vmem:[%s10266_s4 + $0x340] sm:$0xff]  ;;  %7419 = vmatpush3.msra.mxu1 %v5924_v44 }
 0x6b0   :  { %7390 = vmatprep.subr.mxu0 %v8383_v25  ;;  %7420 = vmatprep.subr.mxu1 %v5923_v40 }
 0x6b1   :  { %7391 = vmatpush3.msra.mxu0 %v8383_v25  ;;  %v5922_v25 = vld [vmem:[%s10266_s4 + $0x338] sm:$0xff]  ;;  %7421 = vmatpush3.msra.mxu1 %v5923_v40 }
 0x6b2   :  { %7392 = vmatprep.subr.mxu0 %v8395_v59  ;;  %7422 = vmatprep.subr.mxu1 %v5922_v25 }
 0x6b3   :  { %7393 = vmatpush3.msra.mxu0 %v8395_v59  ;;  %v5921_v59 = vld [vmem:[%s10266_s4 + $0x330] sm:$0xff]  ;;  %7423 = vmatpush3.msra.mxu1 %v5922_v25 }
 0x6b4   :  { %7394 = vmatprep.subr.mxu0 %v8403_v46  ;;  %7424 = vmatprep.subr.mxu1 %v5921_v59 }
 0x6b5   :  { %7395 = vmatpush3.msra.mxu0 %v8403_v46  ;;  %v5920_v46 = vld [vmem:[%s10266_s4 + $0x328] sm:$0xff]  ;;  %7425 = vmatpush3.msra.mxu1 %v5921_v59 }
 0x6b6   :  { %7396 = vmatprep.subr.mxu0 %v8411_v7  ;;  %7426 = vmatprep.subr.mxu1 %v5920_v46 }
 0x6b7   :  { %7397 = vmatpush3.msra.mxu0 %v8411_v7  ;;  %v5919_v7 = vld [vmem:[%s10266_s4 + $0x320] sm:$0xff]  ;;  %7427 = vmatpush3.msra.mxu1 %v5920_v46 }
 0x6b8   :  { %7398 = vmatprep.subr.mxu0 %v8418_v48  ;;  %7428 = vmatprep.subr.mxu1 %v5919_v7 }
 0x6b9   :  { %7399 = vmatpush3.msra.mxu0 %v8418_v48  ;;  %v5918_v48 = vld [vmem:[%s10266_s4 + $0x318] sm:$0xff]  ;;  %7429 = vmatpush3.msra.mxu1 %v5919_v7 }
 0x6ba   :  { %7400 = vmatprep.subr.mxu0 %v8425_v8  ;;  %7430 = vmatprep.subr.mxu1 %v5918_v48 }
 0x6bb   :  { %7401 = vmatpush3.msra.mxu0 %v8425_v8  ;;  %v5917_v8 = vld [vmem:[%s10266_s4 + $0x310] sm:$0xff]  ;;  %7431 = vmatpush3.msra.mxu1 %v5918_v48 }
 0x6bc   :  { %7402 = vmatprep.subr.mxu0 %v8431_v54  ;;  %7432 = vmatprep.subr.mxu1 %v5917_v8 }
 0x6bd   :  { %7403 = vmatpush3.msra.mxu0 %v8431_v54  ;;  %7433 = vmatpush3.msra.mxu1 %v5917_v8  ;;  %v5916_v54 = vld [vmem:[%s10266_s4 + $0x308] sm:$0xff] }
 0x6be   :  { %7404 = vmatprep.subr.mxu0 %v8437_v11  ;;  %7434 = vmatprep.subr.mxu1 %v5916_v54 }
 0x6bf   :  { %7405 = vmatpush3.msra.mxu0 %v8437_v11  ;;  %7435 = vmatpush3.msra.mxu1 %v5916_v54  ;;  %v5915_v11 = vld [vmem:[%s10266_s4 + $0x300] sm:$0xff] }
 0x6c0   :  { %7406 = vmatprep.subr.mxu0 %v8443_v12  ;;  %7436 = vmatprep.subr.mxu1 %v5915_v11 }
 0x6c1   :  { %7407 = vmatpush3.msra.mxu0 %v8443_v12  ;;  %7437 = vmatpush3.msra.mxu1 %v5915_v11 }
 0x6c2   :  { %7409 = vmatmul.mubr.f32.vlgmr.msra.gmra.mxu0 %v5912_v9  ;;  %v6027_v9 = vld [vmem:[%s10203_s11 + $0x108] sm:$0xff]  ;;  %3360 = vperm.xlu1 %7924, %v6014_v38  }
 0x6c3   :  { %7411 = vmatprep.mubr.f32.mxu0 %v5913_v23  ;;  %v6026_v23 = vld [vmem:[%s10203_s11 + $0x100] sm:$0xff] }
 0x6c6   :  { %7412 = vmatmul.mubr.f32.gmra.mxu0 %v5914_v22  ;;  %3491 = vperm.xlu1 %7924, %v6026_v23   ;;  %v5931_v22 = vld [vmem:[%s10205_s7] ss:$0 sm:$0xff] }
 0x762   :  { %v7372_v12 = vpop.f32.mrf.mxu0 }
 0x763   :  { %v9176_v39 = vadd.f32 %v7372_v12, %v9084_v63  ;;  %v5978_v63 = vld [vmem:[%s10203_s11 + $0x80] sm:$0xff] }
 0x764   :  { %v2120_v41 = vpop.f32.mrf.mxu0  ;;  %2967 = vperm.xlu0 %7923, %v5978_v63  }
 0x765   :  { %v9179_v42 = vadd.f32 %v2120_v41, %v9086_v43  ;;  %v6004_v43 = vld [vmem:[%s10203_s11 + $0xd0] sm:$0xff] }
 0x766   :  { %v7375_v45 = vpop.f32.mrf.mxu0 }
 0x767   :  { %v9182_v36 = vadd.f32 %v7375_v45, %v9088_v24  ;;  %v5990_v24 = vld [vmem:[%s10203_s11 + $0xa0] sm:$0xff] }
 0x768   :  { %v2130_v50 = vpop.f32.mrf.mxu0  ;;  %3239 = vperm.xlu0 %7923, %v6004_v43  }
 0x769   :  { %v9185_v52 = vadd.f32 %v2130_v50, %v9090_v28  ;;  %v6016_v28 = vld [vmem:[%s10203_s11 + $0xf0] sm:$0xff] }
 0x76c   :  { %3098 = vperm.xlu0 %7923, %v5990_v24  }
 0x770   :  { %3370 = vperm.xlu0 %7923, %v6016_v28  }
 0x774   :  { %3229 = vperm.xlu0 %7923, %v6002_v33  }
 0x778   :  { %3501 = vperm.xlu0 %7923, %v6028_v32   ;;  %v5933_v32 = vld [vmem:[%s10207_s9] ss:$0 sm:$0xff] }
 0x77c   :  { %3496 = vperm.xlu0 %7923, %v6027_v9  }
 0x782   :  { %v7410_v53 = vpop.f32.mrf.mxu0 }
 0x784   :  { %v2214_v55 = vpop.f32.mrf.mxu0 }
 0x785   :  { %7438 = vmatprep.mubr.msk.f32.mxu1 %vm299_vm2, %v2214_v55 }
 0x786   :  { %v7413_v21 = vpop.f32.mrf.mxu0  ;;  %7439 = vmatmul.mubr.msk.f32.vlgmr.msra.gmra.mxu1 %vm299_vm2, %v7410_v53 }
 0x788   :  { %v2224_v30 = vpop.f32.mrf.mxu0 }
 0x789   :  { %7441 = vmatprep.mubr.msk.f32.mxu1 %vm299_vm2, %v2224_v30 }
 0x78a   :  { %7442 = vmatmul.mubr.msk.f32.gmra.mxu1 %vm299_vm2, %v7413_v21  ;;  %vm2464_vm2 = vcmask 261120  }
 0x78b   :  { %7452 = vmatprep.mubr.msk.f32.mxu1 %vm2464_vm2, %v9224_v27  ;;  %7466 = vmatprep.mubr.msk.f32.mxu0 %vm2464_vm2, %v9229_v3 }
 0x846   :  { %v7440_v31 = vpop.f32.mrf.mxu1 }
 0x847   :  { %v2344_v37 = vadd.f32 %v7440_v31, %v9176_v39 }
 0x848   :  { %v2324_v44 = vpop.f32.mrf.mxu1 }
 0x849   :  { %v2354_v40 = vadd.f32 %v5931_v22, %v2344_v37  ;;  %v2343_v25 = vadd.f32 %v2324_v44, %v9179_v42 }
 0x84a   :  { %v7443_v59 = vpop.f32.mrf.mxu1 }
 0x84b   :  { %v2374_v46 = vmul.f32 %v2354_v40, %v2354_v40  ;;  %v2353_v7 = vadd.f32 %v5931_v22, %v2343_v25  ;;  %v2346_v48 = vadd.f32 %v7443_v59, %v9182_v36  ;;  %v2361_v54 = vsel %vm2359_vm4, %v2354_v40, 0.0 }
 0x84c   :  { %v2334_v8 = vpop.f32.mrf.mxu1 }
 0x84d   :  { %v2360_v11 = vsel %vm2359_vm4, %v2353_v7, 0.0  ;;  %v2373_v12 = vmul.f32 %v2353_v7, %v2353_v7  ;;  %v2356_v45 = vadd.f32 %v5931_v22, %v2346_v48  ;;  %v2345_v39 = vadd.f32 %v2334_v8, %v9185_v52 }
 0x84e   :  { %v2362_v41 = vadd.f32 %v2361_v54, %v2360_v11  ;;  %v2378_v50 = vsel %vm2359_vm4, %v2374_v46, 0.0 }
 0x84f   :  { %v2377_v42 = vsel %vm2359_vm4, %v2373_v12, 0.0  ;;  %v2355_v55 = vadd.f32 %v5931_v22, %v2345_v39  ;;  %v2376_v21 = vmul.f32 %v2356_v45, %v2356_v45  ;;  %v2365_v58 = vsel %vm2359_vm4, %v2356_v45, 0.0  ;;  %v9357_v12 = vld [vmem:[%s10204_s10 + $0x8] sm:$0xff]  ;;  %v9382_v39 = vld [vmem:[%s10204_s10 + $0x30] sm:$0xff] }
 0x850   :  { %v2379_v53 = vadd.f32 %v2378_v50, %v2377_v42  ;;  %10267 = vst [vmem:[#allocation2_spill] sm:$0xff] %v9357_v12  ;;  %10270 = vst [vmem:[#allocation5_spill] sm:$0xff] %v9382_v39  ;;  %v9391_v50 = vld [vmem:[%s10204_s10 + $0x18] sm:$0xff] }
 0x851   :  { %v2363_v30 = vsel %vm2359_vm4, %v2355_v55, 0.0  ;;  %v2375_v36 = vmul.f32 %v2355_v55, %v2355_v55  ;;  %v2382_v0 = vsel %vm2359_vm4, %v2376_v21, 0.0  ;;  %10271 = vst [vmem:[#allocation6_spill] sm:$0xff] %v9391_v50  ;;  %v9396_v42 = vld [vmem:[%s10204_s10 + $0x38] sm:$0xff]  ;;  %v9427_v21 = vld [vmem:[%s10204_s10 + $0x48] sm:$0xff] }
 0x852   :  { %v2364_v56 = vadd.f32 %v2363_v30, %v2362_v41  ;;  %v9362_v41 = vld [vmem:[%s10204_s10 + $0x28] sm:$0xff]  ;;  %10272 = vst [vmem:[#allocation7_spill] sm:$0xff] %v9396_v42  ;;  %10275 = vst [vmem:[#allocation10_spill] sm:$0xff] %v9427_v21 }
 0x853   :  { %v2380_v60 = vsel %vm2359_vm4, %v2375_v36, 0.0  ;;  %10268 = vst [vmem:[#allocation3_spill] sm:$0xff] %v9362_v41  ;;  %v9432_v30 = vld [vmem:[%s10204_s10 + $0x68] sm:$0xff]  ;;  %v9449_v36 = vld [vmem:[%s10204_s10 + $0x50] sm:$0xff] }
 0x854   :  { %v2366_v61 = vadd.f32 %v2365_v58, %v2364_v56  ;;  %v2381_v62 = vadd.f32 %v2380_v60, %v2379_v53  ;;  %v9413_v53 = vld [vmem:[%s10204_s10 + $0x40] sm:$0xff]  ;;  %10276 = vst [vmem:[#allocation11_spill] sm:$0xff] %v9432_v30  ;;  %10277 = vst [vmem:[#allocation12_spill] sm:$0xff] %v9449_v36  ;;  %v9454_v56 = vld [vmem:[%s10204_s10 + $0x70] sm:$0xff] }
 0x855   :  { %10273 = vst [vmem:[#allocation8_spill] sm:$0xff] %v9413_v53  ;;  %10278 = vst [vmem:[#allocation13_spill] sm:$0xff] %v9454_v56  ;;  %v9463_v58 = vld [vmem:[%s10204_s10 + $0x58] sm:$0xff] }
 0x856   :  { %v2367_v52 = vrot.slane %v2366_v61, 4  ;;  %v2383_v51 = vadd.f32 %v2382_v0, %v2381_v62  ;;  %10279 = vst [vmem:[#allocation14_spill] sm:$0xff] %v9463_v58  ;;  %v9468_v60 = vld [vmem:[%s10204_s10 + $0x78] sm:$0xff]  ;;  %v9492_v62 = vld [vmem:[%s10204_s10 + $0xa0] sm:$0xff]  ;;  %v9499_v0 = vld [vmem:[%s10204_s10 + $0x88] sm:$0xff] }
 0x857   :  { %10280 = vst [vmem:[#allocation15_spill] sm:$0xff] %v9468_v60  ;;  %10282 = vst [vmem:[#allocation17_spill] sm:$0xff] %v9492_v62 }
 0x858   :  { %v2368_v1 = vadd.f32 %v2367_v52, %v2366_v61  ;;  %v2384_v47 = vrot.slane %v2383_v51, 4  ;;  %v9485_v61 = vld [vmem:[%s10204_s10 + $0x80] sm:$0xff]  ;;  %10283 = vst [vmem:[#allocation18_spill] sm:$0xff] %v9499_v0  ;;  %v9504_v52 = vld [vmem:[%s10204_s10 + $0xa8] sm:$0xff] }
 0x859   :  { %10281 = vst [vmem:[#allocation16_spill] sm:$0xff] %v9485_v61  ;;  %10284 = vst [vmem:[#allocation19_spill] sm:$0xff] %v9504_v52 }
 0x85a   :  { %v2369_v2 = vrot.slane %v2368_v1, 2  ;;  %v2385_v34 = vadd.f32 %v2384_v47, %v2383_v51  ;;  %v9521_v51 = vld [vmem:[%s10204_s10 + $0x90] sm:$0xff]  ;;  %v9535_v47 = vld [vmem:[%s10204_s10 + $0x98] sm:$0xff] }
 0x85b   :  { %10285 = vst [vmem:[#allocation20_spill] sm:$0xff] %v9521_v51  ;;  %10287 = vst [vmem:[#allocation22_spill] sm:$0xff] %v9535_v47 }
 0x85c   :  { %v2370_v4 = vadd.f32 %v2369_v2, %v2368_v1  ;;  %v2386_v5 = vrot.slane %v2385_v34, 2  ;;  %v9526_v1 = vld [vmem:[%s10204_s10 + $0xb0] sm:$0xff]  ;;  %v9540_v2 = vld [vmem:[%s10204_s10 + $0xb8] sm:$0xff] }
 0x85d   :  { %10286 = vst [vmem:[#allocation21_spill] sm:$0xff] %v9526_v1  ;;  %10288 = vst [vmem:[#allocation23_spill] sm:$0xff] %v9540_v2 }
 0x85e   :  { %v2371_v6 = vrot.slane %v2370_v4, 1  ;;  %v2387_v13 = vadd.f32 %v2386_v5, %v2385_v34  ;;  %v9557_v34 = vld [vmem:[%s10204_s10 + $0xc0] sm:$0xff]  ;;  %v9571_v5 = vld [vmem:[%s10204_s10 + $0xc8] sm:$0xff] }
 0x85f   :  { %10289 = vst [vmem:[#allocation24_spill] sm:$0xff] %v9557_v34  ;;  %10291 = vst [vmem:[#allocation26_spill] sm:$0xff] %v9571_v5 }
 0x860   :  { %v2372_v10 = vadd.f32 %v2371_v6, %v2370_v4  ;;  %v2388_v14 = vrot.slane %v2387_v13, 1  ;;  %v9564_v4 = vld [vmem:[%s10204_s10 + $0xe0] sm:$0xff]  ;;  %v9576_v6 = vld [vmem:[%s10204_s10 + $0xe8] sm:$0xff] }
 0x861   :  { %10290 = vst [vmem:[#allocation25_spill] sm:$0xff] %v9564_v4  ;;  %10292 = vst [vmem:[#allocation27_spill] sm:$0xff] %v9576_v6 }
 0x862   :  { %v2389_v15 = vadd.f32 %v2388_v14, %v2387_v13  ;;  %v2390_v16 = vmul.f32 0.03125, %v2372_v10  ;;  %v9584_v13 = vld [vmem:[%s10204_s10 + $0xd0] sm:$0xff]  ;;  %v9604_v14 = vld [vmem:[%s10204_s10 + $0xf8] sm:$0xff] }
 0x863   :  { %10293 = vst [vmem:[#allocation28_spill] sm:$0xff] %v9584_v13  ;;  %v9592_v10 = vld [vmem:[%s10204_s10 + $0xf0] sm:$0xff]  ;;  %10295 = vst [vmem:[#allocation30_spill] sm:$0xff] %v9604_v14 }
 0x864   :  { %v2391_v17 = vmul.f32 0.03125, %v2389_v15  ;;  %v2392_v57 = vmul.f32 %v2390_v16, %v2390_v16  ;;  %v2394_v18 = vsub.f32 %v2353_v7, %v2390_v16  ;;  %v2395_v19 = vsub.f32 %v2354_v40, %v2390_v16  ;;  %10294 = vst [vmem:[#allocation29_spill] sm:$0xff] %v9592_v10  ;;  %v9612_v15 = vld [vmem:[%s10204_s10 + $0xd8] sm:$0xff] }
 0x865   :  { %v2396_v63 = vsub.f32 %v2355_v55, %v2390_v16  ;;  %v2397_v20 = vsub.f32 %v2356_v45, %v2390_v16  ;;  %v9377_v45 = vld [vmem:[%s10204_s10 + $0x10] sm:$0xff]  ;;  %v9420_v55 = vld [vmem:[%s10204_s10 + $0x60] sm:$0xff]  ;;  %10296 = vst [vmem:[#allocation31_spill] sm:$0xff] %v9612_v15 }
 0x866   :  { %v2393_v43 = vsub.f32 %v2391_v17, %v2392_v57  ;;  %10269 = vst [vmem:[#allocation4_spill] sm:$0xff] %v9377_v45  ;;  %10274 = vst [vmem:[#allocation9_spill] sm:$0xff] %v9420_v55  ;;  %v6022_v16 = vld [vmem:[%s10204_s10 + $0x100] sm:$0xff]  ;;  %v6023_v17 = vld [vmem:[%s10204_s10 + $0x108] sm:$0xff] }
 0x867   :  { %v6024_v57 = vld [vmem:[%s10204_s10 + $0x110] sm:$0xff] }
 0x868   :  { %v2398_v49 = vadd.f32 1e-05, %v2393_v43 }
 0x86a   :  { %7927 = vrsqrt.f32 %v2398_v49 }
 0x877   :  { %v7928_v24 = vpop.eup %7927 }
 0x878   :  { %v2400_v28 = vmul.f32 %v7928_v24, %v2394_v18  ;;  %v2401_v29 = vmul.f32 %v7928_v24, %v2395_v19  ;;  %v2402_v33 = vmul.f32 %v7928_v24, %v2396_v63  ;;  %v2403_v35 = vmul.f32 %v7928_v24, %v2397_v20  ;;  %v6025_v18 = vld [vmem:[%s10204_s10 + $0x118] sm:$0xff]  ;;  %v2462_v19 = vpop.permute.xlu0 %2461  ;;  %v2457_v63 = vpop.permute.xlu1 %2456 }
 0x87a   :  { %v2411_v38 = vmul.f32 %v5932_v26, %v2401_v29  ;;  %v2412_v9 = vmul.f32 %v5932_v26, %v2402_v33  ;;  %v2413_v23 = vmul.f32 %v5932_v26, %v2403_v35  ;;  %v2410_v22 = vmul.f32 %v5932_v26, %v2400_v28 }
 0x87c   :  { %v2422_v31 = vadd.f32 %v5933_v32, %v2412_v9  ;;  %v2423_v37 = vadd.f32 %v5933_v32, %v2413_v23  ;;  %v2421_v44 = vadd.f32 %v5933_v32, %v2411_v38  ;;  %v2420_v40 = vadd.f32 %v5933_v32, %v2410_v22  ;;  %v2590_v20 = vpop.permute.xlu0 %2589  ;;  %v2585_v43 = vpop.permute.xlu1 %2584 }
 0x87e   :  { %vm2427_vm5 = vcmp.ge.f32.partialorder %v2423_v37, 0.0  ;;  %v2430_v25 = vmul.f32 0.01, %v2422_v31  ;;  %v2431_v59 = vmul.f32 0.01, %v2423_v37  ;;  %vm2426_vm6 = vcmp.ge.f32.partialorder %v2422_v31, 0.0 }
 0x87f   :  { %v2429_v46 = vmul.f32 0.01, %v2421_v44  ;;  %vm2425_vm7 = vcmp.ge.f32.partialorder %v2421_v44, 0.0  ;;  %v2428_v48 = vmul.f32 0.01, %v2420_v40  ;;  %vm2424_vm8 = vcmp.ge.f32.partialorder %v2420_v40, 0.0 }
 0x880   :  { %v9334_v7 = vsel %vm2427_vm5, %v2423_v37, %v2431_v59  ;;  %v9338_v8 = vsel %vm2426_vm6, %v2422_v31, %v2430_v25  ;;  %v2452_v49 = vpop.permute.xlu1 %2451 }
 0x881   :  { %7444 = vmatprep.subr.mxu1 %v9334_v7  ;;  %7458 = vmatprep.subr.mxu0 %v9334_v7  ;;  %v9344_v54 = vsel %vm2425_vm7, %v2421_v44, %v2429_v46  ;;  %v9350_v11 = vsel %vm2424_vm8, %v2420_v40, %v2428_v48 }
 0x882   :  { %7445 = vmatpush3.msra.mxu1 %v9334_v7  ;;  %7459 = vmatpush3.msra.mxu0 %v9334_v7 }
 0x883   :  { %7446 = vmatprep.subr.mxu1 %v9338_v8  ;;  %7460 = vmatprep.subr.mxu0 %v9338_v8 }
 0x884   :  { %7447 = vmatpush3.msra.mxu1 %v9338_v8  ;;  %7461 = vmatpush3.msra.mxu0 %v9338_v8  ;;  %v2716_v26 = vpop.permute.xlu1 %2715 }
 0x885   :  { %7448 = vmatprep.subr.mxu1 %v9344_v54  ;;  %7462 = vmatprep.subr.mxu0 %v9344_v54 }
 0x886   :  { %7449 = vmatpush3.msra.mxu1 %v9344_v54  ;;  %7463 = vmatpush3.msra.mxu0 %v9344_v54 }
 0x887   :  { %7450 = vmatprep.subr.mxu1 %v9350_v11  ;;  %7464 = vmatprep.subr.mxu0 %v9350_v11 }
 0x888   :  { %7451 = vmatpush3.msra.mxu1 %v9350_v11  ;;  %7465 = vmatpush3.msra.mxu0 %v9350_v11  ;;  %v2447_v29 = vpop.permute.xlu1 %2446 }
 0x889   :  { %7453 = vmatmul.mubr.msk.f32.vlgmr.msra.gmra.mxu1 %vm2464_vm2, %v9357_v12  ;;  %7467 = vmatmul.mubr.msk.f32.vlgmr.msra.gmra.mxu0 %vm2464_vm2, %v9362_v41 }
 0x88a   :  { %7472 = vmatprep.subr.mxu1 %v9334_v7  ;;  %7486 = vmatprep.subr.mxu0 %v9334_v7 }
 0x88b   :  { %7473 = vmatpush3.msra.mxu1 %v9334_v7  ;;  %7487 = vmatpush3.msra.mxu0 %v9334_v7 }
 0x88c   :  { %7474 = vmatprep.subr.mxu1 %v9338_v8  ;;  %7488 = vmatprep.subr.mxu0 %v9338_v8  ;;  %v2711_v35 = vpop.permute.xlu1 %2710 }
 0x88d   :  { %7455 = vmatprep.mubr.msk.f32.mxu1 %vm2464_vm2, %v9377_v45  ;;  %7469 = vmatprep.mubr.msk.f32.mxu0 %vm2464_vm2, %v9382_v39 }
 0x88e   :  { %7475 = vmatpush3.msra.mxu1 %v9338_v8  ;;  %7489 = vmatpush3.msra.mxu0 %v9338_v8 }
 0x88f   :  { %7456 = vmatmul.mubr.msk.f32.gmra.mxu1 %vm2464_vm2, %v9391_v50  ;;  %7470 = vmatmul.mubr.msk.f32.gmra.mxu0 %vm2464_vm2, %v9396_v42 }
 0x890   :  { %7476 = vmatprep.subr.mxu1 %v9344_v54  ;;  %7490 = vmatprep.subr.mxu0 %v9344_v54  ;;  %v2983_v38 = vpop.permute.xlu1 %2982 }
 0x891   :  { %7477 = vmatpush3.msra.mxu1 %v9344_v54  ;;  %7491 = vmatpush3.msra.mxu0 %v9344_v54 }
 0x892   :  { %7478 = vmatprep.subr.mxu1 %v9350_v11  ;;  %7492 = vmatprep.subr.mxu0 %v9350_v11 }
 0x893   :  { %7479 = vmatpush3.msra.mxu1 %v9350_v11  ;;  %7480 = vmatprep.mubr.msk.f32.mxu1 %vm2464_vm2, %v9413_v53 }
 0x894   :  { %7493 = vmatpush3.msra.mxu0 %v9350_v11  ;;  %7494 = vmatprep.mubr.msk.f32.mxu0 %vm2464_vm2, %v9420_v55  ;;  %v9646_v23 = vpop.permute.xlu1 %2841 }
 0x895   :  { %7481 = vmatmul.mubr.msk.f32.vlgmr.msra.gmra.mxu1 %vm2464_vm2, %v9427_v21  ;;  %7495 = vmatmul.mubr.msk.f32.vlgmr.msra.gmra.mxu0 %vm2464_vm2, %v9432_v30 }
 0x896   :  { %7500 = vmatprep.subr.mxu1 %v9334_v7  ;;  %7514 = vmatprep.subr.mxu0 %v9334_v7 }
 0x897   :  { %7501 = vmatpush3.msra.mxu1 %v9334_v7  ;;  %7515 = vmatpush3.msra.mxu0 %v9334_v7 }
 0x898   :  { %7502 = vmatprep.subr.mxu1 %v9338_v8  ;;  %7516 = vmatprep.subr.mxu0 %v9338_v8 }
 0x899   :  { %7483 = vmatprep.mubr.msk.f32.mxu1 %vm2464_vm2, %v9449_v36  ;;  %7497 = vmatprep.mubr.msk.f32.mxu0 %vm2464_vm2, %v9454_v56 }
 0x89a   :  { %7503 = vmatpush3.msra.mxu1 %v9338_v8  ;;  %7517 = vmatpush3.msra.mxu0 %v9338_v8 }
 0x89b   :  { %7484 = vmatmul.mubr.msk.f32.gmra.mxu1 %vm2464_vm2, %v9463_v58  ;;  %7498 = vmatmul.mubr.msk.f32.gmra.mxu0 %vm2464_vm2, %v9468_v60 }
 0x89c   :  { %7504 = vmatprep.subr.mxu1 %v9344_v54  ;;  %7518 = vmatprep.subr.mxu0 %v9344_v54 }
 0x89d   :  { %7505 = vmatpush3.msra.mxu1 %v9344_v54  ;;  %7519 = vmatpush3.msra.mxu0 %v9344_v54 }
 0x89e   :  { %7506 = vmatprep.subr.mxu1 %v9350_v11  ;;  %7520 = vmatprep.subr.mxu0 %v9350_v11 }
 0x89f   :  { %7507 = vmatpush3.msra.mxu1 %v9350_v11  ;;  %7508 = vmatprep.mubr.msk.f32.mxu1 %vm2464_vm2, %v9485_v61 }
 0x8a0   :  { %7521 = vmatpush3.msra.mxu0 %v9350_v11  ;;  %7522 = vmatprep.mubr.msk.f32.mxu0 %vm2464_vm2, %v9492_v62 }
 0x8a1   :  { %7509 = vmatmul.mubr.msk.f32.vlgmr.msra.gmra.mxu1 %vm2464_vm2, %v9499_v0  ;;  %7523 = vmatmul.mubr.msk.f32.vlgmr.msra.gmra.mxu0 %vm2464_vm2, %v9504_v52 }
 0x8a2   :  { %7528 = vmatprep.subr.mxu1 %v9334_v7  ;;  %7542 = vmatprep.subr.mxu0 %v9334_v7 }
 0x8a3   :  { %7529 = vmatpush3.msra.mxu1 %v9334_v7  ;;  %7543 = vmatpush3.msra.mxu0 %v9334_v7 }
 0x8a4   :  { %7530 = vmatprep.subr.mxu1 %v9338_v8  ;;  %7544 = vmatprep.subr.mxu0 %v9338_v8 }
 0x8a5   :  { %7511 = vmatprep.mubr.msk.f32.mxu1 %vm2464_vm2, %v9521_v51  ;;  %7525 = vmatprep.mubr.msk.f32.mxu0 %vm2464_vm2, %v9526_v1 }
 0x8a6   :  { %7531 = vmatpush3.msra.mxu1 %v9338_v8  ;;  %7545 = vmatpush3.msra.mxu0 %v9338_v8 }
 0x8a7   :  { %7512 = vmatmul.mubr.msk.f32.gmra.mxu1 %vm2464_vm2, %v9535_v47  ;;  %7526 = vmatmul.mubr.msk.f32.gmra.mxu0 %vm2464_vm2, %v9540_v2 }
 0x8a8   :  { %7532 = vmatprep.subr.mxu1 %v9344_v54  ;;  %7546 = vmatprep.subr.mxu0 %v9344_v54 }
 0x8a9   :  { %7533 = vmatpush3.msra.mxu1 %v9344_v54  ;;  %7547 = vmatpush3.msra.mxu0 %v9344_v54 }
 0x8aa   :  { %7534 = vmatprep.subr.mxu1 %v9350_v11  ;;  %7548 = vmatprep.subr.mxu0 %v9350_v11 }
 0x8ab   :  { %7535 = vmatpush3.msra.mxu1 %v9350_v11  ;;  %7536 = vmatprep.mubr.msk.f32.mxu1 %vm2464_vm2, %v9557_v34 }
 0x8ac   :  { %7549 = vmatpush3.msra.mxu0 %v9350_v11  ;;  %7550 = vmatprep.mubr.msk.f32.mxu0 %vm2464_vm2, %v9564_v4 }
 0x8ad   :  { %7537 = vmatmul.mubr.msk.f32.vlgmr.msra.gmra.mxu1 %vm2464_vm2, %v9571_v5  ;;  %7551 = vmatmul.mubr.msk.f32.vlgmr.msra.gmra.mxu0 %vm2464_vm2, %v9576_v6 }
 0x8ae   :  { %7556 = vmatprep.subr.mxu1 %v9334_v7  ;;  %7539 = vmatprep.mubr.msk.f32.mxu1 %vm2464_vm2, %v9584_v13 }
 0x8af   :  { %7557 = vmatpush3.msra.mxu1 %v9334_v7  ;;  %7553 = vmatprep.mubr.msk.f32.mxu0 %vm2464_vm2, %v9592_v10 }
 0x8b0   :  { %7558 = vmatprep.subr.mxu1 %v9338_v8 }
 0x8b1   :  { %7559 = vmatpush3.msra.mxu1 %v9338_v8  ;;  %7554 = vmatmul.mubr.msk.f32.gmra.mxu0 %vm2464_vm2, %v9604_v14 }
 0x8b2   :  { %7540 = vmatmul.mubr.msk.f32.gmra.mxu1 %vm2464_vm2, %v9612_v15  ;;  %7560 = vmatprep.subr.mxu1 %v9344_v54 }
 0x8b3   :  { %7561 = vmatpush3.msra.mxu1 %v9344_v54  ;;  %7564 = vmatprep.mubr.msk.f32.mxu1 %vm2464_vm2, %v6022_v16 }
 0x8b4   :  { %7562 = vmatprep.subr.mxu1 %v9350_v11  ;;  %7578 = vmatprep.mubr.msk.f32.mxu0 %vm2464_vm2, %v9224_v27  ;;  %v2721_v27 = vpop.permute.xlu0 %2720 }
 0x8b5   :  { %7563 = vmatpush3.msra.mxu1 %v9350_v11 }
 0x8b6   :  { %7565 = vmatmul.mubr.msk.f32.vlgmr.msra.gmra.mxu1 %vm2464_vm2, %v6023_v17 }
 0x8b7   :  { %7567 = vmatprep.mubr.msk.f32.mxu1 %vm2464_vm2, %v6024_v57 }
 0x8b8   :  { %v2580_v24 = vpop.permute.xlu0 %2579 }
 0x8ba   :  { %7568 = vmatmul.mubr.msk.f32.gmra.mxu1 %vm2464_vm2, %v6025_v18 }
 0x8bb   :  { %7592 = vmatprep.mubr.msk.f32.mxu1 %vm2464_vm2, %v9229_v3  ;;  %v9650_v3 = vpop.permute.xlu1 %3113 }
 0x8bc   :  { %v2852_v28 = vpop.permute.xlu0 %2851 }
 0x8bf   :  { %v9654_v59 = vpop.permute.xlu1 %2972 }
 0x8c0   :  { %v2575_v33 = vpop.permute.xlu0 %2574 }
 0x8c3   :  { %v9658_v11 = vpop.permute.xlu1 %3244 }
 0x8c4   :  { %v9644_v32 = vpop.permute.xlu0 %2846 }
 0x8c7   :  { %v9660_v10 = vpop.permute.xlu1 %3103 }
 0x8c8   :  { %v2706_v9 = vpop.permute.xlu0 %2705 }
 0x8cb   :  { %v9662_v34 = vpop.permute.xlu1 %3375 }
 0x8cc   :  { %v9648_v22 = vpop.permute.xlu0 %2977  ;;  %10297 = vst [vmem:[#allocation32_spill] sm:$0xff] %v9662_v34 }
 0x8cf   :  { %v3235_v51 = vpop.permute.xlu1 %3234 }
 0x8d0   :  { %v9652_v25 = vpop.permute.xlu0 %2836 }
 0x8d3   :  { %v3507_v34 = vpop.permute.xlu1 %3506 }
 0x8d4   :  { %v9656_v54 = vpop.permute.xlu0 %3108 }
 0x8d8   :  { %v2968_v14 = vpop.permute.xlu0 %2967 }
 0x8dc   :  { %v3240_v5 = vpop.permute.xlu0 %3239 }
 0x8e0   :  { %v9668_v47 = vpop.permute.xlu0 %3098 }
 0x8e1   :  { %10300 = vst [vmem:[#allocation35_spill] sm:$0xff] %v9668_v47 }
 0x8e4   :  { %v3371_v45 = vpop.permute.xlu0 %3370 }
 0x949   :  { %v7454_v31 = vpop.f32.mrf.mxu1  ;;  %v7468_v37 = vpop.f32.mrf.mxu0 }
 0x94a   :  { %v2549_v36 = vadd.f32 %v7454_v31, %v2452_v49  ;;  %v2676_v21 = vadd.f32 %v7468_v37, %v2580_v24  ;;  %v10302_v37 = vld [vmem:[#allocation35_spill] sm:$0xff] }
 0x94b   :  { %v2543_v44 = vpop.f32.mrf.mxu1  ;;  %v2670_v40 = vpop.f32.mrf.mxu0 }
 0x94c   :  { %v2544_v41 = vadd.f32 %v2543_v44, %v2447_v29  ;;  %v2671_v12 = vadd.f32 %v2670_v40, %v2575_v33  ;;  %v3230_v29 = vpop.permute.xlu0 %3229 }
 0x94e   :  { %v2689_v49 = vmax.f32 %v2544_v41, %v2671_v12 }
 0x94f   :  { %v7457_v46 = vpop.f32.mrf.mxu1  ;;  %v7471_v7 = vpop.f32.mrf.mxu0 }
 0x950   :  { %v2559_v0 = vadd.f32 %v7457_v46, %v2462_v19  ;;  %v2686_v61 = vadd.f32 %v7471_v7, %v2590_v20  ;;  %v2690_v20 = vmax.f32 %v2549_v36, %v2676_v21 }
 0x951   :  { %v2553_v48 = vpop.f32.mrf.mxu1  ;;  %v2680_v8 = vpop.f32.mrf.mxu0 }
 0x952   :  { %v2554_v60 = vadd.f32 %v2553_v48, %v2457_v63  ;;  %v2681_v56 = vadd.f32 %v2680_v8, %v2585_v43  ;;  %v2692_v53 = vmax.f32 %v2559_v0, %v2686_v61  ;;  %v10304_v8 = vld [vmem:[#allocation32_spill] sm:$0xff] }
 0x955   :  { %v7482_v16 = vpop.f32.mrf.mxu1  ;;  %v7496_v17 = vpop.f32.mrf.mxu0 }
 0x956   :  { %v2807_v47 = vadd.f32 %v7482_v16, %v2711_v35 }
 0x957   :  { %v2801_v57 = vpop.f32.mrf.mxu1  ;;  %v2932_v18 = vpop.f32.mrf.mxu0 }
 0x958   :  { %v2802_v19 = vadd.f32 %v2801_v57, %v2706_v9  ;;  %v2821_v24 = vmax.f32 %v2690_v20, %v2807_v47 }
 0x95a   :  { %v2820_v33 = vmax.f32 %v2689_v49, %v2802_v19 }
 0x95b   :  { %v7485_v6 = vpop.f32.mrf.mxu1  ;;  %v7499_v4 = vpop.f32.mrf.mxu0 }
 0x95c   :  { %v2817_v30 = vadd.f32 %v7485_v6, %v2721_v27  ;;  %v2948_v63 = vadd.f32 %v7499_v4, %v2852_v28 }
 0x95d   :  { %v2811_v15 = vpop.f32.mrf.mxu1  ;;  %v2942_v13 = vpop.f32.mrf.mxu0 }
 0x95e   :  { %v2812_v50 = vadd.f32 %v2811_v15, %v2716_v26  ;;  %v2943_v0 = vadd.f32 %v2942_v13, %v9644_v32 }
 0x961   :  { %v7510_v2 = vpop.f32.mrf.mxu1  ;;  %v9664_v1 = vpop.f32.mrf.mxu0 }
 0x962   :  { %10298 = vst [vmem:[#allocation33_spill] sm:$0xff] %v9664_v1  ;;  %v2823_v1 = vmax.f32 %v2692_v53, %v2817_v30  ;;  %v2938_v53 = vadd.f32 %v7496_v17, %v9646_v23  ;;  %v2933_v30 = vadd.f32 %v2932_v18, %v9652_v25 }
 0x963   :  { %v3063_v52 = vpop.f32.mrf.mxu1  ;;  %v9666_v62 = vpop.f32.mrf.mxu0 }
 0x964   :  { %10299 = vst [vmem:[#allocation34_spill] sm:$0xff] %v9666_v62  ;;  %v2691_v62 = vmax.f32 %v2554_v60, %v2681_v56  ;;  %v2954_v61 = vmax.f32 %v2823_v1, %v2948_v63  ;;  %v3366_v60 = vpop.permute.xlu1 %3365  ;;  %v3064_v12 = vadd.f32 %v3063_v52, %v2968_v14  ;;  %v2952_v36 = vmax.f32 %v2821_v24, %v2938_v53  ;;  %v10307_v53 = vld [vmem:[#allocation4_spill] sm:$0xff] }
 0x965   :  { %v2951_v47 = vmax.f32 %v2820_v33, %v2933_v30  ;;  %v10306_v33 = vld [vmem:[#allocation3_spill] sm:$0xff]  ;;  %v6046_v30 = vld [vmem:[%s10208_s12 + $0x60] sm:$0xff] }
 0x966   :  { %v2822_v43 = vmax.f32 %v2691_v62, %v2812_v50  ;;  %v3069_v50 = vadd.f32 %v7510_v2, %v9654_v59  ;;  %v3502_v2 = vpop.permute.xlu0 %3501 }
 0x967   :  { %v7513_v55 = vpop.f32.mrf.mxu1  ;;  %v7527_v58 = vpop.f32.mrf.mxu0  ;;  %v3082_v9 = vmax.f32 %v2951_v47, %v3064_v12  ;;  %v3702_v12 = vld [vmem:[%s10208_s12 + $0x30] sm:$0xff]  ;;  %v6043_v47 = vld [vmem:[%s10208_s12 + $0x48] sm:$0xff] }
 0x968   :  { %v3079_v6 = vadd.f32 %v7513_v55, %v2983_v38  ;;  %v2953_v21 = vmax.f32 %v2822_v43, %v2943_v0  ;;  %v3210_v62 = vadd.f32 %v7527_v58, %v9650_v3  ;;  %v3083_v28 = vmax.f32 %v2952_v36, %v3069_v50  ;;  %v6047_v50 = vld [vmem:[%s10208_s12 + $0x68] sm:$0xff]  ;;  %v6045_v36 = vld [vmem:[%s10208_s12 + $0x58] sm:$0xff] }
 0x969   :  { %v3073_v42 = vpop.f32.mrf.mxu1  ;;  %v3204_v39 = vpop.f32.mrf.mxu0  ;;  %v10301_v52 = vld [vmem:[#allocation33_spill] sm:$0xff] }
 0x96a   :  { %v3074_v15 = vadd.f32 %v3073_v42, %v9648_v22  ;;  %v3085_v55 = vmax.f32 %v2954_v61, %v3079_v6  ;;  %v3205_v32 = vadd.f32 %v3204_v39, %v9656_v54  ;;  %v3361_v22 = vpop.permute.xlu1 %3360  ;;  %v3200_v14 = vadd.f32 %v10301_v52, %v9660_v10  ;;  %v3497_v10 = vpop.permute.xlu0 %3496  ;;  %v6068_v52 = vld [vmem:[%s10208_s12 + $0xb0] sm:$0xff] }
 0x96b   :  { %v10303_v44 = vld [vmem:[#allocation34_spill] sm:$0xff] }
 0x96c   :  { %v3084_v1 = vmax.f32 %v2953_v21, %v3074_v15  ;;  %v3216_v35 = vmax.f32 %v3085_v55, %v3210_v62  ;;  %v3195_v40 = vadd.f32 %v10303_v44, %v10302_v37  ;;  %v3214_v48 = vmax.f32 %v3083_v28, %v3200_v14  ;;  %v10308_v21 = vld [vmem:[#allocation5_spill] sm:$0xff]  ;;  %v10309_v55 = vld [vmem:[#allocation7_spill] sm:$0xff]  ;;  %v3698_v28 = vld [vmem:[%s10208_s12 + $0x10] sm:$0xff] }
 0x96d   :  { %v7538_v27 = vpop.f32.mrf.mxu1  ;;  %v7552_v46 = vpop.f32.mrf.mxu0  ;;  %v3701_v62 = vld [vmem:[%s10208_s12 + $0x28] sm:$0xff]  ;;  %v6066_v44 = vld [vmem:[%s10208_s12 + $0xa0] sm:$0xff] }
 0x96e   :  { %v3215_v31 = vmax.f32 %v3084_v1, %v3205_v32  ;;  %v3331_v58 = vadd.f32 %v7538_v27, %v3235_v51  ;;  %v3213_v54 = vmax.f32 %v3082_v9, %v3195_v40  ;;  %v3462_v19 = vadd.f32 %v7552_v46, %v3366_v60  ;;  %v3492_v49 = vpop.permute.xlu1 %3491  ;;  %v3703_v60 = vld [vmem:[%s10208_s12 + $0x38] sm:$0xff]  ;;  %v6044_v1 = vld [vmem:[%s10208_s12 + $0x50] sm:$0xff]  ;;  %v3696_v32 = vld [vmem:[%s10208_s12] sm:$0xff] }
 0x96f   :  { %v3325_v26 = vpop.f32.mrf.mxu1  ;;  %v3456_v56 = vpop.f32.mrf.mxu0  ;;  %v6065_v40 = vld [vmem:[%s10208_s12 + $0x98] sm:$0xff] }
 0x970   :  { %v3326_v25 = vadd.f32 %v3325_v26, %v3230_v29  ;;  %v3345_v16 = vmax.f32 %v3214_v48, %v3331_v58  ;;  %v3457_v24 = vadd.f32 %v3456_v56, %v3361_v22  ;;  %v6049_v26 = vld [vmem:[%s10208_s12 + $0x78] sm:$0xff]  ;;  %v10305_v29 = vld [vmem:[#allocation2_spill] sm:$0xff]  ;;  %v6048_v56 = vld [vmem:[%s10208_s12 + $0x70] sm:$0xff] }
 0x971   :  { %v7555_v4 = vpop.f32.mrf.mxu0  ;;  %v6063_v48 = vld [vmem:[%s10208_s12 + $0x88] sm:$0xff] }
 0x972   :  { %v7541_v41 = vpop.f32.mrf.mxu1  ;;  %v3472_v39 = vadd.f32 %v7555_v4, %v10304_v8  ;;  %v3344_v51 = vmax.f32 %v3213_v54, %v3326_v25  ;;  %v3476_v61 = vmax.f32 %v3345_v16, %v3462_v19  ;;  %v3699_v4 = vld [vmem:[%s10208_s12 + $0x18] sm:$0xff]  ;;  %v10311_v25 = vld [vmem:[#allocation8_spill] sm:$0xff]  ;;  %v10318_v19 = vld [vmem:[#allocation15_spill] sm:$0xff] }
 0x973   :  { %v3341_v42 = vadd.f32 %v7541_v41, %v9658_v11  ;;  %v3466_v59 = vpop.f32.mrf.mxu0  ;;  %v10310_v41 = vld [vmem:[#allocation6_spill] sm:$0xff]  ;;  %v10313_v8 = vld [vmem:[#allocation12_spill] sm:$0xff]  ;;  %v6085_v54 = vld [vmem:[%s10208_s12 + $0xf8] sm:$0xff] }
 0x974   :  { %v3335_v13 = vpop.f32.mrf.mxu1  ;;  %v3467_v57 = vadd.f32 %v3466_v59, %v3371_v45  ;;  %v3475_v45 = vmax.f32 %v3344_v51, %v3457_v24  ;;  %v6064_v59 = vld [vmem:[%s10208_s12 + $0x90] sm:$0xff]  ;;  %v6081_v51 = vld [vmem:[%s10208_s12 + $0xd8] sm:$0xff] }
 0x975   :  { %v3336_v38 = vadd.f32 %v3335_v13, %v3240_v5  ;;  %v3347_v3 = vmax.f32 %v3216_v35, %v3341_v42  ;;  %v3700_v42 = vld [vmem:[%s10208_s12 + $0x20] sm:$0xff]  ;;  %v3697_v35 = vld [vmem:[%s10208_s12 + $0x8] sm:$0xff]  ;;  %v6084_v16 = vld [vmem:[%s10208_s12 + $0xf0] sm:$0xff] }
 0x976   :  { %v7566_v23 = vpop.f32.mrf.mxu1  ;;  %v6042_v13 = vld [vmem:[%s10208_s12 + $0x40] sm:$0xff] }
 0x977   :  { %v3346_v5 = vmax.f32 %v3215_v31, %v3336_v38  ;;  %v3478_v17 = vmax.f32 %v3347_v3, %v3472_v39  ;;  %v3593_v43 = vadd.f32 %v7566_v23, %v3497_v10  ;;  %v6069_v38 = vld [vmem:[%s10208_s12 + $0xb8] sm:$0xff]  ;;  %v6067_v3 = vld [vmem:[%s10208_s12 + $0xa8] sm:$0xff]  ;;  %v6062_v39 = vld [vmem:[%s10208_s12 + $0x80] sm:$0xff] }
 0x978   :  { %v3587_v7 = vpop.f32.mrf.mxu1  ;;  %v6082_v10 = vld [vmem:[%s10208_s12 + $0xe0] sm:$0xff] }
 0x979   :  { %v3477_v63 = vmax.f32 %v3346_v5, %v3467_v57  ;;  %v3588_v0 = vadd.f32 %v3587_v7, %v3492_v49  ;;  %v10312_v7 = vld [vmem:[#allocation10_spill] sm:$0xff]  ;;  %v10317_v57 = vld [vmem:[#allocation13_spill] sm:$0xff] }
 0x97a   :  { %v7569_v11 = vpop.f32.mrf.mxu1  ;;  %v10314_v5 = vld [vmem:[#allocation14_spill] sm:$0xff] }
 0x97b   :  { %v3603_v18 = vadd.f32 %v7569_v11, %v3507_v34  ;;  %v9691_v34 = vmax.f32 %v3476_v61, %v3593_v43  ;;  %v9697_v46 = vmax.f32 %v3475_v45, %v3588_v0  ;;  %v10315_v11 = vld [vmem:[#allocation9_spill] sm:$0xff]  ;;  %v6078_v43 = vld [vmem:[%s10208_s12 + $0xc0] sm:$0xff] }
 0x97c   :  { %v3597_v20 = vpop.f32.mrf.mxu1 }
 0x97d   :  { %v9683_v6 = vmax.f32 %v3478_v17, %v3603_v18  ;;  %v3598_v27 = vadd.f32 %v3597_v20, %v3502_v2  ;;  %v10316_v17 = vld [vmem:[#allocation11_spill] sm:$0xff]  ;;  %v6080_v20 = vld [vmem:[%s10208_s12 + $0xd0] sm:$0xff] }
 0x97e   :  { %v6083_v18 = vld [vmem:[%s10208_s12 + $0xe8] sm:$0xff] }
 0x97f   :  { %v9685_v15 = vmax.f32 %v3477_v63, %v3598_v27  ;;  %7570 = vmatprep.subr.mxu0 %v9683_v6  ;;  %7584 = vmatprep.subr.mxu1 %v9683_v6  ;;  %v6079_v63 = vld [vmem:[%s10208_s12 + $0xc8] sm:$0xff] }
 0x980   :  { %7571 = vmatpush3.msra.mxu0 %v9683_v6  ;;  %7585 = vmatpush3.msra.mxu1 %v9683_v6 }
 0x981   :  { %7572 = vmatprep.subr.mxu0 %v9685_v15  ;;  %7586 = vmatprep.subr.mxu1 %v9685_v15 }
 0x982   :  { %7573 = vmatpush3.msra.mxu0 %v9685_v15  ;;  %7587 = vmatpush3.msra.mxu1 %v9685_v15 }
 0x983   :  { %7574 = vmatprep.subr.mxu0 %v9691_v34  ;;  %7588 = vmatprep.subr.mxu1 %v9691_v34 }
 0x984   :  { %7575 = vmatpush3.msra.mxu0 %v9691_v34  ;;  %7589 = vmatpush3.msra.mxu1 %v9691_v34 }
 0x985   :  { %7576 = vmatprep.subr.mxu0 %v9697_v46  ;;  %7590 = vmatprep.subr.mxu1 %v9697_v46 }
 0x986   :  { %7577 = vmatpush3.msra.mxu0 %v9697_v46  ;;  %7591 = vmatpush3.msra.mxu1 %v9697_v46 }
 0x987   :  { %7579 = vmatmul.mubr.msk.f32.vlgmr.msra.gmra.mxu0 %vm2464_vm2, %v10305_v29  ;;  %7593 = vmatmul.mubr.msk.f32.vlgmr.msra.gmra.mxu1 %vm2464_vm2, %v10306_v33 }
 0x988   :  { %7598 = vmatprep.subr.mxu0 %v6049_v26  ;;  %7581 = vmatprep.mubr.msk.f32.mxu0 %vm2464_vm2, %v10307_v53 }
 0x989   :  { %7599 = vmatpush3.msra.mxu0 %v6049_v26  ;;  %7595 = vmatprep.mubr.msk.f32.mxu1 %vm2464_vm2, %v10308_v21 }
 0x98a   :  { %7600 = vmatprep.subr.mxu0 %v6048_v56  ;;  %7620 = vmatprep.subr.mxu1 %v3703_v60 }
 0x98b   :  { %7601 = vmatpush3.msra.mxu0 %v6048_v56  ;;  %7596 = vmatmul.mubr.msk.f32.gmra.mxu1 %vm2464_vm2, %v10309_v55 }
 0x98c   :  { %7582 = vmatmul.mubr.msk.f32.gmra.mxu0 %vm2464_vm2, %v10310_v41  ;;  %7602 = vmatprep.subr.mxu0 %v6047_v50 }
 0x98d   :  { %7603 = vmatpush3.msra.mxu0 %v6047_v50  ;;  %7621 = vmatpush3.msra.mxu1 %v3703_v60 }
 0x98e   :  { %7604 = vmatprep.subr.mxu0 %v6046_v30  ;;  %7622 = vmatprep.subr.mxu1 %v3702_v12 }
 0x98f   :  { %7605 = vmatpush3.msra.mxu0 %v6046_v30  ;;  %7623 = vmatpush3.msra.mxu1 %v3702_v12  ;;  %v10319_v30 = vld [vmem:[#allocation16_spill] sm:$0xff]  ;;  %v6101_v12 = vld [vmem:[%s10208_s12 + $0x138] sm:$0xff] }
 0x990   :  { %7606 = vmatprep.subr.mxu0 %v6045_v36  ;;  %7624 = vmatprep.subr.mxu1 %v3701_v62 }
 0x991   :  { %7607 = vmatpush3.msra.mxu0 %v6045_v36  ;;  %7625 = vmatpush3.msra.mxu1 %v3701_v62  ;;  %v6100_v36 = vld [vmem:[%s10208_s12 + $0x130] sm:$0xff] }
 0x992   :  { %7608 = vmatprep.subr.mxu0 %v6044_v1  ;;  %7626 = vmatprep.subr.mxu1 %v3700_v42 }
 0x993   :  { %7609 = vmatpush3.msra.mxu0 %v6044_v1  ;;  %7627 = vmatpush3.msra.mxu1 %v3700_v42  ;;  %v10320_v1 = vld [vmem:[#allocation18_spill] sm:$0xff] }
 0x994   :  { %7610 = vmatprep.subr.mxu0 %v6043_v47  ;;  %7628 = vmatprep.subr.mxu1 %v3699_v4 }
 0x995   :  { %7611 = vmatpush3.msra.mxu0 %v6043_v47  ;;  %7629 = vmatpush3.msra.mxu1 %v3699_v4  ;;  %v6099_v47 = vld [vmem:[%s10208_s12 + $0x128] sm:$0xff]  ;;  %v10321_v4 = vld [vmem:[#allocation20_spill] sm:$0xff] }
 0x996   :  { %7612 = vmatprep.subr.mxu0 %v6042_v13  ;;  %7630 = vmatprep.subr.mxu1 %v3698_v28 }
 0x997   :  { %7613 = vmatpush3.msra.mxu0 %v6042_v13  ;;  %7631 = vmatpush3.msra.mxu1 %v3698_v28  ;;  %v6098_v13 = vld [vmem:[%s10208_s12 + $0x120] sm:$0xff] }
 0x998   :  { %7642 = vmatprep.subr.mxu0 %v9683_v6  ;;  %7632 = vmatprep.subr.mxu1 %v3697_v35  ;;  %v10322_v28 = vld [vmem:[#allocation22_spill] sm:$0xff] }
 0x999   :  { %7633 = vmatpush3.msra.mxu1 %v3697_v35  ;;  %v6097_v35 = vld [vmem:[%s10208_s12 + $0x118] sm:$0xff] }
 0x99a   :  { %7634 = vmatprep.subr.mxu1 %v3696_v32 }
 0x99b   :  { %7635 = vmatpush3.msra.mxu1 %v3696_v32  ;;  %v6117_v32 = vld [vmem:[%s10208_s12 + $0x178] sm:$0xff] }
 0x99c   :  { %7656 = vmatprep.subr.mxu1 %v6069_v38 }
 0xa47   :  { %v7580_v2 = vpop.f32.mrf.mxu0  ;;  %v7594_v9 = vpop.f32.mrf.mxu1 }
 0xa49   :  { %v3677_v23 = vpop.f32.mrf.mxu0  ;;  %v3770_v22 = vpop.f32.mrf.mxu1 }
 0xa4a   :  { %7614 = vmatprep.mubr.msk.f32.mxu0 %vm2359_vm4, %v3770_v22  ;;  %7636 = vmatprep.mubr.msk.f32.mxu1 %vm2359_vm4, %v3677_v23  ;;  %v6095_v23 = vld [vmem:[%s10208_s12 + $0x108] sm:$0xff] }
 0xa4b   :  { %v7597_v14 = vpop.f32.mrf.mxu1  ;;  %7615 = vmatmul.mubr.msk.f32.vlgmr.msra.gmra.mxu0 %vm2359_vm4, %v7594_v9  ;;  %7637 = vmatmul.mubr.msk.f32.vlgmr.msra.gmra.mxu1 %vm2359_vm4, %v7580_v2  ;;  %v10323_v2 = vld [vmem:[#allocation17_spill] sm:$0xff]  ;;  %v6116_v9 = vld [vmem:[%s10208_s12 + $0x170] sm:$0xff]  ;;  %v10324_v22 = vld [vmem:[#allocation19_spill] sm:$0xff] }
 0xa4c   :  { %v7583_v31 = vpop.f32.mrf.mxu0  ;;  %7643 = vmatpush3.msra.mxu0 %v9683_v6  ;;  %7657 = vmatpush3.msra.mxu1 %v6069_v38  ;;  %v6096_v38 = vld [vmem:[%s10208_s12 + $0x110] sm:$0xff] }
 0xa4d   :  { %7644 = vmatprep.subr.mxu0 %v9685_v15  ;;  %7658 = vmatprep.subr.mxu1 %v6068_v52  ;;  %v3780_v58 = vpop.f32.mrf.mxu1 }
 0xa4e   :  { %v3687_v37 = vpop.f32.mrf.mxu0  ;;  %7645 = vmatpush3.msra.mxu0 %v9685_v15  ;;  %7659 = vmatpush3.msra.mxu1 %v6068_v52  ;;  %v6115_v52 = vld [vmem:[%s10208_s12 + $0x168] sm:$0xff] }
 0xa4f   :  { %7617 = vmatprep.mubr.msk.f32.mxu0 %vm2359_vm4, %v3780_v58  ;;  %7639 = vmatprep.mubr.msk.f32.mxu1 %vm2359_vm4, %v3687_v37  ;;  %v6114_v58 = vld [vmem:[%s10208_s12 + $0x160] sm:$0xff]  ;;  %v6113_v37 = vld [vmem:[%s10208_s12 + $0x158] sm:$0xff] }
 0xa50   :  { %7646 = vmatprep.subr.mxu0 %v9691_v34  ;;  %7660 = vmatprep.subr.mxu1 %v6067_v3 }
 0xa51   :  { %7618 = vmatmul.mubr.msk.f32.gmra.mxu0 %vm2359_vm4, %v7597_v14  ;;  %7640 = vmatmul.mubr.msk.f32.gmra.mxu1 %vm2359_vm4, %v7583_v31  ;;  %v6094_v14 = vld [vmem:[%s10208_s12 + $0x100] sm:$0xff]  ;;  %v10325_v31 = vld [vmem:[#allocation21_spill] sm:$0xff] }
 0xa52   :  { %7647 = vmatpush3.msra.mxu0 %v9691_v34  ;;  %7661 = vmatpush3.msra.mxu1 %v6067_v3  ;;  %v10326_v3 = vld [vmem:[#allocation23_spill] sm:$0xff] }
 0xa53   :  { %7648 = vmatprep.subr.mxu0 %v9697_v46  ;;  %7662 = vmatprep.subr.mxu1 %v6066_v44 }
 0xa54   :  { %7649 = vmatpush3.msra.mxu0 %v9697_v46  ;;  %7663 = vmatpush3.msra.mxu1 %v6066_v44  ;;  %v6112_v44 = vld [vmem:[%s10208_s12 + $0x150] sm:$0xff] }
 0xa55   :  { %7650 = vmatprep.mubr.msk.f32.mxu0 %vm2464_vm2, %v10311_v25  ;;  %7664 = vmatprep.subr.mxu1 %v6065_v40  ;;  %v6110_v25 = vld [vmem:[%s10208_s12 + $0x140] sm:$0xff] }
 0xa56   :  { %7678 = vmatprep.subr.mxu0 %v9683_v6  ;;  %7651 = vmatmul.mubr.msk.f32.vlgmr.msra.gmra.mxu0 %vm2464_vm2, %v10312_v7 }
 0xa57   :  { %7665 = vmatpush3.msra.mxu1 %v6065_v40  ;;  %7679 = vmatpush3.msra.mxu0 %v9683_v6  ;;  %v6111_v40 = vld [vmem:[%s10208_s12 + $0x148] sm:$0xff] }
 0xa58   :  { %7666 = vmatprep.subr.mxu1 %v6064_v59  ;;  %7680 = vmatprep.subr.mxu0 %v9685_v15 }
 0xa59   :  { %7667 = vmatpush3.msra.mxu1 %v6064_v59  ;;  %7681 = vmatpush3.msra.mxu0 %v9685_v15 }
 0xa5a   :  { %7653 = vmatprep.mubr.msk.f32.mxu0 %vm2464_vm2, %v10313_v8  ;;  %7668 = vmatprep.subr.mxu1 %v6063_v48 }
 0xa5b   :  { %7682 = vmatprep.subr.mxu0 %v9691_v34  ;;  %7654 = vmatmul.mubr.msk.f32.gmra.mxu0 %vm2464_vm2, %v10314_v5 }
 0xa5c   :  { %7669 = vmatpush3.msra.mxu1 %v6063_v48  ;;  %7683 = vmatpush3.msra.mxu0 %v9691_v34 }
 0xa5d   :  { %7670 = vmatprep.subr.mxu1 %v6062_v39  ;;  %7684 = vmatprep.subr.mxu0 %v9697_v46 }
 0xa5e   :  { %7671 = vmatpush3.msra.mxu1 %v6062_v39  ;;  %7685 = vmatpush3.msra.mxu0 %v9697_v46 }
 0xa5f   :  { %7686 = vmatprep.mubr.msk.f32.mxu0 %vm2464_vm2, %v10315_v11  ;;  %7692 = vmatprep.subr.mxu0 %v6085_v54 }
 0xa60   :  { %7714 = vmatprep.subr.mxu1 %v9683_v6  ;;  %7687 = vmatmul.mubr.msk.f32.vlgmr.msra.gmra.mxu0 %vm2464_vm2, %v10316_v17 }
 0xa61   :  { %7693 = vmatpush3.msra.mxu0 %v6085_v54  ;;  %7689 = vmatprep.mubr.msk.f32.mxu0 %vm2464_vm2, %v10317_v57 }
 0xa62   :  { %7694 = vmatprep.subr.mxu0 %v6084_v16 }
 0xa63   :  { %7695 = vmatpush3.msra.mxu0 %v6084_v16 }
 0xa64   :  { %7696 = vmatprep.subr.mxu0 %v6083_v18  ;;  %7690 = vmatmul.mubr.msk.f32.gmra.mxu0 %vm2464_vm2, %v10318_v19 }
 0xa65   :  { %7697 = vmatpush3.msra.mxu0 %v6083_v18 }
 0xa66   :  { %7698 = vmatprep.subr.mxu0 %v6082_v10 }
 0xa67   :  { %7699 = vmatpush3.msra.mxu0 %v6082_v10 }
 0xa68   :  { %7700 = vmatprep.subr.mxu0 %v6081_v51 }
 0xa69   :  { %7701 = vmatpush3.msra.mxu0 %v6081_v51 }
 0xa6a   :  { %7702 = vmatprep.subr.mxu0 %v6080_v20 }
 0xa6b   :  { %7703 = vmatpush3.msra.mxu0 %v6080_v20 }
 0xa6c   :  { %7704 = vmatprep.subr.mxu0 %v6079_v63 }
 0xa6d   :  { %7705 = vmatpush3.msra.mxu0 %v6079_v63 }
 0xa6e   :  { %7706 = vmatprep.subr.mxu0 %v6078_v43 }
 0xa6f   :  { %7707 = vmatpush3.msra.mxu0 %v6078_v43 }
 0xa70   :  { %7750 = vmatprep.subr.mxu0 %v9683_v6 }
 0xb0b   :  { %v7616_v27 = vpop.f32.mrf.mxu0  ;;  %v7638_v49 = vpop.f32.mrf.mxu1 }
 0xb0c   :  { %v9857_v24 = vadd.f32 %v7638_v49, %v7616_v27 }
 0xb0d   :  { %v3876_v61 = vpop.f32.mrf.mxu0  ;;  %v3973_v0 = vpop.f32.mrf.mxu1 }
 0xb0e   :  { %v9859_v45 = vadd.f32 %v3973_v0, %v3876_v61  ;;  %v6133_v0 = vld [vmem:[%s10208_s12 + $0x1b8] sm:$0xff] }
 0xb11   :  { %v7619_v26 = vpop.f32.mrf.mxu0  ;;  %v7641_v29 = vpop.f32.mrf.mxu1 }
 0xb12   :  { %v9861_v33 = vadd.f32 %v7641_v29, %v7619_v26  ;;  %v6132_v29 = vld [vmem:[%s10208_s12 + $0x1b0] sm:$0xff] }
 0xb13   :  { %v9863_v56 = vpop.f32.mrf.mxu0  ;;  %v3983_v59 = vpop.f32.mrf.mxu1 }
 0xb14   :  { %v3984_v54 = vadd.f32 %v3983_v59, %v9863_v56  ;;  %v10328_v56 = vld [vmem:[#allocation26_spill] sm:$0xff] }
 0xb16   :  { %v7652_v60 = vpop.f32.mrf.mxu0 }
 0xb18   :  { %v4058_v53 = vpop.f32.mrf.mxu0 }
 0xb19   :  { %7672 = vmatprep.mubr.msk.f32.mxu1 %vm2359_vm4, %v4058_v53 }
 0xb1a   :  { %7673 = vmatmul.mubr.msk.f32.vlgmr.msra.gmra.mxu1 %vm2359_vm4, %v7652_v60  ;;  %v6131_v60 = vld [vmem:[%s10208_s12 + $0x1a8] sm:$0xff] }
 0xb1b   :  { %v7655_v21 = vpop.f32.mrf.mxu0  ;;  %7715 = vmatpush3.msra.mxu1 %v9683_v6 }
 0xb1c   :  { %7716 = vmatprep.subr.mxu1 %v9685_v15 }
 0xb1d   :  { %v4068_v50 = vpop.f32.mrf.mxu0  ;;  %7717 = vmatpush3.msra.mxu1 %v9685_v15 }
 0xb1e   :  { %7675 = vmatprep.mubr.msk.f32.mxu1 %vm2359_vm4, %v4068_v50  ;;  %7718 = vmatprep.subr.mxu1 %v9691_v34 }
 0xb1f   :  { %7676 = vmatmul.mubr.msk.f32.gmra.mxu1 %vm2359_vm4, %v7655_v21  ;;  %v10329_v21 = vld [vmem:[#allocation28_spill] sm:$0xff] }
 0xb20   :  { %v7688_v55 = vpop.f32.mrf.mxu0  ;;  %7719 = vmatpush3.msra.mxu1 %v9691_v34  ;;  %7722 = vmatprep.mubr.msk.f32.mxu1 %vm2464_vm2, %v10319_v30  ;;  %v10330_v30 = vld [vmem:[#allocation31_spill] sm:$0xff] }
 0xb21   :  { %7720 = vmatprep.subr.mxu1 %v9697_v46 }
 0xb22   :  { %v4253_v41 = vpop.f32.mrf.mxu0  ;;  %7721 = vmatpush3.msra.mxu1 %v9697_v46 }
 0xb23   :  { %7708 = vmatprep.mubr.msk.f32.mxu0 %vm2359_vm4, %v4253_v41  ;;  %7728 = vmatprep.subr.mxu1 %v6101_v12  ;;  %v6128_v41 = vld [vmem:[%s10208_s12 + $0x190] sm:$0xff] }
 0xb24   :  { %v7691_v62 = vpop.f32.mrf.mxu0  ;;  %7709 = vmatmul.mubr.msk.f32.vlgmr.msra.gmra.mxu0 %vm2359_vm4, %v7688_v55  ;;  %7723 = vmatmul.mubr.msk.f32.vlgmr.msra.gmra.mxu1 %vm2464_vm2, %v10320_v1  ;;  %v6130_v55 = vld [vmem:[%s10208_s12 + $0x1a0] sm:$0xff]  ;;  %v6127_v1 = vld [vmem:[%s10208_s12 + $0x188] sm:$0xff] }
 0xb25   :  { %7729 = vmatpush3.msra.mxu1 %v6101_v12  ;;  %7751 = vmatpush3.msra.mxu0 %v9683_v6  ;;  %v6129_v12 = vld [vmem:[%s10208_s12 + $0x198] sm:$0xff] }
 0xb26   :  { %7730 = vmatprep.subr.mxu1 %v6100_v36  ;;  %7752 = vmatprep.subr.mxu0 %v9685_v15  ;;  %v4263_v42 = vpop.f32.mrf.mxu0 }
 0xb27   :  { %7731 = vmatpush3.msra.mxu1 %v6100_v36  ;;  %7753 = vmatpush3.msra.mxu0 %v9685_v15  ;;  %v10331_v36 = vld [vmem:[#allocation25_spill] sm:$0xff] }
 0xb28   :  { %7711 = vmatprep.mubr.msk.f32.mxu0 %vm2359_vm4, %v4263_v42  ;;  %7725 = vmatprep.mubr.msk.f32.mxu1 %vm2464_vm2, %v10321_v4  ;;  %v10333_v42 = vld [vmem:[#allocation29_spill] sm:$0xff]  ;;  %v10334_v4 = vld [vmem:[#allocation30_spill] sm:$0xff] }
 0xb29   :  { %7732 = vmatprep.subr.mxu1 %v6099_v47  ;;  %7754 = vmatprep.subr.mxu0 %v9691_v34 }
 0xb2a   :  { %7712 = vmatmul.mubr.msk.f32.gmra.mxu0 %vm2359_vm4, %v7691_v62  ;;  %7726 = vmatmul.mubr.msk.f32.gmra.mxu1 %vm2464_vm2, %v10322_v28  ;;  %v10332_v62 = vld [vmem:[#allocation27_spill] sm:$0xff]  ;;  %v6148_v28 = vld [vmem:[%s10208_s12 + $0x1f0] sm:$0xff] }
 0xb2b   :  { %7733 = vmatpush3.msra.mxu1 %v6099_v47  ;;  %7755 = vmatpush3.msra.mxu0 %v9691_v34  ;;  %v6126_v47 = vld [vmem:[%s10208_s12 + $0x180] sm:$0xff] }
 0xb2c   :  { %7734 = vmatprep.subr.mxu1 %v6098_v13  ;;  %7756 = vmatprep.subr.mxu0 %v9697_v46 }
 0xb2d   :  { %7735 = vmatpush3.msra.mxu1 %v6098_v13  ;;  %7757 = vmatpush3.msra.mxu0 %v9697_v46  ;;  %v6149_v13 = vld [vmem:[%s10208_s12 + $0x1f8] sm:$0xff] }
 0xb2e   :  { %7736 = vmatprep.subr.mxu1 %v6097_v35  ;;  %7758 = vmatprep.mubr.msk.f32.mxu0 %vm2464_vm2, %v10323_v2  ;;  %v6144_v2 = vld [vmem:[%s10208_s12 + $0x1d0] sm:$0xff] }
 0xb2f   :  { %7764 = vmatprep.subr.mxu0 %v6117_v32  ;;  %7737 = vmatpush3.msra.mxu1 %v6097_v35  ;;  %v6147_v35 = vld [vmem:[%s10208_s12 + $0x1e8] sm:$0xff] }
 0xb30   :  { %7759 = vmatmul.mubr.msk.f32.vlgmr.msra.gmra.mxu0 %vm2464_vm2, %v10324_v22  ;;  %7738 = vmatprep.subr.mxu1 %v6096_v38 }
 0xb31   :  { %7765 = vmatpush3.msra.mxu0 %v6117_v32  ;;  %7739 = vmatpush3.msra.mxu1 %v6096_v38  ;;  %v6146_v32 = vld [vmem:[%s10208_s12 + $0x1e0] sm:$0xff]  ;;  %v6145_v38 = vld [vmem:[%s10208_s12 + $0x1d8] sm:$0xff] }
 0xb32   :  { %7766 = vmatprep.subr.mxu0 %v6116_v9  ;;  %7740 = vmatprep.subr.mxu1 %v6095_v23 }
 0xb33   :  { %7767 = vmatpush3.msra.mxu0 %v6116_v9  ;;  %7761 = vmatprep.mubr.msk.f32.mxu0 %vm2464_vm2, %v10325_v31  ;;  %v6143_v9 = vld [vmem:[%s10208_s12 + $0x1c8] sm:$0xff] }
 0xb34   :  { %7768 = vmatprep.subr.mxu0 %v6115_v52  ;;  %7741 = vmatpush3.msra.mxu1 %v6095_v23  ;;  %v6142_v23 = vld [vmem:[%s10208_s12 + $0x1c0] sm:$0xff] }
 0xb35   :  { %7762 = vmatmul.mubr.msk.f32.gmra.mxu0 %vm2464_vm2, %v10326_v3  ;;  %7742 = vmatprep.subr.mxu1 %v6094_v14 }
 0xb36   :  { %7769 = vmatpush3.msra.mxu0 %v6115_v52  ;;  %7743 = vmatpush3.msra.mxu1 %v6094_v14 }
 0xb37   :  { %7770 = vmatprep.subr.mxu0 %v6114_v58  ;;  %7786 = vmatprep.subr.mxu1 %v9683_v6 }
 0xb38   :  { %7771 = vmatpush3.msra.mxu0 %v6114_v58 }
 0xb39   :  { %7772 = vmatprep.subr.mxu0 %v6113_v37 }
 0xb3a   :  { %7773 = vmatpush3.msra.mxu0 %v6113_v37 }
 0xb3b   :  { %7774 = vmatprep.subr.mxu0 %v6112_v44 }
 0xb3c   :  { %7775 = vmatpush3.msra.mxu0 %v6112_v44 }
 0xb3d   :  { %7776 = vmatprep.subr.mxu0 %v6111_v40 }
 0xb3e   :  { %7777 = vmatpush3.msra.mxu0 %v6111_v40 }
 0xb3f   :  { %7778 = vmatprep.subr.mxu0 %v6110_v25 }
 0xb40   :  { %7779 = vmatpush3.msra.mxu0 %v6110_v25 }
 0xb41   :  { %7822 = vmatprep.subr.mxu0 %v9683_v6 }
 0xbda   :  { %v7674_v7 = vpop.f32.mrf.mxu1 }
 0xbdb   :  { %v4184_v48 = vadd.f32 %v7674_v7, %v9857_v24 }
 0xbdc   :  { %v4164_v8 = vpop.f32.mrf.mxu1 }
 0xbdd   :  { %v4183_v39 = vadd.f32 %v4164_v8, %v9859_v45  ;;  %v10327_v45 = vld [vmem:[#allocation24_spill] sm:$0xff] }
 0xbdf   :  { %v7677_v5 = vpop.f32.mrf.mxu1 }
 0xbe0   :  { %v4186_v11 = vadd.f32 %v7677_v5, %v9861_v33 }
 0xbe1   :  { %v4174_v16 = vpop.f32.mrf.mxu1 }
 0xbe2   :  { %v4185_v17 = vadd.f32 %v4174_v16, %v3984_v54 }
 0xbe4   :  { %v7710_v57 = vpop.f32.mrf.mxu0  ;;  %v7724_v18 = vpop.f32.mrf.mxu1 }
 0xbe5   :  { %v9957_v10 = vadd.f32 %v7710_v57, %v4184_v48 }
 0xbe6   :  { %v4359_v19 = vpop.f32.mrf.mxu0  ;;  %v4448_v51 = vpop.f32.mrf.mxu1 }
 0xbe7   :  { %v9959_v20 = vadd.f32 %v4359_v19, %v4183_v39  ;;  %7744 = vmatprep.mubr.msk.f32.mxu1 %vm2359_vm4, %v4448_v51  ;;  %v7935_v19 = vld [vmem:[%s10204_s10 + $0x110] sm:$0xff] }
 0xbe8   :  { %7745 = vmatmul.mubr.msk.f32.vlgmr.msra.gmra.mxu1 %vm2359_vm4, %v7724_v18  ;;  %v7934_v18 = vld [vmem:[%s10204_s10 + $0x108] sm:$0xff] }
 0xbe9   :  { %7787 = vmatpush3.msra.mxu1 %v9683_v6 }
 0xbea   :  { %v7713_v63 = vpop.f32.mrf.mxu0  ;;  %v7727_v43 = vpop.f32.mrf.mxu1  ;;  %7788 = vmatprep.subr.mxu1 %v9685_v15 }
 0xbeb   :  { %v9965_v27 = vadd.f32 %v7713_v63, %v4186_v11  ;;  %7789 = vmatpush3.msra.mxu1 %v9685_v15  ;;  %v6163_v63 = vld [vmem:[%s10208_s12 + $0x228] sm:$0xff] }
 0xbec   :  { %v4369_v49 = vpop.f32.mrf.mxu0  ;;  %v4458_v24 = vpop.f32.mrf.mxu1  ;;  %7790 = vmatprep.subr.mxu1 %v9691_v34 }
 0xbed   :  { %v9969_v61 = vadd.f32 %v4369_v49, %v4185_v17  ;;  %7747 = vmatprep.mubr.msk.f32.mxu1 %vm2359_vm4, %v4458_v24  ;;  %7791 = vmatpush3.msra.mxu1 %v9691_v34  ;;  %v6160_v49 = vld [vmem:[%s10208_s12 + $0x210] sm:$0xff]  ;;  %v6159_v24 = vld [vmem:[%s10208_s12 + $0x208] sm:$0xff] }
 0xbee   :  { %7748 = vmatmul.mubr.msk.f32.gmra.mxu1 %vm2359_vm4, %v7727_v43  ;;  %7792 = vmatprep.subr.mxu1 %v9697_v46  ;;  %v6162_v43 = vld [vmem:[%s10208_s12 + $0x220] sm:$0xff] }
 0xbef   :  { %7793 = vmatpush3.msra.mxu1 %v9697_v46  ;;  %7794 = vmatprep.mubr.msk.f32.mxu1 %vm2464_vm2, %v10327_v45 }
 0xbf0   :  { %v7760_v26 = vpop.f32.mrf.mxu0  ;;  %7800 = vmatprep.subr.mxu1 %v6133_v0 }
 0xbf2   :  { %v4643_v33 = vpop.f32.mrf.mxu0  ;;  %7795 = vmatmul.mubr.msk.f32.vlgmr.msra.gmra.mxu1 %vm2464_vm2, %v10328_v56 }
 0xbf3   :  { %7780 = vmatprep.mubr.msk.f32.mxu0 %vm2359_vm4, %v4643_v33  ;;  %7801 = vmatpush3.msra.mxu1 %v6133_v0 }
 0xbf4   :  { %7781 = vmatmul.mubr.msk.f32.vlgmr.msra.gmra.mxu0 %vm2359_vm4, %v7760_v26  ;;  %7802 = vmatprep.subr.mxu1 %v6132_v29 }
 0xbf5   :  { %v7763_v53 = vpop.f32.mrf.mxu0  ;;  %7823 = vmatpush3.msra.mxu0 %v9683_v6  ;;  %7803 = vmatpush3.msra.mxu1 %v6132_v29 }
 0xbf6   :  { %7824 = vmatprep.subr.mxu0 %v9685_v15  ;;  %7797 = vmatprep.mubr.msk.f32.mxu1 %vm2464_vm2, %v10329_v21 }
 0xbf7   :  { %v4653_v50 = vpop.f32.mrf.mxu0  ;;  %7825 = vmatpush3.msra.mxu0 %v9685_v15  ;;  %7804 = vmatprep.subr.mxu1 %v6131_v60 }
 0xbf8   :  { %7783 = vmatprep.mubr.msk.f32.mxu0 %vm2359_vm4, %v4653_v50  ;;  %7826 = vmatprep.subr.mxu0 %v9691_v34 }
 0xbf9   :  { %7784 = vmatmul.mubr.msk.f32.gmra.mxu0 %vm2359_vm4, %v7763_v53  ;;  %7798 = vmatmul.mubr.msk.f32.gmra.mxu1 %vm2464_vm2, %v10330_v30 }
 0xbfa   :  { %7805 = vmatpush3.msra.mxu1 %v6131_v60  ;;  %7827 = vmatpush3.msra.mxu0 %v9691_v34 }
 0xbfb   :  { %7806 = vmatprep.subr.mxu1 %v6130_v55  ;;  %7828 = vmatprep.subr.mxu0 %v9697_v46 }
 0xbfc   :  { %7807 = vmatpush3.msra.mxu1 %v6130_v55  ;;  %7829 = vmatpush3.msra.mxu0 %v9697_v46 }
 0xbfd   :  { %7808 = vmatprep.subr.mxu1 %v6129_v12  ;;  %7830 = vmatprep.mubr.msk.f32.mxu0 %vm2464_vm2, %v10331_v36  ;;  %v5446_v36 = vld [vmem:[%s10209_s16 + $0x8] sm:$0xff] }
 0xbfe   :  { %7809 = vmatpush3.msra.mxu1 %v6129_v12  ;;  %7831 = vmatmul.mubr.msk.f32.vlgmr.msra.gmra.mxu0 %vm2464_vm2, %v10332_v62  ;;  %v5448_v12 = vld [vmem:[%s10209_s16 + $0x18] sm:$0xff]  ;;  %v5445_v62 = vld [vmem:[%s10209_s16] sm:$0xff] }
 0xbff   :  { %7810 = vmatprep.subr.mxu1 %v6128_v41  ;;  %7833 = vmatprep.mubr.msk.f32.mxu0 %vm2464_vm2, %v10333_v42 }
 0xc00   :  { %7811 = vmatpush3.msra.mxu1 %v6128_v41  ;;  %7836 = vmatprep.subr.mxu0 %v6149_v13  ;;  %v5447_v41 = vld [vmem:[%s10209_s16 + $0x10] sm:$0xff] }
 0xc01   :  { %7812 = vmatprep.subr.mxu1 %v6127_v1  ;;  %7837 = vmatpush3.msra.mxu0 %v6149_v13  ;;  %v6170_v13 = vld [vmem:[%s10210_s13] ss:$0 sm:$0xff] }
 0xc02   :  { %7813 = vmatpush3.msra.mxu1 %v6127_v1  ;;  %7834 = vmatmul.mubr.msk.f32.gmra.mxu0 %vm2464_vm2, %v10334_v4 }
 0xc03   :  { %7814 = vmatprep.subr.mxu1 %v6126_v47  ;;  %7838 = vmatprep.subr.mxu0 %v6148_v28 }
 0xc04   :  { %7815 = vmatpush3.msra.mxu1 %v6126_v47  ;;  %7839 = vmatpush3.msra.mxu0 %v6148_v28 }
 0xc05   :  { %7858 = vmatprep.subr.mxu1 %v9683_v6  ;;  %7840 = vmatprep.subr.mxu0 %v6147_v35 }
 0xc06   :  { %7841 = vmatpush3.msra.mxu0 %v6147_v35 }
 0xc07   :  { %7842 = vmatprep.subr.mxu0 %v6146_v32 }
 0xc08   :  { %7843 = vmatpush3.msra.mxu0 %v6146_v32 }
 0xc09   :  { %7844 = vmatprep.subr.mxu0 %v6145_v38 }
 0xc0a   :  { %7845 = vmatpush3.msra.mxu0 %v6145_v38 }
 0xc0b   :  { %7846 = vmatprep.subr.mxu0 %v6144_v2 }
 0xc0c   :  { %7847 = vmatpush3.msra.mxu0 %v6144_v2 }
 0xc0d   :  { %7848 = vmatprep.subr.mxu0 %v6143_v9 }
 0xc0e   :  { %7849 = vmatpush3.msra.mxu0 %v6143_v9 }
 0xc0f   :  { %7850 = vmatprep.subr.mxu0 %v6142_v23 }
 0xc10   :  { %7851 = vmatpush3.msra.mxu0 %v6142_v23 }
 0xc11   :  { %7894 = vmatprep.subr.mxu0 %v5448_v12 }
 0xca8   :  { %v7746_v22 = vpop.f32.mrf.mxu1 }
 0xca9   :  { %v4574_v52 = vadd.f32 %v7746_v22, %v9957_v10 }
 0xcaa   :  { %v4554_v14 = vpop.f32.mrf.mxu1 }
 0xcab   :  { %v4573_v31 = vadd.f32 %v4554_v14, %v9959_v20  ;;  %v7936_v20 = vld [vmem:[%s10204_s10 + $0x118] sm:$0xff] }
 0xcae   :  { %v7749_v58 = vpop.f32.mrf.mxu1 }
 0xcaf   :  { %v4576_v3 = vadd.f32 %v7749_v58, %v9965_v27  ;;  %v6161_v27 = vld [vmem:[%s10208_s12 + $0x218] sm:$0xff] }
 0xcb0   :  { %v4564_v37 = vpop.f32.mrf.mxu1 }
 0xcb1   :  { %v4575_v44 = vadd.f32 %v4564_v37, %v9969_v61  ;;  %v6158_v61 = vld [vmem:[%s10208_s12 + $0x200] sm:$0xff] }
 0xcb2   :  { %v7796_v40 = vpop.f32.mrf.mxu1 }
 0xcb4   :  { %v7782_v25 = vpop.f32.mrf.mxu0  ;;  %v4838_v59 = vpop.f32.mrf.mxu1 }
 0xcb5   :  { %v4769_v7 = vadd.f32 %v7782_v25, %v4574_v52  ;;  %7816 = vmatprep.mubr.msk.f32.mxu1 %vm2359_vm4, %v4838_v59 }
 0xcb6   :  { %v4749_v48 = vpop.f32.mrf.mxu0  ;;  %7817 = vmatmul.mubr.msk.f32.vlgmr.msra.gmra.mxu1 %vm2359_vm4, %v7796_v40 }
 0xcb7   :  { %v4768_v8 = vadd.f32 %v4749_v48, %v4573_v31  ;;  %7859 = vmatpush3.msra.mxu1 %v9683_v6  ;;  %v6165_v6 = vld [vmem:[%s10208_s12 + $0x238] sm:$0xff] }
 0xcb8   :  { %7860 = vmatprep.subr.mxu1 %v9685_v15 }
 0xcb9   :  { %v7785_v39 = vpop.f32.mrf.mxu0  ;;  %v7799_v5 = vpop.f32.mrf.mxu1  ;;  %7861 = vmatpush3.msra.mxu1 %v9685_v15  ;;  %v7933_v15 = vld [vmem:[%s10204_s10 + $0x100] sm:$0xff] }
 0xcba   :  { %v4771_v54 = vadd.f32 %v7785_v39, %v4576_v3  ;;  %7862 = vmatprep.subr.mxu1 %v9691_v34 }
 0xcbb   :  { %v4759_v11 = vpop.f32.mrf.mxu0  ;;  %v4848_v16 = vpop.f32.mrf.mxu1  ;;  %7863 = vmatpush3.msra.mxu1 %v9691_v34 }
 0xcbc   :  { %v4770_v17 = vadd.f32 %v4759_v11, %v4575_v44  ;;  %7819 = vmatprep.mubr.msk.f32.mxu1 %vm2359_vm4, %v4848_v16  ;;  %7864 = vmatprep.subr.mxu1 %v9697_v46 }
 0xcbd   :  { %7820 = vmatmul.mubr.msk.f32.gmra.mxu1 %vm2359_vm4, %v7799_v5 }
 0xcbe   :  { %v7832_v57 = vpop.f32.mrf.mxu0  ;;  %7865 = vmatpush3.msra.mxu1 %v9697_v46  ;;  %7866 = vmatprep.mubr.msk.f32.mxu1 %vm2464_vm2, %v7933_v15  ;;  %v6164_v46 = vld [vmem:[%s10208_s12 + $0x230] sm:$0xff] }
 0xcbf   :  { %7872 = vmatprep.subr.mxu1 %v6165_v6 }
 0xcc0   :  { %v5033_v34 = vpop.f32.mrf.mxu0 }
 0xcc1   :  { %7852 = vmatprep.mubr.msk.f32.mxu0 %vm2359_vm4, %v5033_v34  ;;  %7867 = vmatmul.mubr.msk.f32.vlgmr.msra.gmra.mxu1 %vm2464_vm2, %v7934_v18 }
 0xcc2   :  { %v7835_v10 = vpop.f32.mrf.mxu0  ;;  %7853 = vmatmul.mubr.msk.f32.vlgmr.msra.gmra.mxu0 %vm2359_vm4, %v7832_v57  ;;  %7869 = vmatprep.mubr.msk.f32.mxu1 %vm2464_vm2, %v7935_v19 }
 0xcc3   :  { %7873 = vmatpush3.msra.mxu1 %v6165_v6  ;;  %7895 = vmatpush3.msra.mxu0 %v5448_v12 }
 0xcc4   :  { %v5043_v51 = vpop.f32.mrf.mxu0  ;;  %7874 = vmatprep.subr.mxu1 %v6164_v46  ;;  %7896 = vmatprep.subr.mxu0 %v5447_v41 }
 0xcc5   :  { %7855 = vmatprep.mubr.msk.f32.mxu0 %vm2359_vm4, %v5043_v51  ;;  %7870 = vmatmul.mubr.msk.f32.gmra.mxu1 %vm2464_vm2, %v7936_v20 }
 0xcc6   :  { %7856 = vmatmul.mubr.msk.f32.gmra.mxu0 %vm2359_vm4, %v7835_v10  ;;  %7875 = vmatpush3.msra.mxu1 %v6164_v46 }
 0xcc7   :  { %7876 = vmatprep.subr.mxu1 %v6163_v63  ;;  %7897 = vmatpush3.msra.mxu0 %v5447_v41  ;;  %v6171_v41 = vld [vmem:[%s10211_s14] ss:$0 sm:$0xff] }
 0xcc8   :  { %7877 = vmatpush3.msra.mxu1 %v6163_v63  ;;  %7898 = vmatprep.subr.mxu0 %v5446_v36 }
 0xcc9   :  { %7878 = vmatprep.subr.mxu1 %v6162_v43  ;;  %7899 = vmatpush3.msra.mxu0 %v5446_v36 }
 0xcca   :  { %7879 = vmatpush3.msra.mxu1 %v6162_v43  ;;  %7900 = vmatprep.subr.mxu0 %v5445_v62 }
 0xccb   :  { %7880 = vmatprep.subr.mxu1 %v6161_v27  ;;  %7901 = vmatpush3.msra.mxu0 %v5445_v62 }
 0xccc   :  { %7881 = vmatpush3.msra.mxu1 %v6161_v27 }
 0xccd   :  { %7882 = vmatprep.subr.mxu1 %v6160_v49 }
 0xcce   :  { %7883 = vmatpush3.msra.mxu1 %v6160_v49 }
 0xccf   :  { %7884 = vmatprep.subr.mxu1 %v6159_v24 }
 0xcd0   :  { %7885 = vmatpush3.msra.mxu1 %v6159_v24 }
 0xcd1   :  { %7886 = vmatprep.subr.mxu1 %v6158_v61 }
 0xcd2   :  { %7887 = vmatpush3.msra.mxu1 %v6158_v61 }
 0xd76   :  { %v7818_v0 = vpop.f32.mrf.mxu1 }
 0xd77   :  { %v4964_v45 = vadd.f32 %v7818_v0, %v4769_v7 }
 0xd78   :  { %v4944_v26 = vpop.f32.mrf.mxu1 }
 0xd79   :  { %v4963_v29 = vadd.f32 %v4944_v26, %v4768_v8 }
 0xd7d   :  { %v7821_v33 = vpop.f32.mrf.mxu1 }
 0xd7e   :  { %v4966_v56 = vadd.f32 %v7821_v33, %v4771_v54 }
 0xd7f   :  { %v4954_v60 = vpop.f32.mrf.mxu1 }
 0xd80   :  { %v4965_v53 = vadd.f32 %v4954_v60, %v4770_v17 }
 0xd81   :  { %v7868_v21 = vpop.f32.mrf.mxu1 }
 0xd82   :  { %v7854_v1 = vpop.f32.mrf.mxu0 }
 0xd83   :  { %v5228_v50 = vpop.f32.mrf.mxu1  ;;  %v5159_v47 = vadd.f32 %v7854_v1, %v4964_v45 }
 0xd84   :  { %7888 = vmatprep.mubr.msk.f32.mxu1 %vm2359_vm4, %v5228_v50  ;;  %v5139_v42 = vpop.f32.mrf.mxu0 }
 0xd85   :  { %v7871_v55 = vpop.f32.mrf.mxu1  ;;  %7889 = vmatmul.mubr.msk.f32.vlgmr.msra.gmra.mxu1 %vm2359_vm4, %v7868_v21  ;;  %v5158_v35 = vadd.f32 %v5139_v42, %v4963_v29 }
 0xd86   :  { %v7857_v4 = vpop.f32.mrf.mxu0 }
 0xd87   :  { %v5238_v30 = vpop.f32.mrf.mxu1  ;;  %v5161_v2 = vadd.f32 %v7857_v4, %v4966_v56 }
 0xd88   :  { %7891 = vmatprep.mubr.msk.f32.mxu1 %vm2359_vm4, %v5238_v30  ;;  %v5149_v9 = vpop.f32.mrf.mxu0 }
 0xd89   :  { %7892 = vmatmul.mubr.msk.f32.gmra.mxu1 %vm2359_vm4, %v7871_v55  ;;  %v5160_v3 = vadd.f32 %v5149_v9, %v4965_v53 }
 0xe45   :  { %v7890_v28 = vpop.f32.mrf.mxu1 }
 0xe46   :  { %v5354_v32 = vadd.f32 %v7890_v28, %v5159_v47  ;;  %v6172_v47 = vld [vmem:[%s10212_s15] ss:$0 sm:$0xff] }
 0xe47   :  { %v5334_v38 = vpop.f32.mrf.mxu1 }
 0xe48   :  { %v5364_v23 = vadd.f32 %v6170_v13, %v5354_v32  ;;  %v5353_v22 = vadd.f32 %v5334_v38, %v5158_v35 }
 0xe49   :  { %v7893_v52 = vpop.f32.mrf.mxu1 }
 0xe4a   :  { %v5383_v14 = vmul.f32 %v5364_v23, %v5364_v23  ;;  %v5363_v31 = vadd.f32 %v6170_v13, %v5353_v22  ;;  %v5356_v58 = vadd.f32 %v7893_v52, %v5161_v2  ;;  %v5370_v44 = vsel %vm2464_vm2, %v5364_v23, 0.0 }
 0xe4b   :  { %v5344_v37 = vpop.f32.mrf.mxu1 }
 0xe4c   :  { %v5369_v40 = vsel %vm2464_vm2, %v5363_v31, 0.0  ;;  %v5382_v25 = vmul.f32 %v5363_v31, %v5363_v31  ;;  %v5366_v7 = vadd.f32 %v6170_v13, %v5356_v58  ;;  %v5355_v48 = vadd.f32 %v5344_v37, %v5160_v3 }
 0xe4d   :  { %v5371_v59 = vadd.f32 %v5370_v44, %v5369_v40  ;;  %v5387_v8 = vsel %vm2464_vm2, %v5383_v14, 0.0  ;;  %v5634_v44 = vld [vmem:[%s10213_s20 + $0x18] sm:$0xff]  ;;  %v5633_v40 = vld [vmem:[%s10213_s20 + $0x10] sm:$0xff] }
 0xe4e   :  { %v5386_v39 = vsel %vm2464_vm2, %v5382_v25, 0.0  ;;  %v5365_v54 = vadd.f32 %v6170_v13, %v5355_v48  ;;  %v5385_v11 = vmul.f32 %v5366_v7, %v5366_v7  ;;  %v5374_v57 = vsel %vm2464_vm2, %v5366_v7, 0.0  ;;  %7908 = vmatprep.subr.mxu0 %v5634_v44  ;;  %v5632_v25 = vld [vmem:[%s10213_s20 + $0x8] sm:$0xff] }
 0xe4f   :  { %v5388_v5 = vadd.f32 %v5387_v8, %v5386_v39 }
 0xe50   :  { %v5372_v16 = vsel %vm2464_vm2, %v5365_v54, 0.0  ;;  %v5384_v17 = vmul.f32 %v5365_v54, %v5365_v54  ;;  %v5391_v46 = vsel %vm2464_vm2, %v5385_v11, 0.0 }
 0xe51   :  { %v5373_v6 = vadd.f32 %v5372_v16, %v5371_v59  ;;  %v5631_v59 = vld [vmem:[%s10213_s20] sm:$0xff] }
 0xe52   :  { %v5389_v15 = vsel %vm2464_vm2, %v5384_v17, 0.0 }
 0xe53   :  { %v5375_v34 = vadd.f32 %v5374_v57, %v5373_v6  ;;  %v5390_v18 = vadd.f32 %v5389_v15, %v5388_v5 }
 0xe55   :  { %v5376_v10 = vrot.slane %v5375_v34, 4  ;;  %v5392_v19 = vadd.f32 %v5391_v46, %v5390_v18 }
 0xe57   :  { %v5377_v51 = vadd.f32 %v5376_v10, %v5375_v34  ;;  %v5393_v20 = vrot.slane %v5392_v19, 4 }
 0xe59   :  { %v5378_v63 = vrot.slane %v5377_v51, 2  ;;  %v5394_v43 = vadd.f32 %v5393_v20, %v5392_v19 }
 0xe5b   :  { %v5379_v27 = vadd.f32 %v5378_v63, %v5377_v51  ;;  %v5395_v49 = vrot.slane %v5394_v43, 2 }
 0xe5d   :  { %v5380_v24 = vrot.slane %v5379_v27, 1  ;;  %v5396_v61 = vadd.f32 %v5395_v49, %v5394_v43 }
 0xe5f   :  { %v5381_v0 = vadd.f32 %v5380_v24, %v5379_v27  ;;  %v5397_v45 = vrot.slane %v5396_v61, 1 }
 0xe61   :  { %v5398_v26 = vadd.f32 %v5397_v45, %v5396_v61  ;;  %v5399_v29 = vmul.f32 0.03125, %v5381_v0 }
 0xe63   :  { %v5400_v33 = vmul.f32 0.03125, %v5398_v26  ;;  %v5401_v56 = vmul.f32 %v5399_v29, %v5399_v29  ;;  %v5405_v60 = vsub.f32 %v5365_v54, %v5399_v29  ;;  %v5403_v53 = vsub.f32 %v5363_v31, %v5399_v29 }
 0xe64   :  { %v5404_v21 = vsub.f32 %v5364_v23, %v5399_v29  ;;  %v5406_v50 = vsub.f32 %v5366_v7, %v5399_v29  ;;  %v6173_v7 = vld [vmem:[%s10214_s17] ss:$0 sm:$0xff] }
 0xe65   :  { %v5402_v55 = vsub.f32 %v5400_v33, %v5401_v56 }
 0xe67   :  { %v5407_v30 = vadd.f32 1e-05, %v5402_v55 }
 0xe69   :  { %7929 = vrsqrt.f32 %v5407_v30 }
 0xe76   :  { %v7930_v12 = vpop.eup %7929 }
 0xe77   :  { %v5411_v36 = vmul.f32 %v7930_v12, %v5405_v60  ;;  %v5409_v62 = vmul.f32 %v7930_v12, %v5403_v53  ;;  %v5410_v1 = vmul.f32 %v7930_v12, %v5404_v21  ;;  %v5412_v42 = vmul.f32 %v7930_v12, %v5406_v50 }
 0xe79   :  { %v5419_v4 = vmul.f32 %v6171_v41, %v5409_v62  ;;  %v5420_v13 = vmul.f32 %v6171_v41, %v5410_v1  ;;  %v5421_v28 = vmul.f32 %v6171_v41, %v5411_v36  ;;  %v5422_v35 = vmul.f32 %v6171_v41, %v5412_v42 }
 0xe7b   :  { %v5429_v32 = vadd.f32 %v6172_v47, %v5419_v4  ;;  %v5430_v38 = vadd.f32 %v6172_v47, %v5420_v13  ;;  %v5431_v2 = vadd.f32 %v6172_v47, %v5421_v28  ;;  %v5432_v9 = vadd.f32 %v6172_v47, %v5422_v35 }
 0xe7d   :  { %vm5433_vm9 = vcmp.ge.f32.partialorder %v5429_v32, 0.0  ;;  %v5437_v23 = vmul.f32 0.01, %v5429_v32  ;;  %vm5434_vm10 = vcmp.ge.f32.partialorder %v5430_v38, 0.0  ;;  %v5438_v22 = vmul.f32 0.01, %v5430_v38 }
 0xe7e   :  { %vm5435_vm11 = vcmp.ge.f32.partialorder %v5431_v2, 0.0  ;;  %v5439_v52 = vmul.f32 0.01, %v5431_v2  ;;  %v5440_v58 = vmul.f32 0.01, %v5432_v9  ;;  %vm5436_vm12 = vcmp.ge.f32.partialorder %v5432_v9, 0.0 }
 0xe7f   :  { %v5441_v14 = vsel %vm5433_vm9, %v5429_v32, %v5437_v23  ;;  %v5442_v31 = vsel %vm5434_vm10, %v5430_v38, %v5438_v22  ;;  %v6178_v38 = vld [vmem:[%s10215_s18] ss:$0 sm:$0xff] }
 0xe80   :  { %7902 = vmatprep.mubr.msk.f32.mxu0 %vm2464_vm2, %v5441_v14  ;;  %v5443_v3 = vsel %vm5435_vm11, %v5431_v2, %v5439_v52  ;;  %v5444_v37 = vsel %vm5436_vm12, %v5432_v9, %v5440_v58  ;;  %v6179_v52 = vld [vmem:[%s10216_s19] ss:$0 sm:$0xff] }
 0xe81   :  { %7903 = vmatmul.mubr.msk.f32.vlgmr.msra.gmra.mxu0 %vm2464_vm2, %v5442_v31 }
 0xe82   :  { %7905 = vmatprep.mubr.msk.f32.mxu0 %vm2464_vm2, %v5443_v3  ;;  %7909 = vmatpush3.msra.mxu0 %v5634_v44 }
 0xe83   :  { %7910 = vmatprep.subr.mxu0 %v5633_v40 }
 0xe84   :  { %7911 = vmatpush3.msra.mxu0 %v5633_v40 }
 0xe85   :  { %7906 = vmatmul.mubr.msk.f32.gmra.mxu0 %vm2464_vm2, %v5444_v37  ;;  %7912 = vmatprep.subr.mxu0 %v5632_v25 }
 0xe86   :  { %7913 = vmatpush3.msra.mxu0 %v5632_v25 }
 0xe87   :  { %7914 = vmatprep.subr.mxu0 %v5631_v59 }
 0xe88   :  { %7915 = vmatpush3.msra.mxu0 %v5631_v59 }
 0xf41   :  { %v7904_v48 = vpop.f32.mrf.mxu0 }
 0xf42   :  { %v5540_v8 = vadd.f32 %v7904_v48, %v6173_v7 }
 0xf43   :  { %v5534_v39 = vpop.f32.mrf.mxu0 }
 0xf44   :  { %v5535_v5 = vadd.f32 %v6173_v7, %v5534_v39  ;;  %v5569_v11 = vmul.f32 %v5540_v8, %v5540_v8  ;;  %v5556_v15 = vsel %vm2464_vm2, %v5540_v8, 0.0 }
 0xf45   :  { %v7907_v54 = vpop.f32.mrf.mxu0 }
 0xf46   :  { %v5555_v16 = vsel %vm2464_vm2, %v5535_v5, 0.0  ;;  %v5568_v17 = vmul.f32 %v5535_v5, %v5535_v5  ;;  %v5550_v6 = vadd.f32 %v7907_v54, %v6173_v7  ;;  %v5573_v10 = vsel %vm2464_vm2, %v5569_v11, 0.0 }
 0xf47   :  { %v5544_v57 = vpop.f32.mrf.mxu0  ;;  %v5557_v46 = vadd.f32 %v5556_v15, %v5555_v16  ;;  %v6180_v16 = vld [vmem:[%s10217_s21] ss:$0 sm:$0xff] }
 0xf48   :  { %v5572_v34 = vsel %vm2464_vm2, %v5568_v17, 0.0  ;;  %v5545_v18 = vadd.f32 %v6173_v7, %v5544_v57  ;;  %v5571_v19 = vmul.f32 %v5550_v6, %v5550_v6  ;;  %v5560_v27 = vsel %vm2464_vm2, %v5550_v6, 0.0 }
 0xf49   :  { %v5574_v63 = vadd.f32 %v5573_v10, %v5572_v34 }
 0xf4a   :  { %v5558_v51 = vsel %vm2464_vm2, %v5545_v18, 0.0  ;;  %v5570_v20 = vmul.f32 %v5545_v18, %v5545_v18  ;;  %v5577_v0 = vsel %vm2464_vm2, %v5571_v19, 0.0 }
 0xf4b   :  { %v5559_v43 = vadd.f32 %v5558_v51, %v5557_v46 }
 0xf4c   :  { %v5575_v49 = vsel %vm2464_vm2, %v5570_v20, 0.0 }
 0xf4d   :  { %v5561_v24 = vadd.f32 %v5560_v27, %v5559_v43  ;;  %v5576_v61 = vadd.f32 %v5575_v49, %v5574_v63 }
 0xf4f   :  { %v5562_v45 = vrot.slane %v5561_v24, 4  ;;  %v5578_v26 = vadd.f32 %v5577_v0, %v5576_v61 }
 0xf51   :  { %v5563_v29 = vadd.f32 %v5562_v45, %v5561_v24  ;;  %v5579_v33 = vrot.slane %v5578_v26, 4 }
 0xf53   :  { %v5564_v56 = vrot.slane %v5563_v29, 2  ;;  %v5580_v60 = vadd.f32 %v5579_v33, %v5578_v26 }
 0xf55   :  { %v5565_v53 = vadd.f32 %v5564_v56, %v5563_v29  ;;  %v5581_v21 = vrot.slane %v5580_v60, 2 }
 0xf57   :  { %v5566_v50 = vrot.slane %v5565_v53, 1  ;;  %v5582_v55 = vadd.f32 %v5581_v21, %v5580_v60 }
 0xf59   :  { %v5567_v30 = vadd.f32 %v5566_v50, %v5565_v53  ;;  %v5583_v12 = vrot.slane %v5582_v55, 1 }
 0xf5b   :  { %v5584_v41 = vadd.f32 %v5583_v12, %v5582_v55  ;;  %v5585_v36 = vmul.f32 0.03125, %v5567_v30 }
 0xf5d   :  { %v5586_v62 = vmul.f32 0.03125, %v5584_v41  ;;  %v5587_v1 = vmul.f32 %v5585_v36, %v5585_v36  ;;  %v5591_v4 = vsub.f32 %v5545_v18, %v5585_v36  ;;  %v5589_v13 = vsub.f32 %v5535_v5, %v5585_v36 }
 0xf5e   :  { %v5590_v28 = vsub.f32 %v5540_v8, %v5585_v36  ;;  %v5592_v35 = vsub.f32 %v5550_v6, %v5585_v36 }
 0xf5f   :  { %v5588_v42 = vsub.f32 %v5586_v62, %v5587_v1 }
 0xf61   :  { %v5593_v47 = vadd.f32 1e-05, %v5588_v42 }
 0xf63   :  { %7931 = vrsqrt.f32 %v5593_v47 }
 0xf70   :  { %v7932_v32 = vpop.eup %7931 }
 0xf71   :  { %v5597_v2 = vmul.f32 %v7932_v32, %v5591_v4  ;;  %v5595_v9 = vmul.f32 %v7932_v32, %v5589_v13  ;;  %v5596_v23 = vmul.f32 %v7932_v32, %v5590_v28  ;;  %v5598_v22 = vmul.f32 %v7932_v32, %v5592_v35 }
 0xf73   :  { %v5607_v14 = vmul.f32 %v6178_v38, %v5597_v2  ;;  %v5605_v31 = vmul.f32 %v6178_v38, %v5595_v9  ;;  %v5606_v58 = vmul.f32 %v6178_v38, %v5596_v23  ;;  %v5608_v3 = vmul.f32 %v6178_v38, %v5598_v22 }
 0xf75   :  { %v5615_v37 = vadd.f32 %v6179_v52, %v5605_v31  ;;  %v5616_v44 = vadd.f32 %v6179_v52, %v5606_v58  ;;  %v5617_v40 = vadd.f32 %v6179_v52, %v5607_v14  ;;  %v5618_v25 = vadd.f32 %v6179_v52, %v5608_v3 }
 0xf77   :  { %vm5619_vm13 = vcmp.ge.f32.partialorder %v5615_v37, 0.0  ;;  %v5623_v59 = vmul.f32 0.01, %v5615_v37  ;;  %vm5620_vm14 = vcmp.ge.f32.partialorder %v5616_v44, 0.0  ;;  %v5624_v7 = vmul.f32 0.01, %v5616_v44 }
 0xf78   :  { %vm5621_vm15 = vcmp.ge.f32.partialorder %v5617_v40, 0.0  ;;  %v5625_v48 = vmul.f32 0.01, %v5617_v40  ;;  %v5626_v5 = vmul.f32 0.01, %v5618_v25  ;;  %vm5622_vm0 = vcmp.ge.f32.partialorder %v5618_v25, 0.0 }
 0xf79   :  { %v5627_v8 = vsel %vm5619_vm13, %v5615_v37, %v5623_v59  ;;  %v5628_v39 = vsel %vm5620_vm14, %v5616_v44, %v5624_v7 }
 0xf7a   :  { %7916 = vmatprep.mubr.msk.f32.mxu0 %vm2464_vm2, %v5627_v8  ;;  %v5629_v54 = vsel %vm5621_vm15, %v5617_v40, %v5625_v48  ;;  %v5630_v11 = vsel %vm5622_vm0, %v5618_v25, %v5626_v5 }
 0xf7b   :  { %7917 = vmatmul.mubr.msk.f32.vlgmr.msra.gmra.mxu0 %vm2464_vm2, %v5628_v39 }
 0xf7c   :  { %7919 = vmatprep.mubr.msk.f32.mxu0 %vm2464_vm2, %v5629_v54 }
 0xf7f   :  { %7920 = vmatmul.mubr.msk.f32.gmra.mxu0 %vm2464_vm2, %v5630_v11 }
0x103b   :  { %v7918_v17 = vpop.f32.mrf.mxu0 }
0x103c   :  { %v5726_v6 = vadd.f32 %v7918_v17, %v6180_v16 }
0x103d   :  { %v5720_v57 = vpop.f32.mrf.mxu0 }
0x103e   :  { %5740 = vst [vmem:[%s10218_s22 + $0x8] sm:$0xff] %v5726_v6  ;;  %v5721_v15 = vadd.f32 %v6180_v16, %v5720_v57 }
0x103f   :  { %v7921_v34 = vpop.f32.mrf.mxu0 }
0x1040   :  { %5739 = vst [vmem:[%s10218_s22] sm:$0xff] %v5721_v15  ;;  %v5736_v18 = vadd.f32 %v7921_v34, %v6180_v16 }
0x1041   :  { %v5730_v46 = vpop.f32.mrf.mxu0 }
0x1042   :  { %5742 = vst [vmem:[%s10218_s22 + $0x18] sm:$0xff] %v5736_v18  ;;  %v5731_v10 = vadd.f32 %v6180_v16, %v5730_v46 }
0x1044   :  { %5741 = vst [vmem:[%s10218_s22 + $0x10] sm:$0xff] %v5731_v10 }

</bundles_post_ra>
